<compile_context>
chip_gen: v7x
topology: tpu7x:2x2x1
jax: 0.10.0
libtpu: 0.0.40
codegen_flags: <defaults>
</compile_context>

<pallas_src>
import functools

import jax
import jax.numpy as jnp
from jax import lax
from jax.experimental import pallas as pl
from jax.experimental.pallas import tpu as pltpu

# ----------------------------------------------------------------------------
# Problem sizes (small, consistent with the module's forward)
# ----------------------------------------------------------------------------
B = 2            # batch
S = 8            # command sequence length
E = 16           # embedding dim
H = 32           # hidden dim
VOCAB_IN = 12    # input (command) vocab
VOCAB_OUT = 16   # output (target) vocab (power of 2: in-kernel //, % become shifts)
C_SIT = 8        # situation channels
HS = WS = 4
G = HS * WS      # situation grid cells
BEAM = 3
TIMES = 2
MAX_LEN = 6
PAD, SOS, EOS = 0, 1, 2

N = B * BEAM               # batch * beam rows
L1 = MAX_LEN + 1
KALL = BEAM * TIMES
NEG = -1e30                # finite stand-in for the reference's -inf masking
_V_SHIFT = VOCAB_OUT.bit_length() - 1
assert VOCAB_OUT == (1 << _V_SHIFT), "VOCAB_OUT must be a power of two"


# ----------------------------------------------------------------------------
# Fused encoder kernel: command/situation encoders, attention key layers,
# masked-mean pooling + decoder-hidden projection -- all in one pallas_call.
# ----------------------------------------------------------------------------
def _encoder_kernel(emb_ref, sit_ref, poolw_ref,
                    w_enc_ref, b_enc_ref, w_sit_ref, b_sit_ref,
                    wk_text_ref, bk_text_ref, wk_vis_ref, bk_vis_ref,
                    w_e2d_ref, b_e2d_ref,
                    pk_text_ref, pk_vis_ref, h0_ref):
    f32 = jnp.float32
    # command encoder + textual attention keys
    enc_cmd = jnp.tanh(
        jnp.dot(emb_ref[...], w_enc_ref[...], preferred_element_type=f32)
        + b_enc_ref[...])                                            # (B*S, H)
    pk_text_ref[...] = (
        jnp.dot(enc_cmd, wk_text_ref[...], preferred_element_type=f32)
        + bk_text_ref[...])
    # situation encoder + visual attention keys
    enc_sit = (jnp.dot(sit_ref[...], w_sit_ref[...], preferred_element_type=f32)
               + b_sit_ref[...])                                     # (B*G, H)
    pk_vis_ref[...] = (
        jnp.dot(enc_sit, wk_vis_ref[...], preferred_element_type=f32)
        + bk_vis_ref[...])
    # TODO(synk): the real model uses an LSTM encoder's final hidden state;
    # masked mean pooling (rows of pool_w are the normalized length masks)
    # stands in here.
    pooled = jnp.dot(poolw_ref[...], enc_cmd, preferred_element_type=f32)  # (B, H)
    h0_ref[...] = jnp.tanh(
        jnp.dot(pooled, w_e2d_ref[...], preferred_element_type=f32)
        + b_e2d_ref[...])


def encoder_pallas(emb_flat, sit_flat, pool_w, params):
    vmem = pl.BlockSpec(memory_space=pltpu.MemorySpace.VMEM)
    out_shapes = (jax.ShapeDtypeStruct((B * S, H), jnp.float32),
                  jax.ShapeDtypeStruct((B * G, H), jnp.float32),
                  jax.ShapeDtypeStruct((B, H), jnp.float32))
    return pl.pallas_call(
        _encoder_kernel,
        out_shape=out_shapes,
        in_specs=[vmem] * 13,
        out_specs=(vmem, vmem, vmem),
    )(emb_flat, sit_flat, pool_w,
      params["w_enc"], params["b_enc"], params["w_sit"], params["b_sit"],
      params["wk_text"], params["bk_text"], params["wk_vis"], params["bk_vis"],
      params["w_e2d"], params["b_e2d"])


# ----------------------------------------------------------------------------
# Fused decode-loop kernel: attention + LSTM + log-softmax + beam search,
# grid=(MAX_LEN,), weights & state resident in VMEM for the whole generation.
# ----------------------------------------------------------------------------
def _stack_rows(rows, n_rows):
    """Stack a list of (1, C) arrays into (n_rows, C) via iota + select."""
    c = rows[0].shape[-1]
    out = jnp.zeros((n_rows, c), rows[0].dtype)
    ridx = lax.broadcasted_iota(jnp.int32, (n_rows, c), 0)
    for r, row in enumerate(rows):
        out = jnp.where(ridx == r, row, out)
    return out


def _fused_decode_kernel(h0_ref, ktT_ref, kt_ref, amt_ref, kvT_ref, kv_ref, amv_ref,
                         embo_ref, wcat_ref, bg_ref, wout_ref, bout_ref,
                         gen_ref, scores_ref, prefsteps_ref,
                         h_s, c_s, cum_s, tokoh_s, prefix_s,
                         *, force_align):
    p = pl.program_id(0)
    f32 = jnp.float32
    bf16 = jnp.bfloat16

    # ---- step-0 init: decoder state + generated / scores / prefix buffers ----
    @pl.when(p == 0)
    def _init():
        h_s[...] = h0_ref[...]
        c_s[...] = jnp.zeros((N, H), f32)
        cum_s[...] = jnp.zeros((N, 1), f32)
        voc0 = lax.broadcasted_iota(jnp.int32, (N, VOCAB_OUT), 1)
        tokoh_s[...] = (voc0 == SOS).astype(f32)
        gen_ref[...] = jnp.full((N, L1), SOS, jnp.int32)
        scores_ref[...] = jnp.zeros((N, L1), f32)
        prefix_s[...] = jnp.full((B, KALL, L1), SOS, jnp.int32)

    h = h_s[...]
    c = c_s[...]

    # ---- token embedding: one-hot @ table (MXU) -------------------------------
    x_emb = jnp.dot(tokoh_s[...].astype(bf16), embo_ref[...],
                    preferred_element_type=f32)                      # (N, E)

    # ---- textual attention: block-diagonal keys -> plain 2-D MXU matmuls ------
    sc_t = jnp.dot(h.astype(bf16), ktT_ref[...], preferred_element_type=f32)  # (N, B*S)
    sc_t = jnp.where(amt_ref[...] > 0.0, sc_t, NEG)
    sc_t = sc_t - jnp.max(sc_t, axis=-1, keepdims=True)
    e_t = jnp.exp(sc_t)
    a_t = e_t * pl.reciprocal(jnp.sum(e_t, axis=-1, keepdims=True), approx=True)
    ctx_t = jnp.dot(a_t.astype(bf16), kt_ref[...], preferred_element_type=f32)  # (N, H)

    # ---- visual attention ------------------------------------------------------
    sc_v = jnp.dot(h.astype(bf16), kvT_ref[...], preferred_element_type=f32)  # (N, B*G)
    sc_v = jnp.where(amv_ref[...] > 0.0, sc_v, NEG)
    sc_v = sc_v - jnp.max(sc_v, axis=-1, keepdims=True)
    e_v = jnp.exp(sc_v)
    a_v = e_v * pl.reciprocal(jnp.sum(e_v, axis=-1, keepdims=True), approx=True)
    ctx_v = jnp.dot(a_v.astype(bf16), kv_ref[...], preferred_element_type=f32)  # (N, H)

    # ---- LSTM cell: single concatenated-gate MXU matmul ------------------------
    x_cat = jnp.concatenate([x_emb, ctx_t, ctx_v, h], axis=-1)       # (N, E+3H)
    gates = (jnp.dot(x_cat.astype(bf16), wcat_ref[...], preferred_element_type=f32)
             + bg_ref[...])                                          # (N, 4H)

    def sigmoid(z):
        return 1.0 / (1.0 + jnp.exp(-z))

    i_g = sigmoid(gates[:, 0 * H:1 * H])
    f_g = sigmoid(gates[:, 1 * H:2 * H])
    g_g = jnp.tanh(gates[:, 2 * H:3 * H])
    o_g = sigmoid(gates[:, 3 * H:4 * H])
    c_new = f_g * c + i_g * g_g
    h_new = o_g * jnp.tanh(c_new)

    # ---- output projection + log_softmax + PAD/SOS(/EOS) masking ---------------
    logits = (jnp.dot(h_new.astype(bf16), wout_ref[...], preferred_element_type=f32)
              + bout_ref[...])                                       # (N, V)
    z = logits - jnp.max(logits, axis=-1, keepdims=True)
    logp = z - jnp.log(jnp.sum(jnp.exp(z), axis=-1, keepdims=True))
    voc = lax.broadcasted_iota(jnp.int32, (N, VOCAB_OUT), 1)
    banned = jnp.logical_or(voc == PAD, voc == SOS)
    if force_align:
        banned = jnp.logical_or(banned, voc == EOS)
    # Reference masks with -inf; a large finite value keeps the cumulative-score
    # arithmetic NaN-free and selects the same tokens.
    logp = jnp.where(banned, NEG, logp)

    # ---- in-kernel beam search (B, BEAM, TIMES are tiny compile-time consts) ---
    cand = logp + cum_s[...]                                         # (N, V)
    rowi = lax.broadcasted_iota(jnp.int32, (N, VOCAB_OUT), 0)
    is_beam0 = rowi == 0
    for b in range(1, B):
        is_beam0 = jnp.logical_or(is_beam0, rowi == b * BEAM)
    # position 0: only beam 0 of each batch competes (reference's [:, ::beam, :])
    cand = jnp.where(jnp.logical_and(p == 0, jnp.logical_not(is_beam0)), NEG, cand)

    flat_iota = (jnp.left_shift(
        lax.broadcasted_iota(jnp.int32, (BEAM, VOCAB_OUT), 0), _V_SHIFT)
        + lax.broadcasted_iota(jnp.int32, (BEAM, VOCAB_OUT), 1))
    flat_iota_f = flat_iota.astype(f32)
    gidx = lax.broadcasted_iota(jnp.int32, (1, N), 1)
    beam_iota = lax.broadcasted_iota(jnp.int32, (1, BEAM), 1)

    sel_rows, word_rows, cum_rows = [], [], []
    all_word_cols, all_beam_oh = [], []
    for b in range(B):
        work = cand[b * BEAM:(b + 1) * BEAM, :]                      # (BEAM, V)
        vals, idxs = [], []
        for _k in range(KALL):                                       # iterative top-k
            m = jnp.max(jnp.max(work, axis=1, keepdims=True), axis=0, keepdims=True)
            hit = work == m
            cidx = jnp.where(hit, flat_iota_f, float(BEAM * VOCAB_OUT))
            idx = jnp.min(jnp.min(cidx, axis=1, keepdims=True),
                          axis=0, keepdims=True).astype(jnp.int32)   # (1, 1)
            vals.append(m)
            idxs.append(idx)
            work = jnp.where(flat_iota == idx, -3.0e38, work)
        for k in range(BEAM):                                        # new beam slots
            word = jnp.bitwise_and(idxs[k], VOCAB_OUT - 1)
            beam = jnp.right_shift(idxs[k], _V_SHIFT)
            word_rows.append(word)
            cum_rows.append(vals[k])
            sel_rows.append((gidx == beam + b * BEAM).astype(f32))   # (1, N)
        aw, ab = [], []
        for k in range(KALL):                                        # all-candidate set
            aw.append(jnp.bitwise_and(idxs[k], VOCAB_OUT - 1))
            ab.append((beam_iota == jnp.right_shift(idxs[k], _V_SHIFT)).astype(f32))
        all_word_cols.append(_stack_rows(aw, KALL))                  # (KALL, 1) i32
        all_beam_oh.append(_stack_rows(ab, KALL))                    # (KALL, BEAM) f32

    sel = _stack_rows(sel_rows, N)                                   # (N, N) one-hot
    word_col = _stack_rows(word_rows, N)                             # (N, 1) i32
    cum_col = _stack_rows(cum_rows, N)                               # (N, 1) f32

    # ---- reorder state / tokens by selected beams (one-hot gathers) ------------
    gen_old_f = gen_ref[...].astype(f32)
    gen_g = jnp.sum(sel[:, :, None] * gen_old_f[None, :, :], axis=1).astype(jnp.int32)
    col = lax.broadcasted_iota(jnp.int32, (N, L1), 1)
    gen_new = jnp.where(col == p + 1, word_col, gen_g)               # (N, L1)
    gen_ref[...] = gen_new
    scores_ref[...] = jnp.where(col == p, cum_col, scores_ref[...])

    h_s[...] = jnp.sum(sel[:, :, None] * h_new[None, :, :], axis=1)
    c_s[...] = jnp.sum(sel[:, :, None] * c_new[None, :, :], axis=1)
    cum_s[...] = cum_col
    tokoh_s[...] = (voc == word_col).astype(f32)

    # ---- prefix-token bookkeeping (mirrors the reference's two branches) -------
    @pl.when(p > 1)
    def _prefix_late():
        colp = lax.broadcasted_iota(jnp.int32, (KALL, L1), 1)
        for b in range(B):
            gen_b = gen_new[b * BEAM:(b + 1) * BEAM, :].astype(f32)  # (BEAM, L1)
            gath = jnp.sum(all_beam_oh[b][:, :, None] * gen_b[None, :, :],
                           axis=1).astype(jnp.int32)                 # (KALL, L1)
            prefix_s[b] = jnp.where(
                colp <= p, gath,
                jnp.where(colp == p + 1, all_word_cols[b], prefix_s[b]))

    @pl.when(p <= 1)
    def _prefix_early():
        rowp = lax.broadcasted_iota(jnp.int32, (KALL, L1), 0)
        r_oh = (lax.broadcasted_iota(jnp.int32, (KALL, BEAM), 0)
                == lax.broadcasted_iota(jnp.int32, (KALL, BEAM), 1)).astype(f32)
        for b in range(B):
            gen_b = gen_new[b * BEAM:(b + 1) * BEAM, :].astype(f32)
            padded = jnp.sum(r_oh[:, :, None] * gen_b[None, :, :],
                             axis=1).astype(jnp.int32)               # (KALL, L1)
            prefix_s[b] = jnp.where(rowp < BEAM, padded, prefix_s[b])

    # per-position snapshot (used by the wrapper to build decode_dict)
    prefsteps_ref[0] = prefix_s[...]
    # TODO(synk): data-dependent early break on all-EOS is omitted; with
    # force_align=True EOS is masked so it never fires in the reference either.


# ----------------------------------------------------------------------------
# Deterministic parameter init (synthetic stand-in for the wrapped model)
# ----------------------------------------------------------------------------
def init_params(key):
    ks = jax.random.split(key, 12)

    def w(k, shape, scale=0.1):
        return jax.random.normal(k, shape, jnp.float32) * scale

    zeros = lambda *s: jnp.zeros(s, jnp.float32)
    return {
        "emb_in": w(ks[0], (VOCAB_IN, E)),
        "w_enc": w(ks[1], (E, H)), "b_enc": zeros(1, H),
        "w_sit": w(ks[2], (C_SIT, H)), "b_sit": zeros(1, H),
        "wk_vis": w(ks[3], (H, H)), "bk_vis": zeros(1, H),
        "wk_text": w(ks[4], (H, H)), "bk_text": zeros(1, H),
        "w_e2d": w(ks[5], (H, H)), "b_e2d": zeros(1, H),
        "emb_out": w(ks[6], (VOCAB_OUT, E)),
        "w_xe": w(ks[7], (E, 4 * H)), "w_ct": w(ks[8], (H, 4 * H)),
        "w_cv": w(ks[9], (H, 4 * H)), "w_hh": w(ks[10], (H, 4 * H)),
        "b_g": zeros(1, 4 * H),
        "w_out": w(ks[11], (H, VOCAB_OUT)), "b_out": zeros(1, VOCAB_OUT),
    }


# ----------------------------------------------------------------------------
# SequenceGeneratorV3.forward
# ----------------------------------------------------------------------------
@functools.partial(jax.jit, static_argnames=("required_length_list", "force_align"))
def _forward_impl(params, input_sequence, input_lengths, situation,
                  required_length_list, force_align):
    batch_size, seq_len = input_sequence.shape

    # -------- encoder (one fused Pallas kernel) --------
    emb = params["emb_in"][input_sequence]                           # (B, S, E)
    len_mask = (jnp.arange(seq_len)[None, :] < input_lengths[:, None]).astype(jnp.float32)
    norm_mask = len_mask / jnp.sum(len_mask, axis=1, keepdims=True)
    pool_w = (jnp.eye(batch_size, dtype=jnp.float32)[:, :, None]
              * norm_mask[:, None, :]).reshape(batch_size, batch_size * seq_len)
    sit = jnp.transpose(situation, (0, 2, 3, 1)).reshape(batch_size * G, C_SIT)

    pk_text, pk_vis, h0 = encoder_pallas(
        emb.reshape(batch_size * seq_len, E).astype(jnp.float32),
        sit.astype(jnp.float32), pool_w, params)

    # -------- beam expansion + block-diagonal attention layout --------
    # Keys are shared across beams of a batch, so the decode kernel attends with
    # plain 2-D MXU matmuls against the concatenated keys of ALL batches; the
    # per-row mask selects the own batch block (+ textual length mask).
    batch_of_row = jnp.repeat(jnp.arange(batch_size), BEAM)          # (N,)
    amask_t = ((batch_of_row[:, None]
                == jnp.repeat(jnp.arange(batch_size), seq_len)[None, :])
               .astype(jnp.float32) * len_mask.reshape(1, batch_size * seq_len))
    amask_v = (batch_of_row[:, None]
               == jnp.repeat(jnp.arange(batch_size), G)[None, :]).astype(jnp.float32)
    h0_exp = jnp.repeat(h0, BEAM, axis=0)                            # (N, H)

    bf = jnp.bfloat16
    kt = pk_text.astype(bf)                                          # (B*S, H)
    ktT = pk_text.T.astype(bf)                                       # (H, B*S)
    kv = pk_vis.astype(bf)                                           # (B*G, H)
    kvT = pk_vis.T.astype(bf)                                        # (H, B*G)
    w_cat = jnp.concatenate([params["w_xe"], params["w_ct"],
                             params["w_cv"], params["w_hh"]], axis=0).astype(bf)
    emb_out = params["emb_out"].astype(bf)
    w_out = params["w_out"].astype(bf)

    decode_in = (h0_exp, ktT, kt, amask_t, kvT, kv, amask_v,
                 emb_out, w_cat, params["b_g"], w_out, params["b_out"])

    const2d = lambda p: (0, 0)                                       # resident blocks
    in_specs = [pl.BlockSpec(x.shape, const2d) for x in decode_in]
    out_shapes = (jax.ShapeDtypeStruct((N, L1), jnp.int32),
                  jax.ShapeDtypeStruct((N, L1), jnp.float32),
                  jax.ShapeDtypeStruct((MAX_LEN, B, KALL, L1), jnp.int32))
    out_specs = (pl.BlockSpec((N, L1), const2d),
                 pl.BlockSpec((N, L1), const2d),
                 pl.BlockSpec((1, B, KALL, L1), lambda p: (p, 0, 0, 0)))
    scratch = [pltpu.VMEM((N, H), jnp.float32),          # h state
               pltpu.VMEM((N, H), jnp.float32),          # c state
               pltpu.VMEM((N, 1), jnp.float32),          # cumulative beam scores
               pltpu.VMEM((N, VOCAB_OUT), jnp.float32),  # current-token one-hot
               pltpu.VMEM((B, KALL, L1), jnp.int32)]     # prefix tokens

    generated, scores, prefix_steps = pl.pallas_call(
        functools.partial(_fused_decode_kernel, force_align=force_align),
        out_shape=out_shapes,
        grid_spec=pltpu.PrefetchScalarGridSpec(
            num_scalar_prefetch=0, grid=(MAX_LEN,),
            in_specs=in_specs, out_specs=out_specs,
            scratch_shapes=scratch),
        compiler_params=pltpu.CompilerParams(
            dimension_semantics=("arbitrary",)),
    )(*decode_in)

    # -------- decode_dict (static required lengths, from per-step prefixes) ----
    decode_dict = {}
    for t in required_length_list:
        if t == 1:
            decode_dict[t] = prefix_steps[0][:, :BEAM, 1:2]
        else:
            decode_dict[t] = prefix_steps[t - 1][:, :, 1:t + 1]

    # -------- final selection (faithful to the reference, including its
    # scores[:, position + 1] read that is never written => always beam 0) ------
    final_scores = scores[:, MAX_LEN]
    best_beam = jnp.argmax(final_scores.reshape(batch_size, BEAM), axis=-1)
    gen3 = generated.reshape(batch_size, BEAM, L1)
    best_sentences = gen3[jnp.arange(batch_size), best_beam]
    return best_sentences[:, 1:], decode_dict


def sequence_generator_v3_forward(params, batch_data, required_length_list=(),
                                  force_align=True):
    (input_sequence, input_lengths, _deriv, situation, _sit_spec,
     _tgt_seq, _tgt_len, _agent_pos, _tgt_pos) = batch_data
    input_lengths = jnp.asarray(input_lengths, jnp.int32)
    return _forward_impl(params, input_sequence, input_lengths, situation,
                         tuple(required_length_list), bool(force_align))


# ----------------------------------------------------------------------------
if __name__ == "__main__":
    key = jax.random.PRNGKey(0)
    pkey, k_seq, k_sit = jax.random.split(key, 3)
    params = init_params(pkey)

    input_sequence = jax.random.randint(k_seq, (B, S), 3, VOCAB_IN, dtype=jnp.int32)
    input_lengths = [S, S - 3]
    situation = jax.random.normal(k_sit, (B, C_SIT, HS, WS), jnp.float32)  # NCHW
    batch_data = (input_sequence, input_lengths, None, situation, None,
                  None, None, None, None)

    best_sentences, decode_dict = sequence_generator_v3_forward(
        params, batch_data, required_length_list=(), force_align=True)
    best_sentences = jax.block_until_ready(best_sentences)

    assert best_sentences.shape == (B, MAX_LEN)
    assert best_sentences.dtype == jnp.int32
    print("KERNEL_OK")
</pallas_src>

<mosaic_0001>
module attributes {stable_mosaic.version = 11 : i64} {
  func.func @_encoder_kernel(%arg0: memref<16x16xf32, #tpu.memory_space<vmem>>, %arg1: memref<32x8xf32, #tpu.memory_space<vmem>>, %arg2: memref<2x16xf32, #tpu.memory_space<vmem>>, %arg3: memref<16x32xf32, #tpu.memory_space<vmem>>, %arg4: memref<1x32xf32, #tpu.memory_space<vmem>>, %arg5: memref<8x32xf32, #tpu.memory_space<vmem>>, %arg6: memref<1x32xf32, #tpu.memory_space<vmem>>, %arg7: memref<32x32xf32, #tpu.memory_space<vmem>>, %arg8: memref<1x32xf32, #tpu.memory_space<vmem>>, %arg9: memref<32x32xf32, #tpu.memory_space<vmem>>, %arg10: memref<1x32xf32, #tpu.memory_space<vmem>>, %arg11: memref<32x32xf32, #tpu.memory_space<vmem>>, %arg12: memref<1x32xf32, #tpu.memory_space<vmem>>, %arg13: memref<16x32xf32, #tpu.memory_space<vmem>>, %arg14: memref<32x32xf32, #tpu.memory_space<vmem>>, %arg15: memref<2x32xf32, #tpu.memory_space<vmem>>) attributes {dimension_semantics = [], scalar_prefetch = 0 : i64, scratch_operands = 0 : i64, tpu.core_type = #tpu.core_type<tc>} {
    %c0 = arith.constant 0 : index
    %c0_0 = arith.constant 0 : index
    %0 = vector.load %arg0[%c0, %c0_0] : memref<16x16xf32, #tpu.memory_space<vmem>>, vector<16x16xf32>
    %c0_1 = arith.constant 0 : index
    %c0_2 = arith.constant 0 : index
    %1 = vector.load %arg3[%c0_1, %c0_2] : memref<16x32xf32, #tpu.memory_space<vmem>>, vector<16x32xf32>
    %cst = arith.constant dense<0.000000e+00> : vector<16x32xf32>
    %2 = tpu.matmul %0, %1, %cst {dimension_numbers = #tpu.dot_dimension_numbers<[1], [0], [0], [1], [0, 0, 1, 1], [], []>} : vector<16x16xf32>, vector<16x32xf32>, vector<16x32xf32> -> vector<16x32xf32>
    %c0_3 = arith.constant 0 : index
    %c0_4 = arith.constant 0 : index
    %3 = vector.load %arg4[%c0_3, %c0_4] : memref<1x32xf32, #tpu.memory_space<vmem>>, vector<1x32xf32>
    %4 = vector.broadcast %3 : vector<1x32xf32> to vector<16x32xf32>
    %5 = arith.addf %2, %4 : vector<16x32xf32>
    %6 = math.tanh %5 : vector<16x32xf32>
    %c0_5 = arith.constant 0 : index
    %c0_6 = arith.constant 0 : index
    %7 = vector.load %arg7[%c0_5, %c0_6] : memref<32x32xf32, #tpu.memory_space<vmem>>, vector<32x32xf32>
    %cst_7 = arith.constant dense<0.000000e+00> : vector<16x32xf32>
    %8 = tpu.matmul %6, %7, %cst_7 {dimension_numbers = #tpu.dot_dimension_numbers<[1], [0], [0], [1], [0, 0, 1, 1], [], []>} : vector<16x32xf32>, vector<32x32xf32>, vector<16x32xf32> -> vector<16x32xf32>
    %c0_8 = arith.constant 0 : index
    %c0_9 = arith.constant 0 : index
    %9 = vector.load %arg8[%c0_8, %c0_9] : memref<1x32xf32, #tpu.memory_space<vmem>>, vector<1x32xf32>
    %10 = vector.broadcast %9 : vector<1x32xf32> to vector<16x32xf32>
    %11 = arith.addf %8, %10 : vector<16x32xf32>
    %c0_10 = arith.constant 0 : index
    %c0_11 = arith.constant 0 : index
    %12 = vector.load %arg13[%c0_10, %c0_11] : memref<16x32xf32, #tpu.memory_space<vmem>>, vector<16x32xf32>
    tpu.vector_store %arg13[%c0_10, %c0_11], %11 {strides = array<i32>} : memref<16x32xf32, #tpu.memory_space<vmem>>, vector<16x32xf32>,
    %c0_12 = arith.constant 0 : index
    %c0_13 = arith.constant 0 : index
    %13 = vector.load %arg1[%c0_12, %c0_13] : memref<32x8xf32, #tpu.memory_space<vmem>>, vector<32x8xf32>
    %c0_14 = arith.constant 0 : index
    %c0_15 = arith.constant 0 : index
    %14 = vector.load %arg5[%c0_14, %c0_15] : memref<8x32xf32, #tpu.memory_space<vmem>>, vector<8x32xf32>
    %cst_16 = arith.constant dense<0.000000e+00> : vector<32x32xf32>
    %15 = tpu.matmul %13, %14, %cst_16 {dimension_numbers = #tpu.dot_dimension_numbers<[1], [0], [0], [1], [0, 0, 1, 1], [], []>} : vector<32x8xf32>, vector<8x32xf32>, vector<32x32xf32> -> vector<32x32xf32>
    %c0_17 = arith.constant 0 : index
    %c0_18 = arith.constant 0 : index
    %16 = vector.load %arg6[%c0_17, %c0_18] : memref<1x32xf32, #tpu.memory_space<vmem>>, vector<1x32xf32>
    %17 = vector.broadcast %16 : vector<1x32xf32> to vector<32x32xf32>
    %18 = arith.addf %15, %17 : vector<32x32xf32>
    %c0_19 = arith.constant 0 : index
    %c0_20 = arith.constant 0 : index
    %19 = vector.load %arg9[%c0_19, %c0_20] : memref<32x32xf32, #tpu.memory_space<vmem>>, vector<32x32xf32>
    %cst_21 = arith.constant dense<0.000000e+00> : vector<32x32xf32>
    %20 = tpu.matmul %18, %19, %cst_21 {dimension_numbers = #tpu.dot_dimension_numbers<[1], [0], [0], [1], [0, 0, 1, 1], [], []>} : vector<32x32xf32>, vector<32x32xf32>, vector<32x32xf32> -> vector<32x32xf32>
    %c0_22 = arith.constant 0 : index
    %c0_23 = arith.constant 0 : index
    %21 = vector.load %arg10[%c0_22, %c0_23] : memref<1x32xf32, #tpu.memory_space<vmem>>, vector<1x32xf32>
    %22 = vector.broadcast %21 : vector<1x32xf32> to vector<32x32xf32>
    %23 = arith.addf %20, %22 : vector<32x32xf32>
    %c0_24 = arith.constant 0 : index
    %c0_25 = arith.constant 0 : index
    %24 = vector.load %arg14[%c0_24, %c0_25] : memref<32x32xf32, #tpu.memory_space<vmem>>, vector<32x32xf32>
    tpu.vector_store %arg14[%c0_24, %c0_25], %23 {strides = array<i32>} : memref<32x32xf32, #tpu.memory_space<vmem>>, vector<32x32xf32>,
    %c0_26 = arith.constant 0 : index
    %c0_27 = arith.constant 0 : index
    %25 = vector.load %arg2[%c0_26, %c0_27] : memref<2x16xf32, #tpu.memory_space<vmem>>, vector<2x16xf32>
    %cst_28 = arith.constant dense<0.000000e+00> : vector<2x32xf32>
    %26 = tpu.matmul %25, %6, %cst_28 {dimension_numbers = #tpu.dot_dimension_numbers<[1], [0], [0], [1], [0, 0, 1, 1], [], []>} : vector<2x16xf32>, vector<16x32xf32>, vector<2x32xf32> -> vector<2x32xf32>
    %c0_29 = arith.constant 0 : index
    %c0_30 = arith.constant 0 : index
    %27 = vector.load %arg11[%c0_29, %c0_30] : memref<32x32xf32, #tpu.memory_space<vmem>>, vector<32x32xf32>
    %cst_31 = arith.constant dense<0.000000e+00> : vector<2x32xf32>
    %28 = tpu.matmul %26, %27, %cst_31 {dimension_numbers = #tpu.dot_dimension_numbers<[1], [0], [0], [1], [0, 0, 1, 1], [], []>} : vector<2x32xf32>, vector<32x32xf32>, vector<2x32xf32> -> vector<2x32xf32>
    %c0_32 = arith.constant 0 : index
    %c0_33 = arith.constant 0 : index
    %29 = vector.load %arg12[%c0_32, %c0_33] : memref<1x32xf32, #tpu.memory_space<vmem>>, vector<1x32xf32>
    %30 = vector.broadcast %29 : vector<1x32xf32> to vector<2x32xf32>
    %31 = arith.addf %28, %30 : vector<2x32xf32>
    %32 = math.tanh %31 : vector<2x32xf32>
    %c0_34 = arith.constant 0 : index
    %c0_35 = arith.constant 0 : index
    %33 = vector.load %arg15[%c0_34, %c0_35] : memref<2x32xf32, #tpu.memory_space<vmem>>, vector<2x32xf32>
    tpu.vector_store %arg15[%c0_34, %c0_35], %32 {strides = array<i32>} : memref<2x32xf32, #tpu.memory_space<vmem>>, vector<2x32xf32>,
    return
  }
}

module attributes {stable_mosaic.version = 11 : i64} {
  func.func @_fused_decode_kernel(%arg0: i32, %arg1: memref<6x32xf32, #tpu.memory_space<vmem>>, %arg2: memref<32x16xbf16, #tpu.memory_space<vmem>>, %arg3: memref<16x32xbf16, #tpu.memory_space<vmem>>, %arg4: memref<6x16xf32, #tpu.memory_space<vmem>>, %arg5: memref<32x32xbf16, #tpu.memory_space<vmem>>, %arg6: memref<32x32xbf16, #tpu.memory_space<vmem>>, %arg7: memref<6x32xf32, #tpu.memory_space<vmem>>, %arg8: memref<16x16xbf16, #tpu.memory_space<vmem>>, %arg9: memref<112x128xbf16, #tpu.memory_space<vmem>>, %arg10: memref<1x128xf32, #tpu.memory_space<vmem>>, %arg11: memref<32x16xbf16, #tpu.memory_space<vmem>>, %arg12: memref<1x16xf32, #tpu.memory_space<vmem>>, %arg13: memref<6x7xi32, #tpu.memory_space<vmem>>, %arg14: memref<6x7xf32, #tpu.memory_space<vmem>>, %arg15: memref<1x2x6x7xi32, #tpu.memory_space<vmem>>, %arg16: memref<6x32xf32, #tpu.memory_space<vmem>>, %arg17: memref<6x32xf32, #tpu.memory_space<vmem>>, %arg18: memref<6x1xf32, #tpu.memory_space<vmem>>, %arg19: memref<6x16xf32, #tpu.memory_space<vmem>>, %arg20: memref<2x6x7xi32, #tpu.memory_space<vmem>>) attributes {dimension_semantics = [#tpu.dimension_semantics<arbitrary>], iteration_bounds = array<i64: 6>, scalar_prefetch = 0 : i64, scratch_operands = 5 : i64, tpu.core_type = #tpu.core_type<tc>, window_params = [{pipeline_mode = #tpu.pipeline_mode<synchronous>, transform_indices = @transform_0, window_bounds = array<i64: 6, 32>}, {pipeline_mode = #tpu.pipeline_mode<synchronous>, transform_indices = @transform_1, window_bounds = array<i64: 32, 16>}, {pipeline_mode = #tpu.pipeline_mode<synchronous>, transform_indices = @transform_2, window_bounds = array<i64: 16, 32>}, {pipeline_mode = #tpu.pipeline_mode<synchronous>, transform_indices = @transform_3, window_bounds = array<i64: 6, 16>}, {pipeline_mode = #tpu.pipeline_mode<synchronous>, transform_indices = @transform_4, window_bounds = array<i64: 32, 32>}, {pipeline_mode = #tpu.pipeline_mode<synchronous>, transform_indices = @transform_5, window_bounds = array<i64: 32, 32>}, {pipeline_mode = #tpu.pipeline_mode<synchronous>, transform_indices = @transform_6, window_bounds = array<i64: 6, 32>}, {pipeline_mode = #tpu.pipeline_mode<synchronous>, transform_indices = @transform_7, window_bounds = array<i64: 16, 16>}, {pipeline_mode = #tpu.pipeline_mode<synchronous>, transform_indices = @transform_8, window_bounds = array<i64: 112, 128>}, {pipeline_mode = #tpu.pipeline_mode<synchronous>, transform_indices = @transform_9, window_bounds = array<i64: 1, 128>}, {pipeline_mode = #tpu.pipeline_mode<synchronous>, transform_indices = @transform_10, window_bounds = array<i64: 32, 16>}, {pipeline_mode = #tpu.pipeline_mode<synchronous>, transform_indices = @transform_11, window_bounds = array<i64: 1, 16>}, {pipeline_mode = #tpu.pipeline_mode<synchronous>, transform_indices = @transform_12, window_bounds = array<i64: 6, 7>}, {pipeline_mode = #tpu.pipeline_mode<synchronous>, transform_indices = @transform_13, window_bounds = array<i64: 6, 7>}, {transform_indices = @transform_14, window_bounds = array<i64: 1, 2, 6, 7>}]} {
    %c0_i32 = arith.constant 0 : i32
    %0 = arith.cmpi eq, %arg0, %c0_i32 : i32
    %1 = arith.extui %0 : i1 to i32
    %c0_i32_0 = arith.constant 0 : i32
    %2 = arith.cmpi ne, %1, %c0_i32_0 : i32
    scf.if %2 {
      %c0_251 = arith.constant 0 : index
      %c0_252 = arith.constant 0 : index
      %771 = vector.load %arg1[%c0_251, %c0_252] : memref<6x32xf32, #tpu.memory_space<vmem>>, vector<6x32xf32>
      %c0_253 = arith.constant 0 : index
      %c0_254 = arith.constant 0 : index
      %772 = vector.load %arg16[%c0_253, %c0_254] : memref<6x32xf32, #tpu.memory_space<vmem>>, vector<6x32xf32>
      tpu.vector_store %arg16[%c0_253, %c0_254], %771 {strides = array<i32>} : memref<6x32xf32, #tpu.memory_space<vmem>>, vector<6x32xf32>,
      %cst_255 = arith.constant 0.000000e+00 : f32
      %773 = vector.broadcast %cst_255 : f32 to vector<6x32xf32>
      %c0_256 = arith.constant 0 : index
      %c0_257 = arith.constant 0 : index
      %774 = vector.load %arg17[%c0_256, %c0_257] : memref<6x32xf32, #tpu.memory_space<vmem>>, vector<6x32xf32>
      tpu.vector_store %arg17[%c0_256, %c0_257], %773 {strides = array<i32>} : memref<6x32xf32, #tpu.memory_space<vmem>>, vector<6x32xf32>,
      %cst_258 = arith.constant 0.000000e+00 : f32
      %775 = vector.broadcast %cst_258 : f32 to vector<6x1xf32>
      %c0_259 = arith.constant 0 : index
      %c0_260 = arith.constant 0 : index
      %776 = vector.load %arg18[%c0_259, %c0_260] : memref<6x1xf32, #tpu.memory_space<vmem>>, vector<6x1xf32>
      tpu.vector_store %arg18[%c0_259, %c0_260], %775 {strides = array<i32>} : memref<6x1xf32, #tpu.memory_space<vmem>>, vector<6x1xf32>,
      %777 = tpu.iota {dimensions = array<i32: 1>} : vector<6x16xi32>
      %c1_i32_261 = arith.constant 1 : i32
      %778 = vector.broadcast %c1_i32_261 : i32 to vector<6x16xi32>
      %779 = arith.cmpi eq, %777, %778 : vector<6x16xi32>
      %780 = arith.extui %779 : vector<6x16xi1> to vector<6x16xi32>
      %781 = arith.sitofp %780 : vector<6x16xi32> to vector<6x16xf32>
      %c0_262 = arith.constant 0 : index
      %c0_263 = arith.constant 0 : index
      %782 = vector.load %arg19[%c0_262, %c0_263] : memref<6x16xf32, #tpu.memory_space<vmem>>, vector<6x16xf32>
      tpu.vector_store %arg19[%c0_262, %c0_263], %781 {strides = array<i32>} : memref<6x16xf32, #tpu.memory_space<vmem>>, vector<6x16xf32>,
      %c1_i32_264 = arith.constant 1 : i32
      %783 = vector.broadcast %c1_i32_264 : i32 to vector<6x7xi32>
      %c0_265 = arith.constant 0 : index
      %c0_266 = arith.constant 0 : index
      %784 = vector.load %arg13[%c0_265, %c0_266] : memref<6x7xi32, #tpu.memory_space<vmem>>, vector<6x7xi32>
      tpu.vector_store %arg13[%c0_265, %c0_266], %783 {strides = array<i32>} : memref<6x7xi32, #tpu.memory_space<vmem>>, vector<6x7xi32>,
      %cst_267 = arith.constant 0.000000e+00 : f32
      %785 = vector.broadcast %cst_267 : f32 to vector<6x7xf32>
      %c0_268 = arith.constant 0 : index
      %c0_269 = arith.constant 0 : index
      %786 = vector.load %arg14[%c0_268, %c0_269] : memref<6x7xf32, #tpu.memory_space<vmem>>, vector<6x7xf32>
      tpu.vector_store %arg14[%c0_268, %c0_269], %785 {strides = array<i32>} : memref<6x7xf32, #tpu.memory_space<vmem>>, vector<6x7xf32>,
      %c1_i32_270 = arith.constant 1 : i32
      %787 = vector.broadcast %c1_i32_270 : i32 to vector<2x6x7xi32>
      %c0_271 = arith.constant 0 : index
      %c0_272 = arith.constant 0 : index
      %c0_273 = arith.constant 0 : index
      %788 = vector.load %arg20[%c0_271, %c0_272, %c0_273] : memref<2x6x7xi32, #tpu.memory_space<vmem>>, vector<2x6x7xi32>
      tpu.vector_store %arg20[%c0_271, %c0_272, %c0_273], %787 {strides = array<i32>} : memref<2x6x7xi32, #tpu.memory_space<vmem>>, vector<2x6x7xi32>,
    } else {
    }
    %c0 = arith.constant 0 : index
    %c0_1 = arith.constant 0 : index
    %3 = vector.load %arg16[%c0, %c0_1] : memref<6x32xf32, #tpu.memory_space<vmem>>, vector<6x32xf32>
    %c0_2 = arith.constant 0 : index
    %c0_3 = arith.constant 0 : index
    %4 = vector.load %arg17[%c0_2, %c0_3] : memref<6x32xf32, #tpu.memory_space<vmem>>, vector<6x32xf32>
    %c0_4 = arith.constant 0 : index
    %c0_5 = arith.constant 0 : index
    %5 = vector.load %arg19[%c0_4, %c0_5] : memref<6x16xf32, #tpu.memory_space<vmem>>, vector<6x16xf32>
    %6 = arith.truncf %5 : vector<6x16xf32> to vector<6x16xbf16>
    %c0_6 = arith.constant 0 : index
    %c0_7 = arith.constant 0 : index
    %7 = vector.load %arg8[%c0_6, %c0_7] : memref<16x16xbf16, #tpu.memory_space<vmem>>, vector<16x16xbf16>
    %cst = arith.constant dense<0.000000e+00> : vector<6x16xf32>
    %8 = tpu.matmul %6, %7, %cst {dimension_numbers = #tpu.dot_dimension_numbers<[1], [0], [0], [1], [0, 0, 1, 1], [], []>} : vector<6x16xbf16>, vector<16x16xbf16>, vector<6x16xf32> -> vector<6x16xf32>
    %9 = arith.truncf %3 : vector<6x32xf32> to vector<6x32xbf16>
    %c0_8 = arith.constant 0 : index
    %c0_9 = arith.constant 0 : index
    %10 = vector.load %arg2[%c0_8, %c0_9] : memref<32x16xbf16, #tpu.memory_space<vmem>>, vector<32x16xbf16>
    %cst_10 = arith.constant dense<0.000000e+00> : vector<6x16xf32>
    %11 = tpu.matmul %9, %10, %cst_10 {dimension_numbers = #tpu.dot_dimension_numbers<[1], [0], [0], [1], [0, 0, 1, 1], [], []>} : vector<6x32xbf16>, vector<32x16xbf16>, vector<6x16xf32> -> vector<6x16xf32>
    %c0_11 = arith.constant 0 : index
    %c0_12 = arith.constant 0 : index
    %12 = vector.load %arg4[%c0_11, %c0_12] : memref<6x16xf32, #tpu.memory_space<vmem>>, vector<6x16xf32>
    %cst_13 = arith.constant 0.000000e+00 : f32
    %13 = vector.broadcast %cst_13 : f32 to vector<6x16xf32>
    %14 = arith.cmpf ogt, %12, %13 : vector<6x16xf32>
    %cst_14 = arith.constant -1.000000e+30 : f32
    %15 = vector.broadcast %cst_14 : f32 to vector<6x16xf32>
    %16 = arith.select %14, %11, %15 : vector<6x16xi1>, vector<6x16xf32>
    %cst_15 = arith.constant dense<0xFF800000> : vector<6xf32>
    %17 = vector.multi_reduction <maximumf>, %16, %cst_15 [1] : vector<6x16xf32> to vector<6xf32>
    %18 = vector.shape_cast %17 : vector<6xf32> to vector<6x1xf32>
    %19 = vector.broadcast %18 : vector<6x1xf32> to vector<6x16xf32>
    %20 = arith.subf %16, %19 : vector<6x16xf32>
    %21 = math.exp %20 : vector<6x16xf32>
    %cst_16 = arith.constant dense<0.000000e+00> : vector<6xf32>
    %22 = vector.multi_reduction <add>, %21, %cst_16 [1] : vector<6x16xf32> to vector<6xf32>
    %23 = vector.shape_cast %22 : vector<6xf32> to vector<6x1xf32>
    %24 = tpu.reciprocal %23 {approx = true} : vector<6x1xf32> -> vector<6x1xf32>
    %25 = vector.broadcast %24 : vector<6x1xf32> to vector<6x16xf32>
    %26 = arith.mulf %21, %25 : vector<6x16xf32>
    %27 = arith.truncf %26 : vector<6x16xf32> to vector<6x16xbf16>
    %c0_17 = arith.constant 0 : index
    %c0_18 = arith.constant 0 : index
    %28 = vector.load %arg3[%c0_17, %c0_18] : memref<16x32xbf16, #tpu.memory_space<vmem>>, vector<16x32xbf16>
    %cst_19 = arith.constant dense<0.000000e+00> : vector<6x32xf32>
    %29 = tpu.matmul %27, %28, %cst_19 {dimension_numbers = #tpu.dot_dimension_numbers<[1], [0], [0], [1], [0, 0, 1, 1], [], []>} : vector<6x16xbf16>, vector<16x32xbf16>, vector<6x32xf32> -> vector<6x32xf32>
    %30 = arith.truncf %3 : vector<6x32xf32> to vector<6x32xbf16>
    %c0_20 = arith.constant 0 : index
    %c0_21 = arith.constant 0 : index
    %31 = vector.load %arg5[%c0_20, %c0_21] : memref<32x32xbf16, #tpu.memory_space<vmem>>, vector<32x32xbf16>
    %cst_22 = arith.constant dense<0.000000e+00> : vector<6x32xf32>
    %32 = tpu.matmul %30, %31, %cst_22 {dimension_numbers = #tpu.dot_dimension_numbers<[1], [0], [0], [1], [0, 0, 1, 1], [], []>} : vector<6x32xbf16>, vector<32x32xbf16>, vector<6x32xf32> -> vector<6x32xf32>
    %c0_23 = arith.constant 0 : index
    %c0_24 = arith.constant 0 : index
    %33 = vector.load %arg7[%c0_23, %c0_24] : memref<6x32xf32, #tpu.memory_space<vmem>>, vector<6x32xf32>
    %cst_25 = arith.constant 0.000000e+00 : f32
    %34 = vector.broadcast %cst_25 : f32 to vector<6x32xf32>
    %35 = arith.cmpf ogt, %33, %34 : vector<6x32xf32>
    %cst_26 = arith.constant -1.000000e+30 : f32
    %36 = vector.broadcast %cst_26 : f32 to vector<6x32xf32>
    %37 = arith.select %35, %32, %36 : vector<6x32xi1>, vector<6x32xf32>
    %cst_27 = arith.constant dense<0xFF800000> : vector<6xf32>
    %38 = vector.multi_reduction <maximumf>, %37, %cst_27 [1] : vector<6x32xf32> to vector<6xf32>
    %39 = vector.shape_cast %38 : vector<6xf32> to vector<6x1xf32>
    %40 = vector.broadcast %39 : vector<6x1xf32> to vector<6x32xf32>
    %41 = arith.subf %37, %40 : vector<6x32xf32>
    %42 = math.exp %41 : vector<6x32xf32>
    %cst_28 = arith.constant dense<0.000000e+00> : vector<6xf32>
    %43 = vector.multi_reduction <add>, %42, %cst_28 [1] : vector<6x32xf32> to vector<6xf32>
    %44 = vector.shape_cast %43 : vector<6xf32> to vector<6x1xf32>
    %45 = tpu.reciprocal %44 {approx = true} : vector<6x1xf32> -> vector<6x1xf32>
    %46 = vector.broadcast %45 : vector<6x1xf32> to vector<6x32xf32>
    %47 = arith.mulf %42, %46 : vector<6x32xf32>
    %48 = arith.truncf %47 : vector<6x32xf32> to vector<6x32xbf16>
    %c0_29 = arith.constant 0 : index
    %c0_30 = arith.constant 0 : index
    %49 = vector.load %arg6[%c0_29, %c0_30] : memref<32x32xbf16, #tpu.memory_space<vmem>>, vector<32x32xbf16>
    %cst_31 = arith.constant dense<0.000000e+00> : vector<6x32xf32>
    %50 = tpu.matmul %48, %49, %cst_31 {dimension_numbers = #tpu.dot_dimension_numbers<[1], [0], [0], [1], [0, 0, 1, 1], [], []>} : vector<6x32xbf16>, vector<32x32xbf16>, vector<6x32xf32> -> vector<6x32xf32>
    %51 = tpu.concatenate %8, %29, %50, %3 in 1 : vector<6x16xf32>, vector<6x32xf32>, vector<6x32xf32>, vector<6x32xf32> -> vector<6x112xf32>
    %52 = arith.truncf %51 : vector<6x112xf32> to vector<6x112xbf16>
    %c0_32 = arith.constant 0 : index
    %c0_33 = arith.constant 0 : index
    %53 = vector.load %arg9[%c0_32, %c0_33] : memref<112x128xbf16, #tpu.memory_space<vmem>>, vector<112x128xbf16>
    %cst_34 = arith.constant dense<0.000000e+00> : vector<6x128xf32>
    %54 = tpu.matmul %52, %53, %cst_34 {dimension_numbers = #tpu.dot_dimension_numbers<[1], [0], [0], [1], [0, 0, 1, 1], [], []>} : vector<6x112xbf16>, vector<112x128xbf16>, vector<6x128xf32> -> vector<6x128xf32>
    %c0_35 = arith.constant 0 : index
    %c0_36 = arith.constant 0 : index
    %55 = vector.load %arg10[%c0_35, %c0_36] : memref<1x128xf32, #tpu.memory_space<vmem>>, vector<1x128xf32>
    %56 = vector.broadcast %55 : vector<1x128xf32> to vector<6x128xf32>
    %57 = arith.addf %54, %56 : vector<6x128xf32>
    %58 = vector.extract_strided_slice %57 {offsets = [0, 0], sizes = [6, 32], strides = [1, 1]} : vector<6x128xf32> to vector<6x32xf32>
    %cst_37 = arith.constant 0.000000e+00 : f32
    %59 = vector.broadcast %cst_37 : f32 to vector<6x32xf32>
    %60 = arith.subf %59, %58 : vector<6x32xf32>
    %61 = math.exp %60 : vector<6x32xf32>
    %cst_38 = arith.constant 1.000000e+00 : f32
    %62 = vector.broadcast %cst_38 : f32 to vector<6x32xf32>
    %63 = arith.addf %62, %61 : vector<6x32xf32>
    %cst_39 = arith.constant 1.000000e+00 : f32
    %64 = vector.broadcast %cst_39 : f32 to vector<6x32xf32>
    %65 = arith.divf %64, %63 : vector<6x32xf32>
    %66 = vector.extract_strided_slice %57 {offsets = [0, 32], sizes = [6, 32], strides = [1, 1]} : vector<6x128xf32> to vector<6x32xf32>
    %cst_40 = arith.constant 0.000000e+00 : f32
    %67 = vector.broadcast %cst_40 : f32 to vector<6x32xf32>
    %68 = arith.subf %67, %66 : vector<6x32xf32>
    %69 = math.exp %68 : vector<6x32xf32>
    %cst_41 = arith.constant 1.000000e+00 : f32
    %70 = vector.broadcast %cst_41 : f32 to vector<6x32xf32>
    %71 = arith.addf %70, %69 : vector<6x32xf32>
    %cst_42 = arith.constant 1.000000e+00 : f32
    %72 = vector.broadcast %cst_42 : f32 to vector<6x32xf32>
    %73 = arith.divf %72, %71 : vector<6x32xf32>
    %74 = vector.extract_strided_slice %57 {offsets = [0, 64], sizes = [6, 32], strides = [1, 1]} : vector<6x128xf32> to vector<6x32xf32>
    %75 = math.tanh %74 : vector<6x32xf32>
    %76 = vector.extract_strided_slice %57 {offsets = [0, 96], sizes = [6, 32], strides = [1, 1]} : vector<6x128xf32> to vector<6x32xf32>
    %cst_43 = arith.constant 0.000000e+00 : f32
    %77 = vector.broadcast %cst_43 : f32 to vector<6x32xf32>
    %78 = arith.subf %77, %76 : vector<6x32xf32>
    %79 = math.exp %78 : vector<6x32xf32>
    %cst_44 = arith.constant 1.000000e+00 : f32
    %80 = vector.broadcast %cst_44 : f32 to vector<6x32xf32>
    %81 = arith.addf %80, %79 : vector<6x32xf32>
    %cst_45 = arith.constant 1.000000e+00 : f32
    %82 = vector.broadcast %cst_45 : f32 to vector<6x32xf32>
    %83 = arith.divf %82, %81 : vector<6x32xf32>
    %84 = arith.mulf %73, %4 : vector<6x32xf32>
    %85 = arith.mulf %65, %75 : vector<6x32xf32>
    %86 = arith.addf %84, %85 : vector<6x32xf32>
    %87 = math.tanh %86 : vector<6x32xf32>
    %88 = arith.mulf %83, %87 : vector<6x32xf32>
    %89 = arith.truncf %88 : vector<6x32xf32> to vector<6x32xbf16>
    %c0_46 = arith.constant 0 : index
    %c0_47 = arith.constant 0 : index
    %90 = vector.load %arg11[%c0_46, %c0_47] : memref<32x16xbf16, #tpu.memory_space<vmem>>, vector<32x16xbf16>
    %cst_48 = arith.constant dense<0.000000e+00> : vector<6x16xf32>
    %91 = tpu.matmul %89, %90, %cst_48 {dimension_numbers = #tpu.dot_dimension_numbers<[1], [0], [0], [1], [0, 0, 1, 1], [], []>} : vector<6x32xbf16>, vector<32x16xbf16>, vector<6x16xf32> -> vector<6x16xf32>
    %c0_49 = arith.constant 0 : index
    %c0_50 = arith.constant 0 : index
    %92 = vector.load %arg12[%c0_49, %c0_50] : memref<1x16xf32, #tpu.memory_space<vmem>>, vector<1x16xf32>
    %93 = vector.broadcast %92 : vector<1x16xf32> to vector<6x16xf32>
    %94 = arith.addf %91, %93 : vector<6x16xf32>
    %cst_51 = arith.constant dense<0xFF800000> : vector<6xf32>
    %95 = vector.multi_reduction <maximumf>, %94, %cst_51 [1] : vector<6x16xf32> to vector<6xf32>
    %96 = vector.shape_cast %95 : vector<6xf32> to vector<6x1xf32>
    %97 = vector.broadcast %96 : vector<6x1xf32> to vector<6x16xf32>
    %98 = arith.subf %94, %97 : vector<6x16xf32>
    %99 = math.exp %98 : vector<6x16xf32>
    %cst_52 = arith.constant dense<0.000000e+00> : vector<6xf32>
    %100 = vector.multi_reduction <add>, %99, %cst_52 [1] : vector<6x16xf32> to vector<6xf32>
    %101 = vector.shape_cast %100 : vector<6xf32> to vector<6x1xf32>
    %102 = math.log %101 : vector<6x1xf32>
    %103 = vector.broadcast %102 : vector<6x1xf32> to vector<6x16xf32>
    %104 = arith.subf %98, %103 : vector<6x16xf32>
    %105 = tpu.iota {dimensions = array<i32: 1>} : vector<6x16xi32>
    %c0_i32_53 = arith.constant 0 : i32
    %106 = vector.broadcast %c0_i32_53 : i32 to vector<6x16xi32>
    %107 = arith.cmpi eq, %105, %106 : vector<6x16xi32>
    %c1_i32 = arith.constant 1 : i32
    %108 = vector.broadcast %c1_i32 : i32 to vector<6x16xi32>
    %109 = arith.cmpi eq, %105, %108 : vector<6x16xi32>
    %110 = arith.ori %107, %109 : vector<6x16xi1>
    %c2_i32 = arith.constant 2 : i32
    %111 = vector.broadcast %c2_i32 : i32 to vector<6x16xi32>
    %112 = arith.cmpi eq, %105, %111 : vector<6x16xi32>
    %113 = arith.ori %110, %112 : vector<6x16xi1>
    %cst_54 = arith.constant -1.000000e+30 : f32
    %114 = vector.broadcast %cst_54 : f32 to vector<6x16xf32>
    %115 = arith.select %113, %114, %104 : vector<6x16xi1>, vector<6x16xf32>
    %c0_55 = arith.constant 0 : index
    %c0_56 = arith.constant 0 : index
    %116 = vector.load %arg18[%c0_55, %c0_56] : memref<6x1xf32, #tpu.memory_space<vmem>>, vector<6x1xf32>
    %117 = vector.broadcast %116 : vector<6x1xf32> to vector<6x16xf32>
    %118 = arith.addf %115, %117 : vector<6x16xf32>
    %119 = tpu.iota {dimensions = array<i32: 0>} : vector<6x16xi32>
    %c0_i32_57 = arith.constant 0 : i32
    %120 = vector.broadcast %c0_i32_57 : i32 to vector<6x16xi32>
    %121 = arith.cmpi eq, %119, %120 : vector<6x16xi32>
    %c3_i32 = arith.constant 3 : i32
    %122 = vector.broadcast %c3_i32 : i32 to vector<6x16xi32>
    %123 = arith.cmpi eq, %119, %122 : vector<6x16xi32>
    %124 = arith.ori %121, %123 : vector<6x16xi1>
    %c0_i32_58 = arith.constant 0 : i32
    %125 = arith.cmpi eq, %arg0, %c0_i32_58 : i32
    %cst_59 = arith.constant dense<true> : vector<6x16xi1>
    %126 = arith.xori %124, %cst_59 : vector<6x16xi1>
    %127 = vector.broadcast %125 : i1 to vector<6x16xi1>
    %128 = arith.andi %127, %126 : vector<6x16xi1>
    %cst_60 = arith.constant -1.000000e+30 : f32
    %129 = vector.broadcast %cst_60 : f32 to vector<6x16xf32>
    %130 = arith.select %128, %129, %118 : vector<6x16xi1>, vector<6x16xf32>
    %131 = tpu.iota {dimensions = array<i32: 0>} : vector<3x16xi32>
    %c4_i32 = arith.constant 4 : i32
    %132 = vector.broadcast %c4_i32 : i32 to vector<3x16xi32>
    %133 = arith.shli %131, %132 : vector<3x16xi32>
    %134 = tpu.iota {dimensions = array<i32: 1>} : vector<3x16xi32>
    %135 = arith.addi %133, %134 : vector<3x16xi32>
    %136 = arith.sitofp %135 : vector<3x16xi32> to vector<3x16xf32>
    %137 = tpu.iota {dimensions = array<i32: 1>} : vector<1x6xi32>
    %138 = tpu.iota {dimensions = array<i32: 1>} : vector<1x3xi32>
    %139 = vector.extract_strided_slice %130 {offsets = [0, 0], sizes = [3, 16], strides = [1, 1]} : vector<6x16xf32> to vector<3x16xf32>
    %cst_61 = arith.constant dense<0xFF800000> : vector<3xf32>
    %140 = vector.multi_reduction <maximumf>, %139, %cst_61 [1] : vector<3x16xf32> to vector<3xf32>
    %141 = vector.shape_cast %140 : vector<3xf32> to vector<3x1xf32>
    %cst_62 = arith.constant dense<0xFF800000> : vector<1xf32>
    %142 = vector.multi_reduction <maximumf>, %141, %cst_62 [0] : vector<3x1xf32> to vector<1xf32>
    %143 = vector.shape_cast %142 : vector<1xf32> to vector<1x1xf32>
    %144 = vector.broadcast %143 : vector<1x1xf32> to vector<3x16xf32>
    %145 = arith.cmpf oeq, %139, %144 : vector<3x16xf32>
    %cst_63 = arith.constant 4.800000e+01 : f32
    %146 = vector.broadcast %cst_63 : f32 to vector<3x16xf32>
    %147 = arith.select %145, %136, %146 : vector<3x16xi1>, vector<3x16xf32>
    %cst_64 = arith.constant dense<0x7F800000> : vector<3xf32>
    %148 = vector.multi_reduction <minimumf>, %147, %cst_64 [1] : vector<3x16xf32> to vector<3xf32>
    %149 = vector.shape_cast %148 : vector<3xf32> to vector<3x1xf32>
    %cst_65 = arith.constant dense<0x7F800000> : vector<1xf32>
    %150 = vector.multi_reduction <minimumf>, %149, %cst_65 [0] : vector<3x1xf32> to vector<1xf32>
    %151 = vector.shape_cast %150 : vector<1xf32> to vector<1x1xf32>
    %152 = arith.fptosi %151 : vector<1x1xf32> to vector<1x1xi32>
    %153 = vector.broadcast %152 : vector<1x1xi32> to vector<3x16xi32>
    %154 = arith.cmpi eq, %135, %153 : vector<3x16xi32>
    %cst_66 = arith.constant -3.000000e+38 : f32
    %155 = vector.broadcast %cst_66 : f32 to vector<3x16xf32>
    %156 = arith.select %154, %155, %139 : vector<3x16xi1>, vector<3x16xf32>
    %cst_67 = arith.constant dense<0xFF800000> : vector<3xf32>
    %157 = vector.multi_reduction <maximumf>, %156, %cst_67 [1] : vector<3x16xf32> to vector<3xf32>
    %158 = vector.shape_cast %157 : vector<3xf32> to vector<3x1xf32>
    %cst_68 = arith.constant dense<0xFF800000> : vector<1xf32>
    %159 = vector.multi_reduction <maximumf>, %158, %cst_68 [0] : vector<3x1xf32> to vector<1xf32>
    %160 = vector.shape_cast %159 : vector<1xf32> to vector<1x1xf32>
    %161 = vector.broadcast %160 : vector<1x1xf32> to vector<3x16xf32>
    %162 = arith.cmpf oeq, %156, %161 : vector<3x16xf32>
    %cst_69 = arith.constant 4.800000e+01 : f32
    %163 = vector.broadcast %cst_69 : f32 to vector<3x16xf32>
    %164 = arith.select %162, %136, %163 : vector<3x16xi1>, vector<3x16xf32>
    %cst_70 = arith.constant dense<0x7F800000> : vector<3xf32>
    %165 = vector.multi_reduction <minimumf>, %164, %cst_70 [1] : vector<3x16xf32> to vector<3xf32>
    %166 = vector.shape_cast %165 : vector<3xf32> to vector<3x1xf32>
    %cst_71 = arith.constant dense<0x7F800000> : vector<1xf32>
    %167 = vector.multi_reduction <minimumf>, %166, %cst_71 [0] : vector<3x1xf32> to vector<1xf32>
    %168 = vector.shape_cast %167 : vector<1xf32> to vector<1x1xf32>
    %169 = arith.fptosi %168 : vector<1x1xf32> to vector<1x1xi32>
    %170 = vector.broadcast %169 : vector<1x1xi32> to vector<3x16xi32>
    %171 = arith.cmpi eq, %135, %170 : vector<3x16xi32>
    %cst_72 = arith.constant -3.000000e+38 : f32
    %172 = vector.broadcast %cst_72 : f32 to vector<3x16xf32>
    %173 = arith.select %171, %172, %156 : vector<3x16xi1>, vector<3x16xf32>
    %cst_73 = arith.constant dense<0xFF800000> : vector<3xf32>
    %174 = vector.multi_reduction <maximumf>, %173, %cst_73 [1] : vector<3x16xf32> to vector<3xf32>
    %175 = vector.shape_cast %174 : vector<3xf32> to vector<3x1xf32>
    %cst_74 = arith.constant dense<0xFF800000> : vector<1xf32>
    %176 = vector.multi_reduction <maximumf>, %175, %cst_74 [0] : vector<3x1xf32> to vector<1xf32>
    %177 = vector.shape_cast %176 : vector<1xf32> to vector<1x1xf32>
    %178 = vector.broadcast %177 : vector<1x1xf32> to vector<3x16xf32>
    %179 = arith.cmpf oeq, %173, %178 : vector<3x16xf32>
    %cst_75 = arith.constant 4.800000e+01 : f32
    %180 = vector.broadcast %cst_75 : f32 to vector<3x16xf32>
    %181 = arith.select %179, %136, %180 : vector<3x16xi1>, vector<3x16xf32>
    %cst_76 = arith.constant dense<0x7F800000> : vector<3xf32>
    %182 = vector.multi_reduction <minimumf>, %181, %cst_76 [1] : vector<3x16xf32> to vector<3xf32>
    %183 = vector.shape_cast %182 : vector<3xf32> to vector<3x1xf32>
    %cst_77 = arith.constant dense<0x7F800000> : vector<1xf32>
    %184 = vector.multi_reduction <minimumf>, %183, %cst_77 [0] : vector<3x1xf32> to vector<1xf32>
    %185 = vector.shape_cast %184 : vector<1xf32> to vector<1x1xf32>
    %186 = arith.fptosi %185 : vector<1x1xf32> to vector<1x1xi32>
    %187 = vector.broadcast %186 : vector<1x1xi32> to vector<3x16xi32>
    %188 = arith.cmpi eq, %135, %187 : vector<3x16xi32>
    %cst_78 = arith.constant -3.000000e+38 : f32
    %189 = vector.broadcast %cst_78 : f32 to vector<3x16xf32>
    %190 = arith.select %188, %189, %173 : vector<3x16xi1>, vector<3x16xf32>
    %cst_79 = arith.constant dense<0xFF800000> : vector<3xf32>
    %191 = vector.multi_reduction <maximumf>, %190, %cst_79 [1] : vector<3x16xf32> to vector<3xf32>
    %192 = vector.shape_cast %191 : vector<3xf32> to vector<3x1xf32>
    %cst_80 = arith.constant dense<0xFF800000> : vector<1xf32>
    %193 = vector.multi_reduction <maximumf>, %192, %cst_80 [0] : vector<3x1xf32> to vector<1xf32>
    %194 = vector.shape_cast %193 : vector<1xf32> to vector<1x1xf32>
    %195 = vector.broadcast %194 : vector<1x1xf32> to vector<3x16xf32>
    %196 = arith.cmpf oeq, %190, %195 : vector<3x16xf32>
    %cst_81 = arith.constant 4.800000e+01 : f32
    %197 = vector.broadcast %cst_81 : f32 to vector<3x16xf32>
    %198 = arith.select %196, %136, %197 : vector<3x16xi1>, vector<3x16xf32>
    %cst_82 = arith.constant dense<0x7F800000> : vector<3xf32>
    %199 = vector.multi_reduction <minimumf>, %198, %cst_82 [1] : vector<3x16xf32> to vector<3xf32>
    %200 = vector.shape_cast %199 : vector<3xf32> to vector<3x1xf32>
    %cst_83 = arith.constant dense<0x7F800000> : vector<1xf32>
    %201 = vector.multi_reduction <minimumf>, %200, %cst_83 [0] : vector<3x1xf32> to vector<1xf32>
    %202 = vector.shape_cast %201 : vector<1xf32> to vector<1x1xf32>
    %203 = arith.fptosi %202 : vector<1x1xf32> to vector<1x1xi32>
    %204 = vector.broadcast %203 : vector<1x1xi32> to vector<3x16xi32>
    %205 = arith.cmpi eq, %135, %204 : vector<3x16xi32>
    %cst_84 = arith.constant -3.000000e+38 : f32
    %206 = vector.broadcast %cst_84 : f32 to vector<3x16xf32>
    %207 = arith.select %205, %206, %190 : vector<3x16xi1>, vector<3x16xf32>
    %cst_85 = arith.constant dense<0xFF800000> : vector<3xf32>
    %208 = vector.multi_reduction <maximumf>, %207, %cst_85 [1] : vector<3x16xf32> to vector<3xf32>
    %209 = vector.shape_cast %208 : vector<3xf32> to vector<3x1xf32>
    %cst_86 = arith.constant dense<0xFF800000> : vector<1xf32>
    %210 = vector.multi_reduction <maximumf>, %209, %cst_86 [0] : vector<3x1xf32> to vector<1xf32>
    %211 = vector.shape_cast %210 : vector<1xf32> to vector<1x1xf32>
    %212 = vector.broadcast %211 : vector<1x1xf32> to vector<3x16xf32>
    %213 = arith.cmpf oeq, %207, %212 : vector<3x16xf32>
    %cst_87 = arith.constant 4.800000e+01 : f32
    %214 = vector.broadcast %cst_87 : f32 to vector<3x16xf32>
    %215 = arith.select %213, %136, %214 : vector<3x16xi1>, vector<3x16xf32>
    %cst_88 = arith.constant dense<0x7F800000> : vector<3xf32>
    %216 = vector.multi_reduction <minimumf>, %215, %cst_88 [1] : vector<3x16xf32> to vector<3xf32>
    %217 = vector.shape_cast %216 : vector<3xf32> to vector<3x1xf32>
    %cst_89 = arith.constant dense<0x7F800000> : vector<1xf32>
    %218 = vector.multi_reduction <minimumf>, %217, %cst_89 [0] : vector<3x1xf32> to vector<1xf32>
    %219 = vector.shape_cast %218 : vector<1xf32> to vector<1x1xf32>
    %220 = arith.fptosi %219 : vector<1x1xf32> to vector<1x1xi32>
    %221 = vector.broadcast %220 : vector<1x1xi32> to vector<3x16xi32>
    %222 = arith.cmpi eq, %135, %221 : vector<3x16xi32>
    %cst_90 = arith.constant -3.000000e+38 : f32
    %223 = vector.broadcast %cst_90 : f32 to vector<3x16xf32>
    %224 = arith.select %222, %223, %207 : vector<3x16xi1>, vector<3x16xf32>
    %cst_91 = arith.constant dense<0xFF800000> : vector<3xf32>
    %225 = vector.multi_reduction <maximumf>, %224, %cst_91 [1] : vector<3x16xf32> to vector<3xf32>
    %226 = vector.shape_cast %225 : vector<3xf32> to vector<3x1xf32>
    %cst_92 = arith.constant dense<0xFF800000> : vector<1xf32>
    %227 = vector.multi_reduction <maximumf>, %226, %cst_92 [0] : vector<3x1xf32> to vector<1xf32>
    %228 = vector.shape_cast %227 : vector<1xf32> to vector<1x1xf32>
    %229 = vector.broadcast %228 : vector<1x1xf32> to vector<3x16xf32>
    %230 = arith.cmpf oeq, %224, %229 : vector<3x16xf32>
    %cst_93 = arith.constant 4.800000e+01 : f32
    %231 = vector.broadcast %cst_93 : f32 to vector<3x16xf32>
    %232 = arith.select %230, %136, %231 : vector<3x16xi1>, vector<3x16xf32>
    %cst_94 = arith.constant dense<0x7F800000> : vector<3xf32>
    %233 = vector.multi_reduction <minimumf>, %232, %cst_94 [1] : vector<3x16xf32> to vector<3xf32>
    %234 = vector.shape_cast %233 : vector<3xf32> to vector<3x1xf32>
    %cst_95 = arith.constant dense<0x7F800000> : vector<1xf32>
    %235 = vector.multi_reduction <minimumf>, %234, %cst_95 [0] : vector<3x1xf32> to vector<1xf32>
    %236 = vector.shape_cast %235 : vector<1xf32> to vector<1x1xf32>
    %237 = arith.fptosi %236 : vector<1x1xf32> to vector<1x1xi32>
    %c15_i32 = arith.constant 15 : i32
    %238 = vector.broadcast %c15_i32 : i32 to vector<1x1xi32>
    %239 = arith.andi %152, %238 : vector<1x1xi32>
    %c4_i32_96 = arith.constant 4 : i32
    %240 = vector.broadcast %c4_i32_96 : i32 to vector<1x1xi32>
    %241 = arith.shrsi %152, %240 : vector<1x1xi32>
    %c0_i32_97 = arith.constant 0 : i32
    %242 = vector.broadcast %c0_i32_97 : i32 to vector<1x1xi32>
    %243 = arith.addi %241, %242 : vector<1x1xi32>
    %244 = vector.broadcast %243 : vector<1x1xi32> to vector<1x6xi32>
    %245 = arith.cmpi eq, %137, %244 : vector<1x6xi32>
    %246 = arith.extui %245 : vector<1x6xi1> to vector<1x6xi32>
    %247 = arith.sitofp %246 : vector<1x6xi32> to vector<1x6xf32>
    %c15_i32_98 = arith.constant 15 : i32
    %248 = vector.broadcast %c15_i32_98 : i32 to vector<1x1xi32>
    %249 = arith.andi %169, %248 : vector<1x1xi32>
    %c4_i32_99 = arith.constant 4 : i32
    %250 = vector.broadcast %c4_i32_99 : i32 to vector<1x1xi32>
    %251 = arith.shrsi %169, %250 : vector<1x1xi32>
    %c0_i32_100 = arith.constant 0 : i32
    %252 = vector.broadcast %c0_i32_100 : i32 to vector<1x1xi32>
    %253 = arith.addi %251, %252 : vector<1x1xi32>
    %254 = vector.broadcast %253 : vector<1x1xi32> to vector<1x6xi32>
    %255 = arith.cmpi eq, %137, %254 : vector<1x6xi32>
    %256 = arith.extui %255 : vector<1x6xi1> to vector<1x6xi32>
    %257 = arith.sitofp %256 : vector<1x6xi32> to vector<1x6xf32>
    %c15_i32_101 = arith.constant 15 : i32
    %258 = vector.broadcast %c15_i32_101 : i32 to vector<1x1xi32>
    %259 = arith.andi %186, %258 : vector<1x1xi32>
    %c4_i32_102 = arith.constant 4 : i32
    %260 = vector.broadcast %c4_i32_102 : i32 to vector<1x1xi32>
    %261 = arith.shrsi %186, %260 : vector<1x1xi32>
    %c0_i32_103 = arith.constant 0 : i32
    %262 = vector.broadcast %c0_i32_103 : i32 to vector<1x1xi32>
    %263 = arith.addi %261, %262 : vector<1x1xi32>
    %264 = vector.broadcast %263 : vector<1x1xi32> to vector<1x6xi32>
    %265 = arith.cmpi eq, %137, %264 : vector<1x6xi32>
    %266 = arith.extui %265 : vector<1x6xi1> to vector<1x6xi32>
    %267 = arith.sitofp %266 : vector<1x6xi32> to vector<1x6xf32>
    %c15_i32_104 = arith.constant 15 : i32
    %268 = vector.broadcast %c15_i32_104 : i32 to vector<1x1xi32>
    %269 = arith.andi %152, %268 : vector<1x1xi32>
    %c4_i32_105 = arith.constant 4 : i32
    %270 = vector.broadcast %c4_i32_105 : i32 to vector<1x1xi32>
    %271 = arith.shrsi %152, %270 : vector<1x1xi32>
    %272 = vector.broadcast %271 : vector<1x1xi32> to vector<1x3xi32>
    %273 = arith.cmpi eq, %138, %272 : vector<1x3xi32>
    %274 = arith.extui %273 : vector<1x3xi1> to vector<1x3xi32>
    %275 = arith.sitofp %274 : vector<1x3xi32> to vector<1x3xf32>
    %c15_i32_106 = arith.constant 15 : i32
    %276 = vector.broadcast %c15_i32_106 : i32 to vector<1x1xi32>
    %277 = arith.andi %169, %276 : vector<1x1xi32>
    %c4_i32_107 = arith.constant 4 : i32
    %278 = vector.broadcast %c4_i32_107 : i32 to vector<1x1xi32>
    %279 = arith.shrsi %169, %278 : vector<1x1xi32>
    %280 = vector.broadcast %279 : vector<1x1xi32> to vector<1x3xi32>
    %281 = arith.cmpi eq, %138, %280 : vector<1x3xi32>
    %282 = arith.extui %281 : vector<1x3xi1> to vector<1x3xi32>
    %283 = arith.sitofp %282 : vector<1x3xi32> to vector<1x3xf32>
    %c15_i32_108 = arith.constant 15 : i32
    %284 = vector.broadcast %c15_i32_108 : i32 to vector<1x1xi32>
    %285 = arith.andi %186, %284 : vector<1x1xi32>
    %c4_i32_109 = arith.constant 4 : i32
    %286 = vector.broadcast %c4_i32_109 : i32 to vector<1x1xi32>
    %287 = arith.shrsi %186, %286 : vector<1x1xi32>
    %288 = vector.broadcast %287 : vector<1x1xi32> to vector<1x3xi32>
    %289 = arith.cmpi eq, %138, %288 : vector<1x3xi32>
    %290 = arith.extui %289 : vector<1x3xi1> to vector<1x3xi32>
    %291 = arith.sitofp %290 : vector<1x3xi32> to vector<1x3xf32>
    %c15_i32_110 = arith.constant 15 : i32
    %292 = vector.broadcast %c15_i32_110 : i32 to vector<1x1xi32>
    %293 = arith.andi %203, %292 : vector<1x1xi32>
    %c4_i32_111 = arith.constant 4 : i32
    %294 = vector.broadcast %c4_i32_111 : i32 to vector<1x1xi32>
    %295 = arith.shrsi %203, %294 : vector<1x1xi32>
    %296 = vector.broadcast %295 : vector<1x1xi32> to vector<1x3xi32>
    %297 = arith.cmpi eq, %138, %296 : vector<1x3xi32>
    %298 = arith.extui %297 : vector<1x3xi1> to vector<1x3xi32>
    %299 = arith.sitofp %298 : vector<1x3xi32> to vector<1x3xf32>
    %c15_i32_112 = arith.constant 15 : i32
    %300 = vector.broadcast %c15_i32_112 : i32 to vector<1x1xi32>
    %301 = arith.andi %220, %300 : vector<1x1xi32>
    %c4_i32_113 = arith.constant 4 : i32
    %302 = vector.broadcast %c4_i32_113 : i32 to vector<1x1xi32>
    %303 = arith.shrsi %220, %302 : vector<1x1xi32>
    %304 = vector.broadcast %303 : vector<1x1xi32> to vector<1x3xi32>
    %305 = arith.cmpi eq, %138, %304 : vector<1x3xi32>
    %306 = arith.extui %305 : vector<1x3xi1> to vector<1x3xi32>
    %307 = arith.sitofp %306 : vector<1x3xi32> to vector<1x3xf32>
    %c15_i32_114 = arith.constant 15 : i32
    %308 = vector.broadcast %c15_i32_114 : i32 to vector<1x1xi32>
    %309 = arith.andi %237, %308 : vector<1x1xi32>
    %c4_i32_115 = arith.constant 4 : i32
    %310 = vector.broadcast %c4_i32_115 : i32 to vector<1x1xi32>
    %311 = arith.shrsi %237, %310 : vector<1x1xi32>
    %312 = vector.broadcast %311 : vector<1x1xi32> to vector<1x3xi32>
    %313 = arith.cmpi eq, %138, %312 : vector<1x3xi32>
    %314 = arith.extui %313 : vector<1x3xi1> to vector<1x3xi32>
    %315 = arith.sitofp %314 : vector<1x3xi32> to vector<1x3xf32>
    %c0_i32_116 = arith.constant 0 : i32
    %316 = vector.broadcast %c0_i32_116 : i32 to vector<6x1xi32>
    %317 = tpu.iota {dimensions = array<i32: 0>} : vector<6x1xi32>
    %c0_i32_117 = arith.constant 0 : i32
    %318 = vector.broadcast %c0_i32_117 : i32 to vector<6x1xi32>
    %319 = arith.cmpi eq, %317, %318 : vector<6x1xi32>
    %320 = vector.shape_cast %269 : vector<1x1xi32> to vector<1x1xi32>
    %321 = vector.broadcast %320 : vector<1x1xi32> to vector<6x1xi32>
    %322 = arith.select %319, %321, %316 : vector<6x1xi1>, vector<6x1xi32>
    %c1_i32_118 = arith.constant 1 : i32
    %323 = vector.broadcast %c1_i32_118 : i32 to vector<6x1xi32>
    %324 = arith.cmpi eq, %317, %323 : vector<6x1xi32>
    %325 = vector.shape_cast %277 : vector<1x1xi32> to vector<1x1xi32>
    %326 = vector.broadcast %325 : vector<1x1xi32> to vector<6x1xi32>
    %327 = arith.select %324, %326, %322 : vector<6x1xi1>, vector<6x1xi32>
    %c2_i32_119 = arith.constant 2 : i32
    %328 = vector.broadcast %c2_i32_119 : i32 to vector<6x1xi32>
    %329 = arith.cmpi eq, %317, %328 : vector<6x1xi32>
    %330 = vector.shape_cast %285 : vector<1x1xi32> to vector<1x1xi32>
    %331 = vector.broadcast %330 : vector<1x1xi32> to vector<6x1xi32>
    %332 = arith.select %329, %331, %327 : vector<6x1xi1>, vector<6x1xi32>
    %c3_i32_120 = arith.constant 3 : i32
    %333 = vector.broadcast %c3_i32_120 : i32 to vector<6x1xi32>
    %334 = arith.cmpi eq, %317, %333 : vector<6x1xi32>
    %335 = vector.shape_cast %293 : vector<1x1xi32> to vector<1x1xi32>
    %336 = vector.broadcast %335 : vector<1x1xi32> to vector<6x1xi32>
    %337 = arith.select %334, %336, %332 : vector<6x1xi1>, vector<6x1xi32>
    %c4_i32_121 = arith.constant 4 : i32
    %338 = vector.broadcast %c4_i32_121 : i32 to vector<6x1xi32>
    %339 = arith.cmpi eq, %317, %338 : vector<6x1xi32>
    %340 = vector.shape_cast %301 : vector<1x1xi32> to vector<1x1xi32>
    %341 = vector.broadcast %340 : vector<1x1xi32> to vector<6x1xi32>
    %342 = arith.select %339, %341, %337 : vector<6x1xi1>, vector<6x1xi32>
    %c5_i32 = arith.constant 5 : i32
    %343 = vector.broadcast %c5_i32 : i32 to vector<6x1xi32>
    %344 = arith.cmpi eq, %317, %343 : vector<6x1xi32>
    %345 = vector.shape_cast %309 : vector<1x1xi32> to vector<1x1xi32>
    %346 = vector.broadcast %345 : vector<1x1xi32> to vector<6x1xi32>
    %347 = arith.select %344, %346, %342 : vector<6x1xi1>, vector<6x1xi32>
    %cst_122 = arith.constant 0.000000e+00 : f32
    %348 = vector.broadcast %cst_122 : f32 to vector<6x3xf32>
    %349 = tpu.iota {dimensions = array<i32: 0>} : vector<6x3xi32>
    %c0_i32_123 = arith.constant 0 : i32
    %350 = vector.broadcast %c0_i32_123 : i32 to vector<6x3xi32>
    %351 = arith.cmpi eq, %349, %350 : vector<6x3xi32>
    %352 = vector.shape_cast %275 : vector<1x3xf32> to vector<1x3xf32>
    %353 = vector.broadcast %352 : vector<1x3xf32> to vector<6x3xf32>
    %354 = arith.select %351, %353, %348 : vector<6x3xi1>, vector<6x3xf32>
    %c1_i32_124 = arith.constant 1 : i32
    %355 = vector.broadcast %c1_i32_124 : i32 to vector<6x3xi32>
    %356 = arith.cmpi eq, %349, %355 : vector<6x3xi32>
    %357 = vector.shape_cast %283 : vector<1x3xf32> to vector<1x3xf32>
    %358 = vector.broadcast %357 : vector<1x3xf32> to vector<6x3xf32>
    %359 = arith.select %356, %358, %354 : vector<6x3xi1>, vector<6x3xf32>
    %c2_i32_125 = arith.constant 2 : i32
    %360 = vector.broadcast %c2_i32_125 : i32 to vector<6x3xi32>
    %361 = arith.cmpi eq, %349, %360 : vector<6x3xi32>
    %362 = vector.shape_cast %291 : vector<1x3xf32> to vector<1x3xf32>
    %363 = vector.broadcast %362 : vector<1x3xf32> to vector<6x3xf32>
    %364 = arith.select %361, %363, %359 : vector<6x3xi1>, vector<6x3xf32>
    %c3_i32_126 = arith.constant 3 : i32
    %365 = vector.broadcast %c3_i32_126 : i32 to vector<6x3xi32>
    %366 = arith.cmpi eq, %349, %365 : vector<6x3xi32>
    %367 = vector.shape_cast %299 : vector<1x3xf32> to vector<1x3xf32>
    %368 = vector.broadcast %367 : vector<1x3xf32> to vector<6x3xf32>
    %369 = arith.select %366, %368, %364 : vector<6x3xi1>, vector<6x3xf32>
    %c4_i32_127 = arith.constant 4 : i32
    %370 = vector.broadcast %c4_i32_127 : i32 to vector<6x3xi32>
    %371 = arith.cmpi eq, %349, %370 : vector<6x3xi32>
    %372 = vector.shape_cast %307 : vector<1x3xf32> to vector<1x3xf32>
    %373 = vector.broadcast %372 : vector<1x3xf32> to vector<6x3xf32>
    %374 = arith.select %371, %373, %369 : vector<6x3xi1>, vector<6x3xf32>
    %c5_i32_128 = arith.constant 5 : i32
    %375 = vector.broadcast %c5_i32_128 : i32 to vector<6x3xi32>
    %376 = arith.cmpi eq, %349, %375 : vector<6x3xi32>
    %377 = vector.shape_cast %315 : vector<1x3xf32> to vector<1x3xf32>
    %378 = vector.broadcast %377 : vector<1x3xf32> to vector<6x3xf32>
    %379 = arith.select %376, %378, %374 : vector<6x3xi1>, vector<6x3xf32>
    %380 = vector.extract_strided_slice %130 {offsets = [3, 0], sizes = [3, 16], strides = [1, 1]} : vector<6x16xf32> to vector<3x16xf32>
    %cst_129 = arith.constant dense<0xFF800000> : vector<3xf32>
    %381 = vector.multi_reduction <maximumf>, %380, %cst_129 [1] : vector<3x16xf32> to vector<3xf32>
    %382 = vector.shape_cast %381 : vector<3xf32> to vector<3x1xf32>
    %cst_130 = arith.constant dense<0xFF800000> : vector<1xf32>
    %383 = vector.multi_reduction <maximumf>, %382, %cst_130 [0] : vector<3x1xf32> to vector<1xf32>
    %384 = vector.shape_cast %383 : vector<1xf32> to vector<1x1xf32>
    %385 = vector.broadcast %384 : vector<1x1xf32> to vector<3x16xf32>
    %386 = arith.cmpf oeq, %380, %385 : vector<3x16xf32>
    %cst_131 = arith.constant 4.800000e+01 : f32
    %387 = vector.broadcast %cst_131 : f32 to vector<3x16xf32>
    %388 = arith.select %386, %136, %387 : vector<3x16xi1>, vector<3x16xf32>
    %cst_132 = arith.constant dense<0x7F800000> : vector<3xf32>
    %389 = vector.multi_reduction <minimumf>, %388, %cst_132 [1] : vector<3x16xf32> to vector<3xf32>
    %390 = vector.shape_cast %389 : vector<3xf32> to vector<3x1xf32>
    %cst_133 = arith.constant dense<0x7F800000> : vector<1xf32>
    %391 = vector.multi_reduction <minimumf>, %390, %cst_133 [0] : vector<3x1xf32> to vector<1xf32>
    %392 = vector.shape_cast %391 : vector<1xf32> to vector<1x1xf32>
    %393 = arith.fptosi %392 : vector<1x1xf32> to vector<1x1xi32>
    %394 = vector.broadcast %393 : vector<1x1xi32> to vector<3x16xi32>
    %395 = arith.cmpi eq, %135, %394 : vector<3x16xi32>
    %cst_134 = arith.constant -3.000000e+38 : f32
    %396 = vector.broadcast %cst_134 : f32 to vector<3x16xf32>
    %397 = arith.select %395, %396, %380 : vector<3x16xi1>, vector<3x16xf32>
    %cst_135 = arith.constant dense<0xFF800000> : vector<3xf32>
    %398 = vector.multi_reduction <maximumf>, %397, %cst_135 [1] : vector<3x16xf32> to vector<3xf32>
    %399 = vector.shape_cast %398 : vector<3xf32> to vector<3x1xf32>
    %cst_136 = arith.constant dense<0xFF800000> : vector<1xf32>
    %400 = vector.multi_reduction <maximumf>, %399, %cst_136 [0] : vector<3x1xf32> to vector<1xf32>
    %401 = vector.shape_cast %400 : vector<1xf32> to vector<1x1xf32>
    %402 = vector.broadcast %401 : vector<1x1xf32> to vector<3x16xf32>
    %403 = arith.cmpf oeq, %397, %402 : vector<3x16xf32>
    %cst_137 = arith.constant 4.800000e+01 : f32
    %404 = vector.broadcast %cst_137 : f32 to vector<3x16xf32>
    %405 = arith.select %403, %136, %404 : vector<3x16xi1>, vector<3x16xf32>
    %cst_138 = arith.constant dense<0x7F800000> : vector<3xf32>
    %406 = vector.multi_reduction <minimumf>, %405, %cst_138 [1] : vector<3x16xf32> to vector<3xf32>
    %407 = vector.shape_cast %406 : vector<3xf32> to vector<3x1xf32>
    %cst_139 = arith.constant dense<0x7F800000> : vector<1xf32>
    %408 = vector.multi_reduction <minimumf>, %407, %cst_139 [0] : vector<3x1xf32> to vector<1xf32>
    %409 = vector.shape_cast %408 : vector<1xf32> to vector<1x1xf32>
    %410 = arith.fptosi %409 : vector<1x1xf32> to vector<1x1xi32>
    %411 = vector.broadcast %410 : vector<1x1xi32> to vector<3x16xi32>
    %412 = arith.cmpi eq, %135, %411 : vector<3x16xi32>
    %cst_140 = arith.constant -3.000000e+38 : f32
    %413 = vector.broadcast %cst_140 : f32 to vector<3x16xf32>
    %414 = arith.select %412, %413, %397 : vector<3x16xi1>, vector<3x16xf32>
    %cst_141 = arith.constant dense<0xFF800000> : vector<3xf32>
    %415 = vector.multi_reduction <maximumf>, %414, %cst_141 [1] : vector<3x16xf32> to vector<3xf32>
    %416 = vector.shape_cast %415 : vector<3xf32> to vector<3x1xf32>
    %cst_142 = arith.constant dense<0xFF800000> : vector<1xf32>
    %417 = vector.multi_reduction <maximumf>, %416, %cst_142 [0] : vector<3x1xf32> to vector<1xf32>
    %418 = vector.shape_cast %417 : vector<1xf32> to vector<1x1xf32>
    %419 = vector.broadcast %418 : vector<1x1xf32> to vector<3x16xf32>
    %420 = arith.cmpf oeq, %414, %419 : vector<3x16xf32>
    %cst_143 = arith.constant 4.800000e+01 : f32
    %421 = vector.broadcast %cst_143 : f32 to vector<3x16xf32>
    %422 = arith.select %420, %136, %421 : vector<3x16xi1>, vector<3x16xf32>
    %cst_144 = arith.constant dense<0x7F800000> : vector<3xf32>
    %423 = vector.multi_reduction <minimumf>, %422, %cst_144 [1] : vector<3x16xf32> to vector<3xf32>
    %424 = vector.shape_cast %423 : vector<3xf32> to vector<3x1xf32>
    %cst_145 = arith.constant dense<0x7F800000> : vector<1xf32>
    %425 = vector.multi_reduction <minimumf>, %424, %cst_145 [0] : vector<3x1xf32> to vector<1xf32>
    %426 = vector.shape_cast %425 : vector<1xf32> to vector<1x1xf32>
    %427 = arith.fptosi %426 : vector<1x1xf32> to vector<1x1xi32>
    %428 = vector.broadcast %427 : vector<1x1xi32> to vector<3x16xi32>
    %429 = arith.cmpi eq, %135, %428 : vector<3x16xi32>
    %cst_146 = arith.constant -3.000000e+38 : f32
    %430 = vector.broadcast %cst_146 : f32 to vector<3x16xf32>
    %431 = arith.select %429, %430, %414 : vector<3x16xi1>, vector<3x16xf32>
    %cst_147 = arith.constant dense<0xFF800000> : vector<3xf32>
    %432 = vector.multi_reduction <maximumf>, %431, %cst_147 [1] : vector<3x16xf32> to vector<3xf32>
    %433 = vector.shape_cast %432 : vector<3xf32> to vector<3x1xf32>
    %cst_148 = arith.constant dense<0xFF800000> : vector<1xf32>
    %434 = vector.multi_reduction <maximumf>, %433, %cst_148 [0] : vector<3x1xf32> to vector<1xf32>
    %435 = vector.shape_cast %434 : vector<1xf32> to vector<1x1xf32>
    %436 = vector.broadcast %435 : vector<1x1xf32> to vector<3x16xf32>
    %437 = arith.cmpf oeq, %431, %436 : vector<3x16xf32>
    %cst_149 = arith.constant 4.800000e+01 : f32
    %438 = vector.broadcast %cst_149 : f32 to vector<3x16xf32>
    %439 = arith.select %437, %136, %438 : vector<3x16xi1>, vector<3x16xf32>
    %cst_150 = arith.constant dense<0x7F800000> : vector<3xf32>
    %440 = vector.multi_reduction <minimumf>, %439, %cst_150 [1] : vector<3x16xf32> to vector<3xf32>
    %441 = vector.shape_cast %440 : vector<3xf32> to vector<3x1xf32>
    %cst_151 = arith.constant dense<0x7F800000> : vector<1xf32>
    %442 = vector.multi_reduction <minimumf>, %441, %cst_151 [0] : vector<3x1xf32> to vector<1xf32>
    %443 = vector.shape_cast %442 : vector<1xf32> to vector<1x1xf32>
    %444 = arith.fptosi %443 : vector<1x1xf32> to vector<1x1xi32>
    %445 = vector.broadcast %444 : vector<1x1xi32> to vector<3x16xi32>
    %446 = arith.cmpi eq, %135, %445 : vector<3x16xi32>
    %cst_152 = arith.constant -3.000000e+38 : f32
    %447 = vector.broadcast %cst_152 : f32 to vector<3x16xf32>
    %448 = arith.select %446, %447, %431 : vector<3x16xi1>, vector<3x16xf32>
    %cst_153 = arith.constant dense<0xFF800000> : vector<3xf32>
    %449 = vector.multi_reduction <maximumf>, %448, %cst_153 [1] : vector<3x16xf32> to vector<3xf32>
    %450 = vector.shape_cast %449 : vector<3xf32> to vector<3x1xf32>
    %cst_154 = arith.constant dense<0xFF800000> : vector<1xf32>
    %451 = vector.multi_reduction <maximumf>, %450, %cst_154 [0] : vector<3x1xf32> to vector<1xf32>
    %452 = vector.shape_cast %451 : vector<1xf32> to vector<1x1xf32>
    %453 = vector.broadcast %452 : vector<1x1xf32> to vector<3x16xf32>
    %454 = arith.cmpf oeq, %448, %453 : vector<3x16xf32>
    %cst_155 = arith.constant 4.800000e+01 : f32
    %455 = vector.broadcast %cst_155 : f32 to vector<3x16xf32>
    %456 = arith.select %454, %136, %455 : vector<3x16xi1>, vector<3x16xf32>
    %cst_156 = arith.constant dense<0x7F800000> : vector<3xf32>
    %457 = vector.multi_reduction <minimumf>, %456, %cst_156 [1] : vector<3x16xf32> to vector<3xf32>
    %458 = vector.shape_cast %457 : vector<3xf32> to vector<3x1xf32>
    %cst_157 = arith.constant dense<0x7F800000> : vector<1xf32>
    %459 = vector.multi_reduction <minimumf>, %458, %cst_157 [0] : vector<3x1xf32> to vector<1xf32>
    %460 = vector.shape_cast %459 : vector<1xf32> to vector<1x1xf32>
    %461 = arith.fptosi %460 : vector<1x1xf32> to vector<1x1xi32>
    %462 = vector.broadcast %461 : vector<1x1xi32> to vector<3x16xi32>
    %463 = arith.cmpi eq, %135, %462 : vector<3x16xi32>
    %cst_158 = arith.constant -3.000000e+38 : f32
    %464 = vector.broadcast %cst_158 : f32 to vector<3x16xf32>
    %465 = arith.select %463, %464, %448 : vector<3x16xi1>, vector<3x16xf32>
    %cst_159 = arith.constant dense<0xFF800000> : vector<3xf32>
    %466 = vector.multi_reduction <maximumf>, %465, %cst_159 [1] : vector<3x16xf32> to vector<3xf32>
    %467 = vector.shape_cast %466 : vector<3xf32> to vector<3x1xf32>
    %cst_160 = arith.constant dense<0xFF800000> : vector<1xf32>
    %468 = vector.multi_reduction <maximumf>, %467, %cst_160 [0] : vector<3x1xf32> to vector<1xf32>
    %469 = vector.shape_cast %468 : vector<1xf32> to vector<1x1xf32>
    %470 = vector.broadcast %469 : vector<1x1xf32> to vector<3x16xf32>
    %471 = arith.cmpf oeq, %465, %470 : vector<3x16xf32>
    %cst_161 = arith.constant 4.800000e+01 : f32
    %472 = vector.broadcast %cst_161 : f32 to vector<3x16xf32>
    %473 = arith.select %471, %136, %472 : vector<3x16xi1>, vector<3x16xf32>
    %cst_162 = arith.constant dense<0x7F800000> : vector<3xf32>
    %474 = vector.multi_reduction <minimumf>, %473, %cst_162 [1] : vector<3x16xf32> to vector<3xf32>
    %475 = vector.shape_cast %474 : vector<3xf32> to vector<3x1xf32>
    %cst_163 = arith.constant dense<0x7F800000> : vector<1xf32>
    %476 = vector.multi_reduction <minimumf>, %475, %cst_163 [0] : vector<3x1xf32> to vector<1xf32>
    %477 = vector.shape_cast %476 : vector<1xf32> to vector<1x1xf32>
    %478 = arith.fptosi %477 : vector<1x1xf32> to vector<1x1xi32>
    %c15_i32_164 = arith.constant 15 : i32
    %479 = vector.broadcast %c15_i32_164 : i32 to vector<1x1xi32>
    %480 = arith.andi %393, %479 : vector<1x1xi32>
    %c4_i32_165 = arith.constant 4 : i32
    %481 = vector.broadcast %c4_i32_165 : i32 to vector<1x1xi32>
    %482 = arith.shrsi %393, %481 : vector<1x1xi32>
    %c3_i32_166 = arith.constant 3 : i32
    %483 = vector.broadcast %c3_i32_166 : i32 to vector<1x1xi32>
    %484 = arith.addi %482, %483 : vector<1x1xi32>
    %485 = vector.broadcast %484 : vector<1x1xi32> to vector<1x6xi32>
    %486 = arith.cmpi eq, %137, %485 : vector<1x6xi32>
    %487 = arith.extui %486 : vector<1x6xi1> to vector<1x6xi32>
    %488 = arith.sitofp %487 : vector<1x6xi32> to vector<1x6xf32>
    %c15_i32_167 = arith.constant 15 : i32
    %489 = vector.broadcast %c15_i32_167 : i32 to vector<1x1xi32>
    %490 = arith.andi %410, %489 : vector<1x1xi32>
    %c4_i32_168 = arith.constant 4 : i32
    %491 = vector.broadcast %c4_i32_168 : i32 to vector<1x1xi32>
    %492 = arith.shrsi %410, %491 : vector<1x1xi32>
    %c3_i32_169 = arith.constant 3 : i32
    %493 = vector.broadcast %c3_i32_169 : i32 to vector<1x1xi32>
    %494 = arith.addi %492, %493 : vector<1x1xi32>
    %495 = vector.broadcast %494 : vector<1x1xi32> to vector<1x6xi32>
    %496 = arith.cmpi eq, %137, %495 : vector<1x6xi32>
    %497 = arith.extui %496 : vector<1x6xi1> to vector<1x6xi32>
    %498 = arith.sitofp %497 : vector<1x6xi32> to vector<1x6xf32>
    %c15_i32_170 = arith.constant 15 : i32
    %499 = vector.broadcast %c15_i32_170 : i32 to vector<1x1xi32>
    %500 = arith.andi %427, %499 : vector<1x1xi32>
    %c4_i32_171 = arith.constant 4 : i32
    %501 = vector.broadcast %c4_i32_171 : i32 to vector<1x1xi32>
    %502 = arith.shrsi %427, %501 : vector<1x1xi32>
    %c3_i32_172 = arith.constant 3 : i32
    %503 = vector.broadcast %c3_i32_172 : i32 to vector<1x1xi32>
    %504 = arith.addi %502, %503 : vector<1x1xi32>
    %505 = vector.broadcast %504 : vector<1x1xi32> to vector<1x6xi32>
    %506 = arith.cmpi eq, %137, %505 : vector<1x6xi32>
    %507 = arith.extui %506 : vector<1x6xi1> to vector<1x6xi32>
    %508 = arith.sitofp %507 : vector<1x6xi32> to vector<1x6xf32>
    %c15_i32_173 = arith.constant 15 : i32
    %509 = vector.broadcast %c15_i32_173 : i32 to vector<1x1xi32>
    %510 = arith.andi %393, %509 : vector<1x1xi32>
    %c4_i32_174 = arith.constant 4 : i32
    %511 = vector.broadcast %c4_i32_174 : i32 to vector<1x1xi32>
    %512 = arith.shrsi %393, %511 : vector<1x1xi32>
    %513 = vector.broadcast %512 : vector<1x1xi32> to vector<1x3xi32>
    %514 = arith.cmpi eq, %138, %513 : vector<1x3xi32>
    %515 = arith.extui %514 : vector<1x3xi1> to vector<1x3xi32>
    %516 = arith.sitofp %515 : vector<1x3xi32> to vector<1x3xf32>
    %c15_i32_175 = arith.constant 15 : i32
    %517 = vector.broadcast %c15_i32_175 : i32 to vector<1x1xi32>
    %518 = arith.andi %410, %517 : vector<1x1xi32>
    %c4_i32_176 = arith.constant 4 : i32
    %519 = vector.broadcast %c4_i32_176 : i32 to vector<1x1xi32>
    %520 = arith.shrsi %410, %519 : vector<1x1xi32>
    %521 = vector.broadcast %520 : vector<1x1xi32> to vector<1x3xi32>
    %522 = arith.cmpi eq, %138, %521 : vector<1x3xi32>
    %523 = arith.extui %522 : vector<1x3xi1> to vector<1x3xi32>
    %524 = arith.sitofp %523 : vector<1x3xi32> to vector<1x3xf32>
    %c15_i32_177 = arith.constant 15 : i32
    %525 = vector.broadcast %c15_i32_177 : i32 to vector<1x1xi32>
    %526 = arith.andi %427, %525 : vector<1x1xi32>
    %c4_i32_178 = arith.constant 4 : i32
    %527 = vector.broadcast %c4_i32_178 : i32 to vector<1x1xi32>
    %528 = arith.shrsi %427, %527 : vector<1x1xi32>
    %529 = vector.broadcast %528 : vector<1x1xi32> to vector<1x3xi32>
    %530 = arith.cmpi eq, %138, %529 : vector<1x3xi32>
    %531 = arith.extui %530 : vector<1x3xi1> to vector<1x3xi32>
    %532 = arith.sitofp %531 : vector<1x3xi32> to vector<1x3xf32>
    %c15_i32_179 = arith.constant 15 : i32
    %533 = vector.broadcast %c15_i32_179 : i32 to vector<1x1xi32>
    %534 = arith.andi %444, %533 : vector<1x1xi32>
    %c4_i32_180 = arith.constant 4 : i32
    %535 = vector.broadcast %c4_i32_180 : i32 to vector<1x1xi32>
    %536 = arith.shrsi %444, %535 : vector<1x1xi32>
    %537 = vector.broadcast %536 : vector<1x1xi32> to vector<1x3xi32>
    %538 = arith.cmpi eq, %138, %537 : vector<1x3xi32>
    %539 = arith.extui %538 : vector<1x3xi1> to vector<1x3xi32>
    %540 = arith.sitofp %539 : vector<1x3xi32> to vector<1x3xf32>
    %c15_i32_181 = arith.constant 15 : i32
    %541 = vector.broadcast %c15_i32_181 : i32 to vector<1x1xi32>
    %542 = arith.andi %461, %541 : vector<1x1xi32>
    %c4_i32_182 = arith.constant 4 : i32
    %543 = vector.broadcast %c4_i32_182 : i32 to vector<1x1xi32>
    %544 = arith.shrsi %461, %543 : vector<1x1xi32>
    %545 = vector.broadcast %544 : vector<1x1xi32> to vector<1x3xi32>
    %546 = arith.cmpi eq, %138, %545 : vector<1x3xi32>
    %547 = arith.extui %546 : vector<1x3xi1> to vector<1x3xi32>
    %548 = arith.sitofp %547 : vector<1x3xi32> to vector<1x3xf32>
    %c15_i32_183 = arith.constant 15 : i32
    %549 = vector.broadcast %c15_i32_183 : i32 to vector<1x1xi32>
    %550 = arith.andi %478, %549 : vector<1x1xi32>
    %c4_i32_184 = arith.constant 4 : i32
    %551 = vector.broadcast %c4_i32_184 : i32 to vector<1x1xi32>
    %552 = arith.shrsi %478, %551 : vector<1x1xi32>
    %553 = vector.broadcast %552 : vector<1x1xi32> to vector<1x3xi32>
    %554 = arith.cmpi eq, %138, %553 : vector<1x3xi32>
    %555 = arith.extui %554 : vector<1x3xi1> to vector<1x3xi32>
    %556 = arith.sitofp %555 : vector<1x3xi32> to vector<1x3xf32>
    %c0_i32_185 = arith.constant 0 : i32
    %557 = vector.broadcast %c0_i32_185 : i32 to vector<6x1xi32>
    %558 = tpu.iota {dimensions = array<i32: 0>} : vector<6x1xi32>
    %c0_i32_186 = arith.constant 0 : i32
    %559 = vector.broadcast %c0_i32_186 : i32 to vector<6x1xi32>
    %560 = arith.cmpi eq, %558, %559 : vector<6x1xi32>
    %561 = vector.shape_cast %510 : vector<1x1xi32> to vector<1x1xi32>
    %562 = vector.broadcast %561 : vector<1x1xi32> to vector<6x1xi32>
    %563 = arith.select %560, %562, %557 : vector<6x1xi1>, vector<6x1xi32>
    %c1_i32_187 = arith.constant 1 : i32
    %564 = vector.broadcast %c1_i32_187 : i32 to vector<6x1xi32>
    %565 = arith.cmpi eq, %558, %564 : vector<6x1xi32>
    %566 = vector.shape_cast %518 : vector<1x1xi32> to vector<1x1xi32>
    %567 = vector.broadcast %566 : vector<1x1xi32> to vector<6x1xi32>
    %568 = arith.select %565, %567, %563 : vector<6x1xi1>, vector<6x1xi32>
    %c2_i32_188 = arith.constant 2 : i32
    %569 = vector.broadcast %c2_i32_188 : i32 to vector<6x1xi32>
    %570 = arith.cmpi eq, %558, %569 : vector<6x1xi32>
    %571 = vector.shape_cast %526 : vector<1x1xi32> to vector<1x1xi32>
    %572 = vector.broadcast %571 : vector<1x1xi32> to vector<6x1xi32>
    %573 = arith.select %570, %572, %568 : vector<6x1xi1>, vector<6x1xi32>
    %c3_i32_189 = arith.constant 3 : i32
    %574 = vector.broadcast %c3_i32_189 : i32 to vector<6x1xi32>
    %575 = arith.cmpi eq, %558, %574 : vector<6x1xi32>
    %576 = vector.shape_cast %534 : vector<1x1xi32> to vector<1x1xi32>
    %577 = vector.broadcast %576 : vector<1x1xi32> to vector<6x1xi32>
    %578 = arith.select %575, %577, %573 : vector<6x1xi1>, vector<6x1xi32>
    %c4_i32_190 = arith.constant 4 : i32
    %579 = vector.broadcast %c4_i32_190 : i32 to vector<6x1xi32>
    %580 = arith.cmpi eq, %558, %579 : vector<6x1xi32>
    %581 = vector.shape_cast %542 : vector<1x1xi32> to vector<1x1xi32>
    %582 = vector.broadcast %581 : vector<1x1xi32> to vector<6x1xi32>
    %583 = arith.select %580, %582, %578 : vector<6x1xi1>, vector<6x1xi32>
    %c5_i32_191 = arith.constant 5 : i32
    %584 = vector.broadcast %c5_i32_191 : i32 to vector<6x1xi32>
    %585 = arith.cmpi eq, %558, %584 : vector<6x1xi32>
    %586 = vector.shape_cast %550 : vector<1x1xi32> to vector<1x1xi32>
    %587 = vector.broadcast %586 : vector<1x1xi32> to vector<6x1xi32>
    %588 = arith.select %585, %587, %583 : vector<6x1xi1>, vector<6x1xi32>
    %cst_192 = arith.constant 0.000000e+00 : f32
    %589 = vector.broadcast %cst_192 : f32 to vector<6x3xf32>
    %590 = tpu.iota {dimensions = array<i32: 0>} : vector<6x3xi32>
    %c0_i32_193 = arith.constant 0 : i32
    %591 = vector.broadcast %c0_i32_193 : i32 to vector<6x3xi32>
    %592 = arith.cmpi eq, %590, %591 : vector<6x3xi32>
    %593 = vector.shape_cast %516 : vector<1x3xf32> to vector<1x3xf32>
    %594 = vector.broadcast %593 : vector<1x3xf32> to vector<6x3xf32>
    %595 = arith.select %592, %594, %589 : vector<6x3xi1>, vector<6x3xf32>
    %c1_i32_194 = arith.constant 1 : i32
    %596 = vector.broadcast %c1_i32_194 : i32 to vector<6x3xi32>
    %597 = arith.cmpi eq, %590, %596 : vector<6x3xi32>
    %598 = vector.shape_cast %524 : vector<1x3xf32> to vector<1x3xf32>
    %599 = vector.broadcast %598 : vector<1x3xf32> to vector<6x3xf32>
    %600 = arith.select %597, %599, %595 : vector<6x3xi1>, vector<6x3xf32>
    %c2_i32_195 = arith.constant 2 : i32
    %601 = vector.broadcast %c2_i32_195 : i32 to vector<6x3xi32>
    %602 = arith.cmpi eq, %590, %601 : vector<6x3xi32>
    %603 = vector.shape_cast %532 : vector<1x3xf32> to vector<1x3xf32>
    %604 = vector.broadcast %603 : vector<1x3xf32> to vector<6x3xf32>
    %605 = arith.select %602, %604, %600 : vector<6x3xi1>, vector<6x3xf32>
    %c3_i32_196 = arith.constant 3 : i32
    %606 = vector.broadcast %c3_i32_196 : i32 to vector<6x3xi32>
    %607 = arith.cmpi eq, %590, %606 : vector<6x3xi32>
    %608 = vector.shape_cast %540 : vector<1x3xf32> to vector<1x3xf32>
    %609 = vector.broadcast %608 : vector<1x3xf32> to vector<6x3xf32>
    %610 = arith.select %607, %609, %605 : vector<6x3xi1>, vector<6x3xf32>
    %c4_i32_197 = arith.constant 4 : i32
    %611 = vector.broadcast %c4_i32_197 : i32 to vector<6x3xi32>
    %612 = arith.cmpi eq, %590, %611 : vector<6x3xi32>
    %613 = vector.shape_cast %548 : vector<1x3xf32> to vector<1x3xf32>
    %614 = vector.broadcast %613 : vector<1x3xf32> to vector<6x3xf32>
    %615 = arith.select %612, %614, %610 : vector<6x3xi1>, vector<6x3xf32>
    %c5_i32_198 = arith.constant 5 : i32
    %616 = vector.broadcast %c5_i32_198 : i32 to vector<6x3xi32>
    %617 = arith.cmpi eq, %590, %616 : vector<6x3xi32>
    %618 = vector.shape_cast %556 : vector<1x3xf32> to vector<1x3xf32>
    %619 = vector.broadcast %618 : vector<1x3xf32> to vector<6x3xf32>
    %620 = arith.select %617, %619, %615 : vector<6x3xi1>, vector<6x3xf32>
    %cst_199 = arith.constant 0.000000e+00 : f32
    %621 = vector.broadcast %cst_199 : f32 to vector<6x6xf32>
    %622 = tpu.iota {dimensions = array<i32: 0>} : vector<6x6xi32>
    %c0_i32_200 = arith.constant 0 : i32
    %623 = vector.broadcast %c0_i32_200 : i32 to vector<6x6xi32>
    %624 = arith.cmpi eq, %622, %623 : vector<6x6xi32>
    %625 = vector.shape_cast %247 : vector<1x6xf32> to vector<1x6xf32>
    %626 = vector.broadcast %625 : vector<1x6xf32> to vector<6x6xf32>
    %627 = arith.select %624, %626, %621 : vector<6x6xi1>, vector<6x6xf32>
    %c1_i32_201 = arith.constant 1 : i32
    %628 = vector.broadcast %c1_i32_201 : i32 to vector<6x6xi32>
    %629 = arith.cmpi eq, %622, %628 : vector<6x6xi32>
    %630 = vector.shape_cast %257 : vector<1x6xf32> to vector<1x6xf32>
    %631 = vector.broadcast %630 : vector<1x6xf32> to vector<6x6xf32>
    %632 = arith.select %629, %631, %627 : vector<6x6xi1>, vector<6x6xf32>
    %c2_i32_202 = arith.constant 2 : i32
    %633 = vector.broadcast %c2_i32_202 : i32 to vector<6x6xi32>
    %634 = arith.cmpi eq, %622, %633 : vector<6x6xi32>
    %635 = vector.shape_cast %267 : vector<1x6xf32> to vector<1x6xf32>
    %636 = vector.broadcast %635 : vector<1x6xf32> to vector<6x6xf32>
    %637 = arith.select %634, %636, %632 : vector<6x6xi1>, vector<6x6xf32>
    %c3_i32_203 = arith.constant 3 : i32
    %638 = vector.broadcast %c3_i32_203 : i32 to vector<6x6xi32>
    %639 = arith.cmpi eq, %622, %638 : vector<6x6xi32>
    %640 = vector.shape_cast %488 : vector<1x6xf32> to vector<1x6xf32>
    %641 = vector.broadcast %640 : vector<1x6xf32> to vector<6x6xf32>
    %642 = arith.select %639, %641, %637 : vector<6x6xi1>, vector<6x6xf32>
    %c4_i32_204 = arith.constant 4 : i32
    %643 = vector.broadcast %c4_i32_204 : i32 to vector<6x6xi32>
    %644 = arith.cmpi eq, %622, %643 : vector<6x6xi32>
    %645 = vector.shape_cast %498 : vector<1x6xf32> to vector<1x6xf32>
    %646 = vector.broadcast %645 : vector<1x6xf32> to vector<6x6xf32>
    %647 = arith.select %644, %646, %642 : vector<6x6xi1>, vector<6x6xf32>
    %c5_i32_205 = arith.constant 5 : i32
    %648 = vector.broadcast %c5_i32_205 : i32 to vector<6x6xi32>
    %649 = arith.cmpi eq, %622, %648 : vector<6x6xi32>
    %650 = vector.shape_cast %508 : vector<1x6xf32> to vector<1x6xf32>
    %651 = vector.broadcast %650 : vector<1x6xf32> to vector<6x6xf32>
    %652 = arith.select %649, %651, %647 : vector<6x6xi1>, vector<6x6xf32>
    %c0_i32_206 = arith.constant 0 : i32
    %653 = vector.broadcast %c0_i32_206 : i32 to vector<6x1xi32>
    %654 = tpu.iota {dimensions = array<i32: 0>} : vector<6x1xi32>
    %c0_i32_207 = arith.constant 0 : i32
    %655 = vector.broadcast %c0_i32_207 : i32 to vector<6x1xi32>
    %656 = arith.cmpi eq, %654, %655 : vector<6x1xi32>
    %657 = vector.shape_cast %239 : vector<1x1xi32> to vector<1x1xi32>
    %658 = vector.broadcast %657 : vector<1x1xi32> to vector<6x1xi32>
    %659 = arith.select %656, %658, %653 : vector<6x1xi1>, vector<6x1xi32>
    %c1_i32_208 = arith.constant 1 : i32
    %660 = vector.broadcast %c1_i32_208 : i32 to vector<6x1xi32>
    %661 = arith.cmpi eq, %654, %660 : vector<6x1xi32>
    %662 = vector.shape_cast %249 : vector<1x1xi32> to vector<1x1xi32>
    %663 = vector.broadcast %662 : vector<1x1xi32> to vector<6x1xi32>
    %664 = arith.select %661, %663, %659 : vector<6x1xi1>, vector<6x1xi32>
    %c2_i32_209 = arith.constant 2 : i32
    %665 = vector.broadcast %c2_i32_209 : i32 to vector<6x1xi32>
    %666 = arith.cmpi eq, %654, %665 : vector<6x1xi32>
    %667 = vector.shape_cast %259 : vector<1x1xi32> to vector<1x1xi32>
    %668 = vector.broadcast %667 : vector<1x1xi32> to vector<6x1xi32>
    %669 = arith.select %666, %668, %664 : vector<6x1xi1>, vector<6x1xi32>
    %c3_i32_210 = arith.constant 3 : i32
    %670 = vector.broadcast %c3_i32_210 : i32 to vector<6x1xi32>
    %671 = arith.cmpi eq, %654, %670 : vector<6x1xi32>
    %672 = vector.shape_cast %480 : vector<1x1xi32> to vector<1x1xi32>
    %673 = vector.broadcast %672 : vector<1x1xi32> to vector<6x1xi32>
    %674 = arith.select %671, %673, %669 : vector<6x1xi1>, vector<6x1xi32>
    %c4_i32_211 = arith.constant 4 : i32
    %675 = vector.broadcast %c4_i32_211 : i32 to vector<6x1xi32>
    %676 = arith.cmpi eq, %654, %675 : vector<6x1xi32>
    %677 = vector.shape_cast %490 : vector<1x1xi32> to vector<1x1xi32>
    %678 = vector.broadcast %677 : vector<1x1xi32> to vector<6x1xi32>
    %679 = arith.select %676, %678, %674 : vector<6x1xi1>, vector<6x1xi32>
    %c5_i32_212 = arith.constant 5 : i32
    %680 = vector.broadcast %c5_i32_212 : i32 to vector<6x1xi32>
    %681 = arith.cmpi eq, %654, %680 : vector<6x1xi32>
    %682 = vector.shape_cast %500 : vector<1x1xi32> to vector<1x1xi32>
    %683 = vector.broadcast %682 : vector<1x1xi32> to vector<6x1xi32>
    %684 = arith.select %681, %683, %679 : vector<6x1xi1>, vector<6x1xi32>
    %cst_213 = arith.constant 0.000000e+00 : f32
    %685 = vector.broadcast %cst_213 : f32 to vector<6x1xf32>
    %686 = tpu.iota {dimensions = array<i32: 0>} : vector<6x1xi32>
    %c0_i32_214 = arith.constant 0 : i32
    %687 = vector.broadcast %c0_i32_214 : i32 to vector<6x1xi32>
    %688 = arith.cmpi eq, %686, %687 : vector<6x1xi32>
    %689 = vector.shape_cast %143 : vector<1x1xf32> to vector<1x1xf32>
    %690 = vector.broadcast %689 : vector<1x1xf32> to vector<6x1xf32>
    %691 = arith.select %688, %690, %685 : vector<6x1xi1>, vector<6x1xf32>
    %c1_i32_215 = arith.constant 1 : i32
    %692 = vector.broadcast %c1_i32_215 : i32 to vector<6x1xi32>
    %693 = arith.cmpi eq, %686, %692 : vector<6x1xi32>
    %694 = vector.shape_cast %160 : vector<1x1xf32> to vector<1x1xf32>
    %695 = vector.broadcast %694 : vector<1x1xf32> to vector<6x1xf32>
    %696 = arith.select %693, %695, %691 : vector<6x1xi1>, vector<6x1xf32>
    %c2_i32_216 = arith.constant 2 : i32
    %697 = vector.broadcast %c2_i32_216 : i32 to vector<6x1xi32>
    %698 = arith.cmpi eq, %686, %697 : vector<6x1xi32>
    %699 = vector.shape_cast %177 : vector<1x1xf32> to vector<1x1xf32>
    %700 = vector.broadcast %699 : vector<1x1xf32> to vector<6x1xf32>
    %701 = arith.select %698, %700, %696 : vector<6x1xi1>, vector<6x1xf32>
    %c3_i32_217 = arith.constant 3 : i32
    %702 = vector.broadcast %c3_i32_217 : i32 to vector<6x1xi32>
    %703 = arith.cmpi eq, %686, %702 : vector<6x1xi32>
    %704 = vector.shape_cast %384 : vector<1x1xf32> to vector<1x1xf32>
    %705 = vector.broadcast %704 : vector<1x1xf32> to vector<6x1xf32>
    %706 = arith.select %703, %705, %701 : vector<6x1xi1>, vector<6x1xf32>
    %c4_i32_218 = arith.constant 4 : i32
    %707 = vector.broadcast %c4_i32_218 : i32 to vector<6x1xi32>
    %708 = arith.cmpi eq, %686, %707 : vector<6x1xi32>
    %709 = vector.shape_cast %401 : vector<1x1xf32> to vector<1x1xf32>
    %710 = vector.broadcast %709 : vector<1x1xf32> to vector<6x1xf32>
    %711 = arith.select %708, %710, %706 : vector<6x1xi1>, vector<6x1xf32>
    %c5_i32_219 = arith.constant 5 : i32
    %712 = vector.broadcast %c5_i32_219 : i32 to vector<6x1xi32>
    %713 = arith.cmpi eq, %686, %712 : vector<6x1xi32>
    %714 = vector.shape_cast %418 : vector<1x1xf32> to vector<1x1xf32>
    %715 = vector.broadcast %714 : vector<1x1xf32> to vector<6x1xf32>
    %716 = arith.select %713, %715, %711 : vector<6x1xi1>, vector<6x1xf32>
    %c0_220 = arith.constant 0 : index
    %c0_221 = arith.constant 0 : index
    %717 = vector.load %arg13[%c0_220, %c0_221] : memref<6x7xi32, #tpu.memory_space<vmem>>, vector<6x7xi32>
    %718 = arith.sitofp %717 : vector<6x7xi32> to vector<6x7xf32>
    %719 = vector.shape_cast %652 : vector<6x6xf32> to vector<6x6x1xf32>
    %720 = vector.shape_cast %718 : vector<6x7xf32> to vector<1x6x7xf32>
    %721 = vector.broadcast %719 : vector<6x6x1xf32> to vector<6x6x7xf32>
    %722 = vector.broadcast %720 : vector<1x6x7xf32> to vector<6x6x7xf32>
    %723 = arith.mulf %721, %722 : vector<6x6x7xf32>
    %cst_222 = arith.constant dense<0.000000e+00> : vector<6x7xf32>
    %724 = vector.multi_reduction <add>, %723, %cst_222 [1] : vector<6x6x7xf32> to vector<6x7xf32>
    %725 = arith.fptosi %724 : vector<6x7xf32> to vector<6x7xi32>
    %726 = tpu.iota {dimensions = array<i32: 1>} : vector<6x7xi32>
    %c1_i32_223 = arith.constant 1 : i32
    %727 = arith.addi %arg0, %c1_i32_223 : i32
    %728 = vector.broadcast %727 : i32 to vector<6x7xi32>
    %729 = arith.cmpi eq, %726, %728 : vector<6x7xi32>
    %730 = vector.shape_cast %684 : vector<6x1xi32> to vector<6x1xi32>
    %731 = vector.broadcast %730 : vector<6x1xi32> to vector<6x7xi32>
    %732 = arith.select %729, %731, %725 : vector<6x7xi1>, vector<6x7xi32>
    %c0_224 = arith.constant 0 : index
    %c0_225 = arith.constant 0 : index
    %733 = vector.load %arg13[%c0_224, %c0_225] : memref<6x7xi32, #tpu.memory_space<vmem>>, vector<6x7xi32>
    tpu.vector_store %arg13[%c0_224, %c0_225], %732 {strides = array<i32>} : memref<6x7xi32, #tpu.memory_space<vmem>>, vector<6x7xi32>,
    %734 = vector.broadcast %arg0 : i32 to vector<6x7xi32>
    %735 = arith.cmpi eq, %726, %734 : vector<6x7xi32>
    %c0_226 = arith.constant 0 : index
    %c0_227 = arith.constant 0 : index
    %736 = vector.load %arg14[%c0_226, %c0_227] : memref<6x7xf32, #tpu.memory_space<vmem>>, vector<6x7xf32>
    %737 = vector.shape_cast %716 : vector<6x1xf32> to vector<6x1xf32>
    %738 = vector.broadcast %737 : vector<6x1xf32> to vector<6x7xf32>
    %739 = arith.select %735, %738, %736 : vector<6x7xi1>, vector<6x7xf32>
    %c0_228 = arith.constant 0 : index
    %c0_229 = arith.constant 0 : index
    %740 = vector.load %arg14[%c0_228, %c0_229] : memref<6x7xf32, #tpu.memory_space<vmem>>, vector<6x7xf32>
    tpu.vector_store %arg14[%c0_228, %c0_229], %739 {strides = array<i32>} : memref<6x7xf32, #tpu.memory_space<vmem>>, vector<6x7xf32>,
    %741 = vector.shape_cast %652 : vector<6x6xf32> to vector<6x6x1xf32>
    %742 = vector.shape_cast %88 : vector<6x32xf32> to vector<1x6x32xf32>
    %743 = vector.broadcast %741 : vector<6x6x1xf32> to vector<6x6x32xf32>
    %744 = vector.broadcast %742 : vector<1x6x32xf32> to vector<6x6x32xf32>
    %745 = arith.mulf %743, %744 : vector<6x6x32xf32>
    %cst_230 = arith.constant dense<0.000000e+00> : vector<6x32xf32>
    %746 = vector.multi_reduction <add>, %745, %cst_230 [1] : vector<6x6x32xf32> to vector<6x32xf32>
    %c0_231 = arith.constant 0 : index
    %c0_232 = arith.constant 0 : index
    %747 = vector.load %arg16[%c0_231, %c0_232] : memref<6x32xf32, #tpu.memory_space<vmem>>, vector<6x32xf32>
    tpu.vector_store %arg16[%c0_231, %c0_232], %746 {strides = array<i32>} : memref<6x32xf32, #tpu.memory_space<vmem>>, vector<6x32xf32>,
    %748 = vector.shape_cast %652 : vector<6x6xf32> to vector<6x6x1xf32>
    %749 = vector.shape_cast %86 : vector<6x32xf32> to vector<1x6x32xf32>
    %750 = vector.broadcast %748 : vector<6x6x1xf32> to vector<6x6x32xf32>
    %751 = vector.broadcast %749 : vector<1x6x32xf32> to vector<6x6x32xf32>
    %752 = arith.mulf %750, %751 : vector<6x6x32xf32>
    %cst_233 = arith.constant dense<0.000000e+00> : vector<6x32xf32>
    %753 = vector.multi_reduction <add>, %752, %cst_233 [1] : vector<6x6x32xf32> to vector<6x32xf32>
    %c0_234 = arith.constant 0 : index
    %c0_235 = arith.constant 0 : index
    %754 = vector.load %arg17[%c0_234, %c0_235] : memref<6x32xf32, #tpu.memory_space<vmem>>, vector<6x32xf32>
    tpu.vector_store %arg17[%c0_234, %c0_235], %753 {strides = array<i32>} : memref<6x32xf32, #tpu.memory_space<vmem>>, vector<6x32xf32>,
    %c0_236 = arith.constant 0 : index
    %c0_237 = arith.constant 0 : index
    %755 = vector.load %arg18[%c0_236, %c0_237] : memref<6x1xf32, #tpu.memory_space<vmem>>, vector<6x1xf32>
    tpu.vector_store %arg18[%c0_236, %c0_237], %716 {strides = array<i32>} : memref<6x1xf32, #tpu.memory_space<vmem>>, vector<6x1xf32>,
    %756 = vector.broadcast %684 : vector<6x1xi32> to vector<6x16xi32>
    %757 = arith.cmpi eq, %105, %756 : vector<6x16xi32>
    %758 = arith.extui %757 : vector<6x16xi1> to vector<6x16xi32>
    %759 = arith.sitofp %758 : vector<6x16xi32> to vector<6x16xf32>
    %c0_238 = arith.constant 0 : index
    %c0_239 = arith.constant 0 : index
    %760 = vector.load %arg19[%c0_238, %c0_239] : memref<6x16xf32, #tpu.memory_space<vmem>>, vector<6x16xf32>
    tpu.vector_store %arg19[%c0_238, %c0_239], %759 {strides = array<i32>} : memref<6x16xf32, #tpu.memory_space<vmem>>, vector<6x16xf32>,
    %c1_i32_240 = arith.constant 1 : i32
    %761 = arith.cmpi sgt, %arg0, %c1_i32_240 : i32
    %762 = arith.extui %761 : i1 to i32
    %c0_i32_241 = arith.constant 0 : i32
    %763 = arith.cmpi ne, %762, %c0_i32_241 : i32
    scf.if %763 {
      %771 = tpu.iota {dimensions = array<i32: 1>} : vector<6x7xi32>
      %772 = vector.extract_strided_slice %732 {offsets = [0, 0], sizes = [3, 7], strides = [1, 1]} : vector<6x7xi32> to vector<3x7xi32>
      %773 = arith.sitofp %772 : vector<3x7xi32> to vector<3x7xf32>
      %774 = vector.shape_cast %379 : vector<6x3xf32> to vector<6x3x1xf32>
      %775 = vector.shape_cast %773 : vector<3x7xf32> to vector<1x3x7xf32>
      %776 = vector.broadcast %774 : vector<6x3x1xf32> to vector<6x3x7xf32>
      %777 = vector.broadcast %775 : vector<1x3x7xf32> to vector<6x3x7xf32>
      %778 = arith.mulf %776, %777 : vector<6x3x7xf32>
      %cst_251 = arith.constant dense<0.000000e+00> : vector<6x7xf32>
      %779 = vector.multi_reduction <add>, %778, %cst_251 [1] : vector<6x3x7xf32> to vector<6x7xf32>
      %780 = arith.fptosi %779 : vector<6x7xf32> to vector<6x7xi32>
      %781 = vector.broadcast %arg0 : i32 to vector<6x7xi32>
      %782 = arith.cmpi sle, %771, %781 : vector<6x7xi32>
      %c1_i32_252 = arith.constant 1 : i32
      %783 = arith.addi %arg0, %c1_i32_252 : i32
      %784 = vector.broadcast %783 : i32 to vector<6x7xi32>
      %785 = arith.cmpi eq, %771, %784 : vector<6x7xi32>
      %c0_253 = arith.constant 0 : index
      %c0_254 = arith.constant 0 : index
      %c0_255 = arith.constant 0 : index
      %786 = vector.load %arg20[%c0_253, %c0_254, %c0_255] : memref<2x6x7xi32, #tpu.memory_space<vmem>>, vector<1x6x7xi32>
      %787 = vector.shape_cast %786 : vector<1x6x7xi32> to vector<6x7xi32>
      %788 = vector.shape_cast %347 : vector<6x1xi32> to vector<6x1xi32>
      %789 = vector.broadcast %788 : vector<6x1xi32> to vector<6x7xi32>
      %790 = arith.select %785, %789, %787 : vector<6x7xi1>, vector<6x7xi32>
      %791 = arith.select %782, %780, %790 : vector<6x7xi1>, vector<6x7xi32>
      %c0_256 = arith.constant 0 : index
      %c0_257 = arith.constant 0 : index
      %c0_258 = arith.constant 0 : index
      %792 = vector.load %arg20[%c0_256, %c0_257, %c0_258] : memref<2x6x7xi32, #tpu.memory_space<vmem>>, vector<1x6x7xi32>
      %793 = vector.shape_cast %792 : vector<1x6x7xi32> to vector<6x7xi32>
      %794 = vector.shape_cast %791 : vector<6x7xi32> to vector<1x6x7xi32>
      tpu.vector_store %arg20[%c0_256, %c0_257, %c0_258], %794 {strides = array<i32>} : memref<2x6x7xi32, #tpu.memory_space<vmem>>, vector<1x6x7xi32>,
      %795 = vector.extract_strided_slice %732 {offsets = [3, 0], sizes = [3, 7], strides = [1, 1]} : vector<6x7xi32> to vector<3x7xi32>
      %796 = arith.sitofp %795 : vector<3x7xi32> to vector<3x7xf32>
      %797 = vector.shape_cast %620 : vector<6x3xf32> to vector<6x3x1xf32>
      %798 = vector.shape_cast %796 : vector<3x7xf32> to vector<1x3x7xf32>
      %799 = vector.broadcast %797 : vector<6x3x1xf32> to vector<6x3x7xf32>
      %800 = vector.broadcast %798 : vector<1x3x7xf32> to vector<6x3x7xf32>
      %801 = arith.mulf %799, %800 : vector<6x3x7xf32>
      %cst_259 = arith.constant dense<0.000000e+00> : vector<6x7xf32>
      %802 = vector.multi_reduction <add>, %801, %cst_259 [1] : vector<6x3x7xf32> to vector<6x7xf32>
      %803 = arith.fptosi %802 : vector<6x7xf32> to vector<6x7xi32>
      %804 = vector.broadcast %arg0 : i32 to vector<6x7xi32>
      %805 = arith.cmpi sle, %771, %804 : vector<6x7xi32>
      %c1_i32_260 = arith.constant 1 : i32
      %806 = arith.addi %arg0, %c1_i32_260 : i32
      %807 = vector.broadcast %806 : i32 to vector<6x7xi32>
      %808 = arith.cmpi eq, %771, %807 : vector<6x7xi32>
      %c1 = arith.constant 1 : index
      %c0_261 = arith.constant 0 : index
      %c0_262 = arith.constant 0 : index
      %809 = vector.load %arg20[%c1, %c0_261, %c0_262] : memref<2x6x7xi32, #tpu.memory_space<vmem>>, vector<1x6x7xi32>
      %810 = vector.shape_cast %809 : vector<1x6x7xi32> to vector<6x7xi32>
      %811 = vector.shape_cast %588 : vector<6x1xi32> to vector<6x1xi32>
      %812 = vector.broadcast %811 : vector<6x1xi32> to vector<6x7xi32>
      %813 = arith.select %808, %812, %810 : vector<6x7xi1>, vector<6x7xi32>
      %814 = arith.select %805, %803, %813 : vector<6x7xi1>, vector<6x7xi32>
      %c1_263 = arith.constant 1 : index
      %c0_264 = arith.constant 0 : index
      %c0_265 = arith.constant 0 : index
      %815 = vector.load %arg20[%c1_263, %c0_264, %c0_265] : memref<2x6x7xi32, #tpu.memory_space<vmem>>, vector<1x6x7xi32>
      %816 = vector.shape_cast %815 : vector<1x6x7xi32> to vector<6x7xi32>
      %817 = vector.shape_cast %814 : vector<6x7xi32> to vector<1x6x7xi32>
      tpu.vector_store %arg20[%c1_263, %c0_264, %c0_265], %817 {strides = array<i32>} : memref<2x6x7xi32, #tpu.memory_space<vmem>>, vector<1x6x7xi32>,
    } else {
    }
    %c1_i32_242 = arith.constant 1 : i32
    %764 = arith.cmpi sle, %arg0, %c1_i32_242 : i32
    %765 = arith.extui %764 : i1 to i32
    %c0_i32_243 = arith.constant 0 : i32
    %766 = arith.cmpi ne, %765, %c0_i32_243 : i32
    scf.if %766 {
      %771 = tpu.iota {dimensions = array<i32: 0>} : vector<6x7xi32>
      %772 = tpu.iota {dimensions = array<i32: 0>} : vector<6x3xi32>
      %773 = tpu.iota {dimensions = array<i32: 1>} : vector<6x3xi32>
      %774 = arith.cmpi eq, %772, %773 : vector<6x3xi32>
      %775 = arith.extui %774 : vector<6x3xi1> to vector<6x3xi32>
      %776 = arith.sitofp %775 : vector<6x3xi32> to vector<6x3xf32>
      %777 = vector.extract_strided_slice %732 {offsets = [0, 0], sizes = [3, 7], strides = [1, 1]} : vector<6x7xi32> to vector<3x7xi32>
      %778 = arith.sitofp %777 : vector<3x7xi32> to vector<3x7xf32>
      %779 = vector.shape_cast %776 : vector<6x3xf32> to vector<6x3x1xf32>
      %780 = vector.shape_cast %778 : vector<3x7xf32> to vector<1x3x7xf32>
      %781 = vector.broadcast %779 : vector<6x3x1xf32> to vector<6x3x7xf32>
      %782 = vector.broadcast %780 : vector<1x3x7xf32> to vector<6x3x7xf32>
      %783 = arith.mulf %781, %782 : vector<6x3x7xf32>
      %cst_251 = arith.constant dense<0.000000e+00> : vector<6x7xf32>
      %784 = vector.multi_reduction <add>, %783, %cst_251 [1] : vector<6x3x7xf32> to vector<6x7xf32>
      %785 = arith.fptosi %784 : vector<6x7xf32> to vector<6x7xi32>
      %c3_i32_252 = arith.constant 3 : i32
      %786 = vector.broadcast %c3_i32_252 : i32 to vector<6x7xi32>
      %787 = arith.cmpi slt, %771, %786 : vector<6x7xi32>
      %c0_253 = arith.constant 0 : index
      %c0_254 = arith.constant 0 : index
      %c0_255 = arith.constant 0 : index
      %788 = vector.load %arg20[%c0_253, %c0_254, %c0_255] : memref<2x6x7xi32, #tpu.memory_space<vmem>>, vector<1x6x7xi32>
      %789 = vector.shape_cast %788 : vector<1x6x7xi32> to vector<6x7xi32>
      %790 = arith.select %787, %785, %789 : vector<6x7xi1>, vector<6x7xi32>
      %c0_256 = arith.constant 0 : index
      %c0_257 = arith.constant 0 : index
      %c0_258 = arith.constant 0 : index
      %791 = vector.load %arg20[%c0_256, %c0_257, %c0_258] : memref<2x6x7xi32, #tpu.memory_space<vmem>>, vector<1x6x7xi32>
      %792 = vector.shape_cast %791 : vector<1x6x7xi32> to vector<6x7xi32>
      %793 = vector.shape_cast %790 : vector<6x7xi32> to vector<1x6x7xi32>
      tpu.vector_store %arg20[%c0_256, %c0_257, %c0_258], %793 {strides = array<i32>} : memref<2x6x7xi32, #tpu.memory_space<vmem>>, vector<1x6x7xi32>,
      %794 = vector.extract_strided_slice %732 {offsets = [3, 0], sizes = [3, 7], strides = [1, 1]} : vector<6x7xi32> to vector<3x7xi32>
      %795 = arith.sitofp %794 : vector<3x7xi32> to vector<3x7xf32>
      %796 = vector.shape_cast %776 : vector<6x3xf32> to vector<6x3x1xf32>
      %797 = vector.shape_cast %795 : vector<3x7xf32> to vector<1x3x7xf32>
      %798 = vector.broadcast %796 : vector<6x3x1xf32> to vector<6x3x7xf32>
      %799 = vector.broadcast %797 : vector<1x3x7xf32> to vector<6x3x7xf32>
      %800 = arith.mulf %798, %799 : vector<6x3x7xf32>
      %cst_259 = arith.constant dense<0.000000e+00> : vector<6x7xf32>
      %801 = vector.multi_reduction <add>, %800, %cst_259 [1] : vector<6x3x7xf32> to vector<6x7xf32>
      %802 = arith.fptosi %801 : vector<6x7xf32> to vector<6x7xi32>
      %c3_i32_260 = arith.constant 3 : i32
      %803 = vector.broadcast %c3_i32_260 : i32 to vector<6x7xi32>
      %804 = arith.cmpi slt, %771, %803 : vector<6x7xi32>
      %c1 = arith.constant 1 : index
      %c0_261 = arith.constant 0 : index
      %c0_262 = arith.constant 0 : index
      %805 = vector.load %arg20[%c1, %c0_261, %c0_262] : memref<2x6x7xi32, #tpu.memory_space<vmem>>, vector<1x6x7xi32>
      %806 = vector.shape_cast %805 : vector<1x6x7xi32> to vector<6x7xi32>
      %807 = arith.select %804, %802, %806 : vector<6x7xi1>, vector<6x7xi32>
      %c1_263 = arith.constant 1 : index
      %c0_264 = arith.constant 0 : index
      %c0_265 = arith.constant 0 : index
      %808 = vector.load %arg20[%c1_263, %c0_264, %c0_265] : memref<2x6x7xi32, #tpu.memory_space<vmem>>, vector<1x6x7xi32>
      %809 = vector.shape_cast %808 : vector<1x6x7xi32> to vector<6x7xi32>
      %810 = vector.shape_cast %807 : vector<6x7xi32> to vector<1x6x7xi32>
      tpu.vector_store %arg20[%c1_263, %c0_264, %c0_265], %810 {strides = array<i32>} : memref<2x6x7xi32, #tpu.memory_space<vmem>>, vector<1x6x7xi32>,
    } else {
    }
    %c0_244 = arith.constant 0 : index
    %c0_245 = arith.constant 0 : index
    %c0_246 = arith.constant 0 : index
    %767 = vector.load %arg20[%c0_244, %c0_245, %c0_246] : memref<2x6x7xi32, #tpu.memory_space<vmem>>, vector<2x6x7xi32>
    %c0_247 = arith.constant 0 : index
    %c0_248 = arith.constant 0 : index
    %c0_249 = arith.constant 0 : index
    %c0_250 = arith.constant 0 : index
    %768 = vector.load %arg15[%c0_247, %c0_248, %c0_249, %c0_250] : memref<1x2x6x7xi32, #tpu.memory_space<vmem>>, vector<1x2x6x7xi32>
    %769 = vector.shape_cast %768 : vector<1x2x6x7xi32> to vector<2x6x7xi32>
    %770 = vector.shape_cast %767 : vector<2x6x7xi32> to vector<1x2x6x7xi32>
    tpu.vector_store %arg15[%c0_247, %c0_248, %c0_249, %c0_250], %770 {strides = array<i32>} : memref<1x2x6x7xi32, #tpu.memory_space<vmem>>, vector<1x2x6x7xi32>,
    return
  }
  func.func @transform_0(%arg0: i32) -> (i32, i32) {
    %c0_i32 = arith.constant 0 : i32
    %c0_i32_0 = arith.constant 0 : i32
    %c0_i32_1 = arith.constant 0 : i32
    return %c0_i32, %c0_i32_0 : i32, i32
  }
  func.func @transform_1(%arg0: i32) -> (i32, i32) {
    %c0_i32 = arith.constant 0 : i32
    %c0_i32_0 = arith.constant 0 : i32
    %c0_i32_1 = arith.constant 0 : i32
    return %c0_i32, %c0_i32_0 : i32, i32
  }
  func.func @transform_2(%arg0: i32) -> (i32, i32) {
    %c0_i32 = arith.constant 0 : i32
    %c0_i32_0 = arith.constant 0 : i32
    %c0_i32_1 = arith.constant 0 : i32
    return %c0_i32, %c0_i32_0 : i32, i32
  }
  func.func @transform_3(%arg0: i32) -> (i32, i32) {
    %c0_i32 = arith.constant 0 : i32
    %c0_i32_0 = arith.constant 0 : i32
    %c0_i32_1 = arith.constant 0 : i32
    return %c0_i32, %c0_i32_0 : i32, i32
  }
  func.func @transform_4(%arg0: i32) -> (i32, i32) {
    %c0_i32 = arith.constant 0 : i32
    %c0_i32_0 = arith.constant 0 : i32
    %c0_i32_1 = arith.constant 0 : i32
    return %c0_i32, %c0_i32_0 : i32, i32
  }
  func.func @transform_5(%arg0: i32) -> (i32, i32) {
    %c0_i32 = arith.constant 0 : i32
    %c0_i32_0 = arith.constant 0 : i32
    %c0_i32_1 = arith.constant 0 : i32
    return %c0_i32, %c0_i32_0 : i32, i32
  }
  func.func @transform_6(%arg0: i32) -> (i32, i32) {
    %c0_i32 = arith.constant 0 : i32
    %c0_i32_0 = arith.constant 0 : i32
    %c0_i32_1 = arith.constant 0 : i32
    return %c0_i32, %c0_i32_0 : i32, i32
  }
  func.func @transform_7(%arg0: i32) -> (i32, i32) {
    %c0_i32 = arith.constant 0 : i32
    %c0_i32_0 = arith.constant 0 : i32
    %c0_i32_1 = arith.constant 0 : i32
    return %c0_i32, %c0_i32_0 : i32, i32
  }
  func.func @transform_8(%arg0: i32) -> (i32, i32) {
    %c0_i32 = arith.constant 0 : i32
    %c0_i32_0 = arith.constant 0 : i32
    %c0_i32_1 = arith.constant 0 : i32
    return %c0_i32, %c0_i32_0 : i32, i32
  }
  func.func @transform_9(%arg0: i32) -> (i32, i32) {
    %c0_i32 = arith.constant 0 : i32
    %c0_i32_0 = arith.constant 0 : i32
    %c0_i32_1 = arith.constant 0 : i32
    return %c0_i32, %c0_i32_0 : i32, i32
  }
  func.func @transform_10(%arg0: i32) -> (i32, i32) {
    %c0_i32 = arith.constant 0 : i32
    %c0_i32_0 = arith.constant 0 : i32
    %c0_i32_1 = arith.constant 0 : i32
    return %c0_i32, %c0_i32_0 : i32, i32
  }
  func.func @transform_11(%arg0: i32) -> (i32, i32) {
    %c0_i32 = arith.constant 0 : i32
    %c0_i32_0 = arith.constant 0 : i32
    %c0_i32_1 = arith.constant 0 : i32
    return %c0_i32, %c0_i32_0 : i32, i32
  }
  func.func @transform_12(%arg0: i32) -> (i32, i32) {
    %c0_i32 = arith.constant 0 : i32
    %c0_i32_0 = arith.constant 0 : i32
    %c0_i32_1 = arith.constant 0 : i32
    return %c0_i32, %c0_i32_0 : i32, i32
  }
  func.func @transform_13(%arg0: i32) -> (i32, i32) {
    %c0_i32 = arith.constant 0 : i32
    %c0_i32_0 = arith.constant 0 : i32
    %c0_i32_1 = arith.constant 0 : i32
    return %c0_i32, %c0_i32_0 : i32, i32
  }
  func.func @transform_14(%arg0: i32) -> (i32, i32, i32, i32) {
    %c0_i32 = arith.constant 0 : i32
    %c0_i32_0 = arith.constant 0 : i32
    %c0_i32_1 = arith.constant 0 : i32
    %c0_i32_2 = arith.constant 0 : i32
    return %arg0, %c0_i32, %c0_i32_0, %c0_i32_1 : i32, i32, i32, i32
  }
}

</mosaic_0001>

<bundles_post_ra>
// kernel: eq.29
= control target key start
LH: loop header
LB: loop body
LE: loop exit
PB: predicated region body
PF: predicated region fallthrough
CT: control target
= control target key end

     0   :  { %vm7_vm0 = vcmask 130048   ;;  %vm13_vm1 = vcmask 261248   ;;  %s39_s0 = inlined_call_operand.vmem [shape: s32[2,16], index: 0, kind: input, shape index: {}]   ;;  %s40_s1 = inlined_call_operand.vmem [shape: s32[32], index: 1, kind: output, shape index: {}]  }
   0x1   :  { %v4_v0 = vld [vmem:[%s39_s0] sm:$0x3]  ;;  %s22_s0 = smov 16  }
   0x2   :  { %5 = vst [vmem:[#allocation1] sm:$0x3] %v4_v0 }
   0x9   :  { %v10_v1 = vld [vmem:[#allocation1 + $0x1] sm:$0x1]   ;;  %v6_v2 = vld [vmem:[#allocation1] sm:$0x1]  }
   0xa   :  { %11 = vrot.lane.b32.xlu0 %v10_v1, %s22_s0  ;;  %8 = vst.msk [vmem:[#allocation0] sm:$0x1] %vm7_vm0, %v6_v2  }
  0x7c   :  { %v12_v3 = vpop.permute.xlu0 %11  }
  0x7d   :  { %14 = vst.msk [vmem:[#allocation0] sm:$0x1] %vm13_vm1, %v12_v3  }
  0x84   :  { %v18_v4 = vld [vmem:[#allocation0] sm:$0x1] }
  0x85   :  { %20 = vst [vmem:[%s40_s1] sm:$0x1] %v18_v4 }

// kernel: eq.19
= control target key start
LH: loop header
LB: loop body
LE: loop exit
PB: predicated region body
PF: predicated region fallthrough
CT: control target
= control target key end

     0   :  { %vm7_vm0 = vcmask 23552   ;;  %vm13_vm1 = vcmask 48152   ;;  %s39_s0 = inlined_call_operand.vmem [shape: s32[2,3], index: 0, kind: input, shape index: {}]   ;;  %s40_s1 = inlined_call_operand.vmem [shape: s32[6], index: 1, kind: output, shape index: {}]  }
   0x1   :  { %v4_v0 = vld [vmem:[%s39_s0] sm:$0x3]  ;;  %s22_s0 = smov 3  }
   0x2   :  { %5 = vst [vmem:[#allocation1] sm:$0x3] %v4_v0 }
   0x9   :  { %v10_v1 = vld [vmem:[#allocation1 + $0x1] sm:$0x1]   ;;  %v6_v2 = vld [vmem:[#allocation1] sm:$0x1]  }
   0xa   :  { %11 = vrot.lane.b32.xlu0 %v10_v1, %s22_s0  ;;  %8 = vst.msk [vmem:[#allocation0] sm:$0x1] %vm7_vm0, %v6_v2  }
  0x7c   :  { %v12_v3 = vpop.permute.xlu0 %11  }
  0x7d   :  { %14 = vst.msk [vmem:[#allocation0] sm:$0x1] %vm13_vm1, %v12_v3  }
  0x84   :  { %v18_v4 = vld [vmem:[#allocation0] sm:$0x1] }
  0x85   :  { %20 = vst [vmem:[%s40_s1] sm:$0x1] %v18_v4 }

// kernel: squeeze.1
= control target key start
LH: loop header
LB: loop body
LE: loop exit
PB: predicated region body
PF: predicated region fallthrough
CT: control target
= control target key end

     0   :  { %vm7_vm0 = vcmask 23552   ;;  %s39_s0 = inlined_call_operand.vmem [shape: f32[6], index: 0, kind: input, shape index: {}]   ;;  %s40_s1 = inlined_call_operand.vmem [shape: f32[2,3], index: 1, kind: output, shape index: {}]  }
   0x1   :  { %v4_v0 = vld [vmem:[%s39_s0] sm:$0x1]  ;;  %s22_s0 = smov 125  }
   0x2   :  { %5 = vst [vmem:[#allocation1] sm:$0x1] %v4_v0 }
   0x9   :  { %v9_v1 = vld [vmem:[#allocation1] sm:$0x1]  }
   0xa   :  { %v6_v2 = vld [vmem:[#allocation1] sm:$0x1]   ;;  %10 = vrot.lane.b32.xlu0 %v9_v1, %s22_s0 }
   0xb   :  { %8 = vst.msk [vmem:[#allocation0] sm:$0x1] %vm7_vm0, %v6_v2  }
  0x7c   :  { %v11_v3 = vpop.permute.xlu0 %10  }
  0x7d   :  { %14 = vst.msk [vmem:[#allocation0 + $0x1] sm:$0x1] %vm7_vm0, %v11_v3  }
  0x84   :  { %v18_v4 = vld [vmem:[#allocation0] sm:$0x3] }
  0x85   :  { %20 = vst [vmem:[%s40_s1] sm:$0x3] %v18_v4 }

// kernel: _forward_impl.2
= control target key start
LH: loop header
LB: loop body
LE: loop exit
PB: predicated region body
PF: predicated region fallthrough
CT: control target
= control target key end

     0   :  { %vm58_vm0 = vcmask 130048   ;;  %v778_v11 = vmov 0.0|0.0   ;;  %vm249_vm1 = vcmask 64512   ;;  %vm153_vm2 = vcmask 261120   ;;  %s979_s3 = inlined_call_operand.vmem [shape: f32[16,32], index: 3, kind: input, shape index: {}]   ;;  %s980_s0 = inlined_call_operand.vmem [shape: f32[16,16], index: 0, kind: input, shape index: {}]   ;;  %s981_s7 = inlined_call_operand.vmem [shape: f32[32,32], index: 7, kind: input, shape index: {}]   ;;  %s982_s5 = inlined_call_operand.vmem [shape: f32[8,32], index: 5, kind: input, shape index: {}]   ;;  %s983_s1 = inlined_call_operand.vmem [shape: f32[32,8], index: 1, kind: input, shape index: {}]   ;;  %s984_s4 = inlined_call_operand.vmem [shape: f32[1,32], index: 4, kind: input, shape index: {}]   ;;  %s985_s11 = inlined_call_operand.vmem [shape: f32[32,32], index: 11, kind: input, shape index: {}]   ;;  %s986_s2 = inlined_call_operand.vmem [shape: f32[2,16], index: 2, kind: input, shape index: {}]   ;;  %s987_s9 = inlined_call_operand.vmem [shape: f32[32,32], index: 9, kind: input, shape index: {}]   ;;  %s988_s6 = inlined_call_operand.vmem [shape: f32[1,32], index: 6, kind: input, shape index: {}]   ;;  %s989_s8 = inlined_call_operand.vmem [shape: f32[1,32], index: 8, kind: input, shape index: {}]   ;;  %s990_s13 = inlined_call_operand.vmem [shape: f32[16,32], index: 13, kind: output, shape index: {0}]   ;;  %s991_s10 = inlined_call_operand.vmem [shape: f32[1,32], index: 10, kind: input, shape index: {}]   ;;  %s992_s14 = inlined_call_operand.vmem [shape: f32[32,32], index: 14, kind: output, shape index: {1}]   ;;  %s993_s12 = inlined_call_operand.vmem [shape: f32[1,32], index: 12, kind: input, shape index: {}]   ;;  %s994_s15 = inlined_call_operand.vmem [shape: f32[2,32], index: 15, kind: output, shape index: {2}]  }
   0x1   :  { %v49_v0 = vld [vmem:[%s979_s3] sm:$0xff]  ;;  %v50_v1 = vld [vmem:[%s979_s3 + $0x8] sm:$0xff]  ;;  %v144_v7 = vld [vmem:[%s981_s7 + $0x10] sm:$0xff]  ;;  %vm779_vm3 = vmmov 0   ;;  %v780_v27 = vmov 0.0   ;;  %vm618_vm4 = vcmask 254976  }
   0x2   :  { %v47_v2 = vld [vmem:[%s980_s0] sm:$0xff]  ;;  %v740_v3 = vpack.c.bf16 %v50_v1, %v49_v0  ;;  %v48_v4 = vld [vmem:[%s980_s0 + $0x8] sm:$0xff]  ;;  %v145_v9 = vld [vmem:[%s981_s7 + $0x18] sm:$0xff] }
   0x3   :  { %686 = vmatprep.mubr.msk.f32.mxu0 %vm58_vm0, %v47_v2  ;;  %v142_v5 = vld [vmem:[%s981_s7] sm:$0xff]  ;;  %v143_v6 = vld [vmem:[%s981_s7 + $0x8] sm:$0xff]  ;;  %v748_v10 = vpack.c.bf16 %v145_v9, %v144_v7  ;;  %v239_v15 = vld [vmem:[%s983_s1 + $0x10] sm:$0xff] }
   0x4   :  { %741 = vmatprep.subr.bf16.mxu0 %v740_v3  ;;  %v744_v8 = vpack.c.bf16 %v143_v6, %v142_v5  ;;  %v241_v12 = vld [vmem:[%s982_s5] sm:$0xff]  ;;  %v238_v14 = vld [vmem:[%s983_s1 + $0x8] sm:$0xff]  ;;  %v240_v16 = vld [vmem:[%s983_s1 + $0x18] sm:$0xff] }
   0x5   :  { %743 = vmatpush3.bf16.msra.mxu0 %v740_v3  ;;  %v237_v13 = vld [vmem:[%s983_s1] sm:$0xff]  ;;  %v534_v25 = vld [vmem:[%s985_s11 + $0x8] sm:$0xff]  ;;  %v535_v33 = vld [vmem:[%s985_s11 + $0x10] sm:$0xff] }
   0x6   :  { %745 = vmatprep.subr.bf16.mxu1 %v744_v8  ;;  %700 = vmatprep.subr.mxu0 %v241_v12  ;;  %v632_v17 = vld [vmem:[%s984_s4] ss:$0 sm:$0xff]  ;;  %v348_v31 = vld [vmem:[%s987_s9 + $0x8] sm:$0xff]  ;;  %v536_v34 = vld [vmem:[%s985_s11 + $0x18] sm:$0xff] }
   0x7   :  { %747 = vmatpush3.bf16.msra.mxu1 %v744_v8  ;;  %v533_v24 = vld [vmem:[%s985_s11] sm:$0xff]  ;;  %v767_v35 = vpack.c.bf16 %v536_v34, %v535_v33  ;;  %v349_v36 = vld [vmem:[%s987_s9 + $0x10] sm:$0xff]  ;;  %v350_v37 = vld [vmem:[%s987_s9 + $0x18] sm:$0xff] }
   0x8   :  { %687 = vmatmul.mubr.msk.f32.vlgmr.msra.gmra.mrb[0].mxu0 %vm58_vm0, %v48_v4  ;;  %749 = vmatprep.subr.bf16.mxu1 %v748_v10  ;;  %v459_v28 = vld [vmem:[%s986_s2] sm:$0x3]  ;;  %v764_v29 = vpack.c.bf16 %v534_v25, %v533_v24  ;;  %v756_v38 = vpack.c.bf16 %v350_v37, %v349_v36 }
   0x9   :  { %701 = vmatpush3.msra.mxu0 %v241_v12  ;;  %702 = vmatprep.mubr.msk.f32.mxu0 %vm249_vm1, %v237_v13  ;;  %v347_v30 = vld [vmem:[%s987_s9] sm:$0xff] }
   0xa   :  { %v752_v32 = vpack.c.bf16 %v348_v31, %v347_v30  ;;  %v638_v40 = vld [vmem:[%s988_s6] ss:$0 sm:$0xff] }
   0xb   :  { %751 = vmatpush3.bf16.msra.mxu1 %v748_v10  ;;  %v635_v48 = vld [vmem:[%s989_s8] ss:$0 sm:$0xff] }
   0xc   :  { %760 = vmatprep.subr.bf16.mxu1 %v778_v11  ;;  %703 = vmatmul.mubr.msk.f32.vlgmr.msra.gmra.mrb[2].mxu0 %vm249_vm1, %v238_v14  ;;  %v643_v56 = vld [vmem:[%s991_s10] ss:$0 sm:$0xff] }
   0xd   :  { %705 = vmatprep.mubr.msk.f32.mxu0 %vm249_vm1, %v239_v15  ;;  %753 = vmatprep.subr.bf16.mxu0 %v752_v32  ;;  %v649_v0 = vld [vmem:[%s993_s12] ss:$0 sm:$0xff] }
   0xe   :  { %755 = vmatpush3.bf16.msra.mxu0 %v752_v32 }
   0xf   :  { %757 = vmatprep.subr.bf16.mxu0 %v756_v38 }
  0x10   :  { %706 = vmatmul.mubr.msk.f32.gmra.mrb[4].mxu0 %vm249_vm1, %v240_v16 }
  0x12   :  { %759 = vmatpush3.bf16.msra.mxu0 %v756_v38 }
  0xdb   :  { %v688_v18 = vpop.f32.mrb[0].mxu0 }
  0xdc   :  { %v137_v19 = vadd.f32 %v688_v18, %v632_v17  ;;  %v131_v20 = vpop.f32.mrb[1].mxu0 }
  0xdd   :  { %v132_v21 = vadd.f32 %v632_v17, %v131_v20 }
  0xde   :  { %772 = vtanh.f32 %v137_v19 }
  0xdf   :  { %774 = vtanh.f32 %v132_v21  ;;  %v704_v39 = vpop.f32.mrb[2].mxu0 }
  0xe0   :  { %v328_v41 = vpop.f32.mrb[3].mxu0  ;;  %v334_v42 = vadd.f32 %v704_v39, %v638_v40 }
  0xe1   :  { %v329_v43 = vadd.f32 %v638_v40, %v328_v41 }
  0xe3   :  { %v707_v44 = vpop.f32.mrb[4].mxu0  ;;  %716 = vmatprep.mubr.msk.f32.mxu0 %vm153_vm2, %v329_v43 }
  0xe4   :  { %v344_v45 = vadd.f32 %v707_v44, %v638_v40  ;;  %v338_v46 = vpop.f32.mrb[5].mxu0  ;;  %717 = vmatmul.mubr.msk.f32.vlgmr.msra.gmra.mrb[6].mxu0 %vm153_vm2, %v334_v42 }
  0xe5   :  { %v339_v47 = vadd.f32 %v638_v40, %v338_v46 }
  0xe7   :  { %719 = vmatprep.mubr.msk.f32.mxu0 %vm153_vm2, %v339_v47 }
  0xe8   :  { %v773_v22 = vpop.eup %772  ;;  %720 = vmatmul.mubr.msk.f32.gmra.mrb[8].mxu0 %vm153_vm2, %v344_v45 }
  0xe9   :  { %v775_v23 = vpop.eup %774 }
  0xea   :  { %697 = vmatprep.mubr.msk.f32.mxu1 %vm153_vm2, %v775_v23  ;;  %v761_v26 = vpack.c.bf16 %v773_v22, %v775_v23 }
  0xeb   :  { %698 = vmatmul.mubr.msk.f32.vlgmr.msra.gmra.mrb[0].mxu1 %vm153_vm2, %v773_v22 }
  0xec   :  { %762 = vmatpush3.bf16.msra.mxu1 %v761_v26  ;;  %726 = vmatprep.mubr.msk.f32.mxu1 %vm779_vm3, %v780_v27 }
  0xed   :  { %763 = vmatprep.subr.bf16.mxu1 %v778_v11 }
  0xef   :  { %727 = vmatmul.mubr.msk.f32.vlgmr.msra.gmra.mrb[2].mxu1 %vm58_vm0, %v459_v28 }
  0xf0   :  { %765 = vmatpush3.bf16.msra.mxu1 %v764_v29  ;;  %737 = vmatprep.mubr.msk.f32.mxu1 %vm779_vm3, %v780_v27 }
  0xf1   :  { %766 = vmatprep.subr.bf16.mxu1 %v778_v11 }
  0xf4   :  { %768 = vmatpush3.bf16.msra.mxu1 %v767_v35 }
 0x1b7   :  { %v718_v55 = vpop.f32.mrb[6].mxu0 }
 0x1b8   :  { %v436_v57 = vpop.f32.mrb[7].mxu0  ;;  %v442_v58 = vadd.f32 %v718_v55, %v643_v56 }
 0x1b9   :  { %v437_v59 = vadd.f32 %v643_v56, %v436_v57 }
 0x1ba   :  { %456 = vst.msk [vmem:[%s992_s14 + $0x8] sm:$0xff] %vm153_vm2, %v442_v58 }
 0x1bb   :  { %455 = vst.msk [vmem:[%s992_s14] sm:$0xff] %vm153_vm2, %v437_v59  ;;  %v721_v60 = vpop.f32.mrb[8].mxu0 }
 0x1bc   :  { %v446_v61 = vpop.f32.mrb[9].mxu0  ;;  %v452_v62 = vadd.f32 %v721_v60, %v643_v56 }
 0x1bd   :  { %v447_v63 = vadd.f32 %v643_v56, %v446_v61 }
 0x1be   :  { %v699_v49 = vpop.f32.mrb[0].mxu1  ;;  %458 = vst.msk [vmem:[%s992_s14 + $0x18] sm:$0xff] %vm153_vm2, %v452_v62 }
 0x1bf   :  { %v232_v50 = vadd.f32 %v699_v49, %v635_v48  ;;  %v226_v51 = vpop.f32.mrb[1].mxu1  ;;  %457 = vst.msk [vmem:[%s992_s14 + $0x10] sm:$0xff] %vm153_vm2, %v447_v63 }
 0x1c0   :  { %v227_v52 = vadd.f32 %v635_v48, %v226_v51 }
 0x1c1   :  { %236 = vst.msk [vmem:[%s990_s13 + $0x8] sm:$0xff] %vm153_vm2, %v232_v50 }
 0x1c2   :  { %235 = vst.msk [vmem:[%s990_s13] sm:$0xff] %vm153_vm2, %v227_v52  ;;  %v529_v53 = vpop.f32.mrb[2].mxu1 }
 0x1c3   :  { %v728_v54 = vpop.f32.mrb[3].mxu1  ;;  %738 = vmatmul.mubr.msk.f32.vlgmr.msra.gmra.mrb[4].mxu1 %vm153_vm2, %v529_v53 }
 0x296   :  { %v613_v1 = vpop.f32.mrb[4].mxu1 }
 0x297   :  { %v614_v2 = vadd.f32 %v649_v0, %v613_v1  ;;  %v739_v3 = vpop.f32.mrb[5].mxu1 }
 0x299   :  { %776 = vtanh.f32 %v614_v2 }
 0x2a3   :  { %v777_v4 = vpop.eup %776 }
 0x2a4   :  { %619 = vst.msk [vmem:[%s994_s15] sm:$0x3] %vm618_vm4, %v777_v4 }

// kernel: _forward_impl.3
= control target key start
LH: loop header
LB: loop body
LE: loop exit
PB: predicated region body
PF: predicated region fallthrough
CT: control target
= control target key end

     0   :  { %s3565_s0 = inlined_call_operand.vmem [shape: f32[6,32], index: 0, kind: input, shape index: {}]   ;;  %s3566_s1 = inlined_call_operand.vmem [shape: bf16[32,16], index: 1, kind: input, shape index: {}]   ;;  %s3567_s2 = inlined_call_operand.vmem [shape: bf16[16,32], index: 2, kind: input, shape index: {}]   ;;  %s3568_s3 = inlined_call_operand.vmem [shape: f32[6,16], index: 3, kind: input, shape index: {}]   ;;  %s3569_s4 = inlined_call_operand.vmem [shape: bf16[32,32], index: 4, kind: input, shape index: {}]   ;;  %s3570_s5 = inlined_call_operand.vmem [shape: bf16[32,32], index: 5, kind: input, shape index: {}]   ;;  %s3571_s6 = inlined_call_operand.vmem [shape: f32[6,32], index: 6, kind: input, shape index: {}]   ;;  %s3572_s7 = inlined_call_operand.vmem [shape: bf16[16,16], index: 7, kind: input, shape index: {}]   ;;  %s3573_s8 = inlined_call_operand.vmem [shape: bf16[112,128], index: 8, kind: input, shape index: {}]   ;;  %s3574_s9 = inlined_call_operand.vmem [shape: f32[1,128], index: 9, kind: input, shape index: {}]   ;;  %s3575_s10 = inlined_call_operand.vmem [shape: bf16[32,16], index: 10, kind: input, shape index: {}]   ;;  %s3576_s11 = inlined_call_operand.vmem [shape: f32[1,16], index: 11, kind: input, shape index: {}]   ;;  %s3577_s12 = inlined_call_operand.vmem [shape: s32[6,7], index: 12, kind: output, shape index: {0}]   ;;  %s3578_s13 = inlined_call_operand.vmem [shape: f32[6,7], index: 13, kind: output, shape index: {1}]   ;;  %s3579_s14 = inlined_call_operand.hbm [shape: s32[6,2,6,7], index: 14, kind: output, shape index: {2}]  }
   0x1   :  { %3584 = sst [smem:[#allocation10_spill]] %s3565_s0 }
   0x2   :  { %3585 = sst [smem:[#allocation11_spill]] %s3566_s1 }
   0x3   :  { %3586 = sst [smem:[#allocation12_spill]] %s3567_s2 }
   0x4   :  { %20 = vsyncpa [#allocation8], 0 }
   0x5   :  { %22 = vsyncpa [#allocation8 + $0x1], 0  ;;  %s2669_s29 = smov 0   ;;  %s2671_s30 = smov 0  }
   0x6   :  { %s2673_s15 = smov 0   ;;  %s2675_s16 = smov 0  }
   0x7 LB: > { %s2690_s17 = sadd.s32 4294967295, %s2576_s16   ;;  %s2195_s18 = sadd.s32 4294967294, %s2576_s16   ;;  %s2576_s16 = sphi %s2675_s16, %s3601_s16   ;;  %s2572_s15 = sphi %s2673_s15, %s3600_s15   ;;  %s2568_s30 = sphi %s2671_s30, %s3599_s30   ;;  %s2564_s29 = sphi %s2669_s29, %s3598_s29  }
   0x8   : > { %s2694_s19 = sadd.s32 1, %s2576_s16   ;;  %s329_s20 = sadd.s32 1, %s2572_s15 }
   0x9   : > { %s326_s21 = ssub.s32 %s2576_s16, %s2694_s19  ;;  %p339_p0 = scmp.ne.s32.totalorder %s2572_s15, %s2568_s30 }
   0xa   : > { %p327_p1 = scmp.eq.s32.totalorder %s326_s21, 0  ;;  %p340_p2 = scmp.eq.s32.totalorder %s2690_s17, 5 }
   0xb   : > { %p345_p3 = scmp.ne.s32.totalorder %s2568_s30, %s2564_s29  ;;  %p346_p4 = scmp.eq.s32.totalorder %s2195_s18, 5 }
   0xc   : > { %s2705_s22 = scalar_select %p327_p1, %s2572_s15, %s329_s20  }
   0xd   : > { %p2707_p5 = por %p340_p2, %p339_p0  ;;  %p2711_p6 = por %p346_p4, %p345_p3 }
   0xe   : > { %p2197_p7 = scmp.ge.s32.totalorder %s2576_s16, 1  ;;  %p400_p8 = scmp.lt.s32.totalorder %s2576_s16, 7 }
  0x10   : > { %p401_p9 = pnand %p2197_p7, %p400_p8 }
  0x11   : > { %s3580_s25 = sand.u32 (!%p401_p9), 1, %s2568_s30   ;;  %p442_p10 = scmp.eq.s32.totalorder (!%p401_p9), %s2690_s17, 0 }
  0x12   : > { %404 = sbr.rel (%p401_p9) target bundleno = 4449 (0x1161), region = 68  ;;  %s2198_s26 = sshll.u32 (!%p401_p9), %s3580_s25, 4 }
  0x13   : > { %s2721_s27 = scalar_lea.vmem (!%p401_p9), [#allocation7], %s2198_s26  ;;  %p2199_p11 = scmp.ne.s32.totalorder (!%p401_p9), %s2690_s17, 0 }
  0x19   : > { %445 = sbr.rel (%p2199_p11) target bundleno = 33 (0x21), region = 72  ;;  %s3589_s0 = sld [smem:[#allocation10_spill]] (!%p2199_p11)  ;;  %vm447_vm0 = vcmask (!%p2199_p11), 259072   ;;  %vm450_vm1 = vcmask (!%p2199_p11), 5120   ;;  %v452_v1 = vlaneseq (!%p2199_p11)  ;;  %v2578_v2 = vmov (!%p2199_p11), 0.0  }
  0x1a   : > { %449 = vst.msk [vmem:[#allocation3] sm:$0x3f] (!%p2199_p11), %vm447_vm0, %v2578_v2  ;;  %vm459_vm2 = vcmask (!%p2199_p11), 54272   ;;  %v2579_v4 = vmov (!%p2199_p11), 1   ;;  %vm457_vm3 = vcmask (!%p2199_p11), 128000  }
  0x1b   : > { %451 = vst.msk [vmem:[#allocation4] sm:$0x3f] (!%p2199_p11), %vm450_vm1, %v2578_v2  ;;  %v453_v3 = vand.u32 (!%p2199_p11), 127, %v452_v1 }
  0x1c   : > { %460 = vst.msk [vmem:[%s3577_s12] sm:$0x3f] (!%p2199_p11), %vm459_vm2, %v2579_v4  ;;  %461 = vst.msk [vmem:[%s3578_s13] sm:$0x3f] (!%p2199_p11), %vm459_vm2, %v2578_v2 }
  0x1d   : > { %462 = vst.msk [vmem:[#allocation6] sm:$0x3f] (!%p2199_p11), %vm459_vm2, %v2579_v4  ;;  %463 = vst.msk [vmem:[#allocation6 + $0x8] sm:$0x3f] (!%p2199_p11), %vm459_vm2, %v2579_v4  ;;  %vm454_vm4 = vcmp.eq.s32.totalorder (!%p2199_p11), %v453_v3, 1 }
  0x1e   : > { %v2200_v5 = vsel (!%p2199_p11), %vm454_vm4, 1.0, %v2578_v2 }
  0x1f   : > { %v446_v0 = vld [vmem:[%s3589_s0] sm:$0x3f] (!%p2199_p11)  ;;  %458 = vst.msk [vmem:[#allocation5] sm:$0x3f] (!%p2199_p11), %vm457_vm3, %v2200_v5 }
  0x20   : > { %448 = vst.msk [vmem:[#allocation2] sm:$0x3f] %vm447_vm0, %v446_v0 }
  0x21 PF: > { %v2477_v6 = vld [vmem:[%s3572_s7] sm:$0xff]   ;;  %v3582_v7 = vmov 0.0   ;;  %vm2581_vm5 = vmmov 0   ;;  %vm476_vm6 = vcmask 130048   ;;  %s3590_s1 = sld [smem:[#allocation11_spill]]  ;;  %vm537_vm7 = vcmask 261120  }
  0x22   : > { %2276 = vmatprep.subr.bf16.mxu0 %v3582_v7  ;;  %2296 = vmatprep.subr.bf16.mxu1 %v3582_v7  ;;  %v2480_v12 = vld [vmem:[%s3569_s4] sm:$0xff]   ;;  %v2481_v14 = vld [vmem:[%s3569_s4 + $0x8] sm:$0xff]   ;;  %vm584_vm10 = vcmask 128000   ;;  %vm707_vm11 = vcmask 259072   ;;  %s3591_s2 = sld [smem:[#allocation12_spill]]  ;;  %v2487_v57 = vld [vmem:[%s3573_s8 + $0x10] sm:$0xff]  }
  0x23   : > { %2277 = vmatpush3.bf16.msra.mxu0 %v2477_v6  ;;  %2278 = vmatprep.mubr.msk.bf16.mxu0 %vm2581_vm5, %v3582_v7  ;;  %v581_v20 = vld [vmem:[%s3568_s3] sm:$0x3f]  ;;  %v2484_v52 = vld [vmem:[%s3570_s5 + $0x8] sm:$0xff]   ;;  %v2488_v58 = vld [vmem:[%s3573_s8 + $0x18] sm:$0xff]   ;;  %s2582_s25 = smov 16   ;;  %s2583_s20 = smov 32  }
  0x24   : > { %2282 = vmatprep.subr.bf16.mxu0 %v3582_v7  ;;  %2300 = vmatprep.mubr.msk.bf16.mxu1 %vm2581_vm5, %v3582_v7  ;;  %v704_v21 = vld [vmem:[%s3571_s6] sm:$0x3f]  ;;  %vm582_vm8 = vcmp.gt.f32.partialorder %v581_v20, 0.0  ;;  %v2486_v56 = vld [vmem:[%s3573_s8 + $0x8] sm:$0xff]   ;;  %v2491_v61 = vld [vmem:[%s3573_s8 + $0x30] sm:$0xff]   ;;  %s2584_s21 = smov 48  }
  0x25   : > { %2297 = vmatpush3.bf16.msra.mxu1 %v2480_v12  ;;  %vm705_vm9 = vcmp.gt.f32.partialorder %v704_v21, 0.0  ;;  %v2483_v49 = vld [vmem:[%s3570_s5] sm:$0xff]   ;;  %v2490_v60 = vld [vmem:[%s3573_s8 + $0x28] sm:$0xff]   ;;  %s2585_s26 = smov 80   ;;  %vm792_vm12 = vcmask 392192   ;;  %vm794_vm13 = vcmask 654336  }
  0x26   : > { %2298 = vmatprep.subr.bf16.mxu1 %v3582_v7  ;;  %v2485_v55 = vld [vmem:[%s3573_s8] sm:$0xff]   ;;  %v465_v2 = vld [vmem:[#allocation3] sm:$0x3f]  ;;  %vm860_vm14 = vcmask 916480   ;;  %s2586_s0 = smov 64   ;;  %s2589_s18 = smov 96  }
  0x27   : > { %v466_v8 = vld [vmem:[#allocation5] sm:$0x3f]  ;;  %v2478_v10 = vld [vmem:[%s3590_s1] sm:$0xff]   ;;  %v2479_v11 = vld [vmem:[%s3590_s1 + $0x8] sm:$0xff]   ;;  %p2243_p12 = scmp.le.s32.totalorder %s2690_s17, 1 }
  0x28   : > { %v467_v9 = vpack.c.bf16 %v466_v8, %v466_v8  ;;  %v2752_v13 = vld [vmem:[#allocation2] sm:$0x3f] }
  0x29   : > { %v520_v15 = vpack.c.bf16 %v2752_v13, %v2752_v13  ;;  %2299 = vmatpush3.bf16.msra.mxu1 %v2481_v14  ;;  %v2482_v44 = vld [vmem:[%s3591_s2] sm:$0xff]  }
  0x2a   : > { %2279 = vmatmul.mubr.msk.bf16.vlgmr.msra.gmra.mrb[0].mxu0 %vm476_vm6, %v467_v9  ;;  %2312 = vmatprep.subr.bf16.mxu1 %v3582_v7  ;;  %v2489_v59 = vld [vmem:[%s3573_s8 + $0x20] sm:$0xff]  }
  0x2b   : > { %2283 = vmatpush3.bf16.msra.mxu0 %v2478_v10  ;;  %2286 = vmatprep.mubr.msk.bf16.mxu0 %vm2581_vm5, %v3582_v7 }
  0x2c   : > { %2284 = vmatprep.subr.bf16.mxu0 %v3582_v7  ;;  %2301 = vmatmul.mubr.msk.bf16.vlgmr.msra.gmra.mrb[0].mxu1 %vm537_vm7, %v520_v15 }
  0x2d   : > { %2326 = vmatprep.mubr.msk.bf16.mxu1 %vm2581_vm5, %v3582_v7  ;;  %2313 = vmatpush3.bf16.msra.mxu1 %v2485_v55 }
  0x2e   : > { %2314 = vmatprep.subr.bf16.mxu1 %v3582_v7 }
  0x2f   : > { %2285 = vmatpush3.bf16.msra.mxu0 %v2479_v11 }
  0x30   : > { %2290 = vmatprep.subr.bf16.mxu0 %v3582_v7 }
  0x31   : > { %2315 = vmatpush3.bf16.msra.mxu1 %v2486_v56 }
  0x32   : > { %2287 = vmatmul.mubr.msk.bf16.vlgmr.msra.gmra.mrb[4].mxu0 %vm537_vm7, %v520_v15  ;;  %2316 = vmatprep.subr.bf16.mxu1 %v3582_v7 }
  0x33   : > { %2292 = vmatprep.mubr.msk.bf16.mxu0 %vm2581_vm5, %v3582_v7  ;;  %2291 = vmatpush3.bf16.msra.mxu0 %v2482_v44 }
  0x34   : > { %2304 = vmatprep.subr.bf16.mxu0 %v3582_v7 }
  0x35   : > { %2317 = vmatpush3.bf16.msra.mxu1 %v2487_v57 }
  0x36   : > { %2318 = vmatprep.subr.bf16.mxu1 %v3582_v7 }
  0x39   : > { %2319 = vmatpush3.bf16.msra.mxu1 %v2488_v58 }
  0x3a   : > { %2320 = vmatprep.subr.bf16.mxu1 %v3582_v7 }
  0x3d   : > { %2321 = vmatpush3.bf16.msra.mxu1 %v2489_v59 }
  0x3e   : > { %2322 = vmatprep.subr.bf16.mxu1 %v3582_v7 }
  0x41   : > { %2323 = vmatpush3.bf16.msra.mxu1 %v2490_v60 }
  0x42   : > { %2324 = vmatprep.subr.bf16.mxu1 %v3582_v7 }
  0x45   : > { %2325 = vmatpush3.bf16.msra.mxu1 %v2491_v61 }
  0xfd   : > { %v2772_v16 = vpop.f32.mrb[0].mxu0 }
  0xfe   : > { %v2280_v17 = vpop.f32.mrb[1].mxu0 }
  0xff   : > { %v517_v18 = vpop.f32.mrb[2].mxu0  ;;  %v698_v23 = vpop.f32.mrb[0].mxu1  ;;  %v2214_v17 = vld [vmem:[%s3574_s9] ss:$0 sm:$0xff] }
 0x100   : > { %v2281_v19 = vpop.f32.mrb[3].mxu0  ;;  %v706_v26 = vsel %vm705_vm9, %v698_v23, -1e+30  ;;  %v2302_v27 = vpop.f32.mrb[1].mxu1 }
 0x101   : > { %v701_v30 = vpop.f32.mrb[2].mxu1  ;;  %v708_v33 = vsel %vm707_vm11, %v706_v26, -inf }
 0x102   : > { %v2303_v32 = vpop.f32.mrb[3].mxu1 }
 0x105   : > { %v575_v22 = vpop.f32.mrb[4].mxu0 }
 0x106   : > { %v583_v24 = vsel %vm582_vm8, %v575_v22, -1e+30  ;;  %v2288_v25 = vpop.f32.mrb[5].mxu0 }
 0x107   : > { %v578_v28 = vpop.f32.mrb[6].mxu0  ;;  %v585_v29 = vsel %vm584_vm10, %v583_v24, -inf }
 0x108   : > { %586 = vmax.xlane.f32.xlu0 %v585_v29  ;;  %v2289_v31 = vpop.f32.mrb[7].mxu0 }
 0x10c   : > { %709 = vmax.xlane.f32.xlu0 %v708_v33  ;;  %v2492_v33 = vld [vmem:[%s3575_s10] sm:$0xff]  }
 0x195   : > { %v587_v34 = vpop.xlane.xlu0 %586 }
 0x196   : > { %v588_v35 = vsub.f32 %v583_v24, %v587_v34  ;;  %v2493_v34 = vld [vmem:[%s3575_s10 + $0x8] sm:$0xff]  }
 0x198   : > { %v589_v36 = vmul.f32 1.442695, %v588_v35 }
 0x199   : > { %v710_v37 = vpop.xlane.xlu0 %709 }
 0x19a   : > { %2494 = vpow2.f32 %v589_v36  ;;  %v711_v38 = vsub.f32 %v706_v26, %v710_v37 }
 0x19c   : > { %v712_v39 = vmul.f32 1.442695, %v711_v38 }
 0x19e   : > { %2496 = vpow2.f32 %v712_v39 }
 0x1a4   : > { %v2495_v40 = vpop.eup %2494 }
 0x1a5   : > { %v591_v41 = vsel %vm584_vm10, %v2495_v40, 0.0 }
 0x1a6   : > { %592 = vadd.xlane.f32.xlu1 %v591_v41 }
 0x1a8   : > { %v2497_v42 = vpop.eup %2496 }
 0x1a9   : > { %v714_v43 = vsel %vm707_vm11, %v2497_v42, 0.0 }
 0x1aa   : > { %715 = vadd.xlane.f32.xlu1 %v714_v43 }
 0x233   : > { %v593_v45 = vpop.xlane.xlu1 %592 }
 0x234   : > { %2498 = vrcp.f32 %v593_v45 }
 0x237   : > { %v716_v46 = vpop.xlane.xlu1 %715 }
 0x238   : > { %2500 = vrcp.f32 %v716_v46 }
 0x23e   : > { %v2499_v47 = vpop.eup %2498 }
 0x23f   : > { %v595_v48 = vmul.f32 %v2499_v47, %v2495_v40  ;;  %v2223_v40 = vld [vmem:[%s3576_s11] ss:$0 sm:$0xff]  ;;  %v1022_v47 = vld [vmem:[#allocation4] sm:$0x3f] }
 0x241   : > { %v596_v50 = vpack.c.bf16 %v595_v48, %v595_v48  ;;  %v2587_v48 = vmov 0  }
 0x242   : > { %v2501_v51 = vpop.eup %2500  ;;  %2476 = vset.pattern.permute.xlu0 %v2587_v48 }
 0x243   : > { %2293 = vmatmul.mubr.msk.bf16.vlgmr.msra.gmra.mrb[8].mxu0 %vm476_vm6, %v596_v50  ;;  %v718_v53 = vmul.f32 %v2501_v51, %v2497_v42 }
 0x244   : > { %2305 = vmatpush3.bf16.msra.mxu0 %v2483_v49  ;;  %2308 = vmatprep.mubr.msk.bf16.mxu0 %vm2581_vm5, %v3582_v7 }
 0x245   : > { %2306 = vmatprep.subr.bf16.mxu0 %v3582_v7  ;;  %v719_v54 = vpack.c.bf16 %v718_v53, %v718_v53 }
 0x248   : > { %2307 = vmatpush3.bf16.msra.mxu0 %v2484_v52 }
 0x249   : > { %2330 = vmatprep.subr.bf16.mxu0 %v3582_v7 }
 0x24b   : > { %2309 = vmatmul.mubr.msk.bf16.vlgmr.msra.gmra.mrb[12].mxu0 %vm537_vm7, %v719_v54  ;;  %v1014_v54 = vlaneseq }
 0x24c   : > { %2334 = vmatprep.mubr.msk.bf16.mxu0 %vm2581_vm5, %v3582_v7  ;;  %2331 = vmatpush3.bf16.msra.mxu0 %v2492_v33 }
 0x24d   : > { %2332 = vmatprep.subr.bf16.mxu0 %v3582_v7  ;;  %v2858_v56 = vand.u32 127, %v1014_v54  ;;  %v2860_v57 = vshrl.u32 %v1014_v54, 7 }
 0x24f   : > { %vm1016_vm15 = vcmp.eq.s32.totalorder %v2858_v56, 0  ;;  %vm1017_vm0 = vcmp.eq.s32.totalorder %v2858_v56, 1  ;;  %vm1031_vm1 = vcmp.eq.s32.totalorder %v2860_v57, 0  ;;  %vm1032_vm2 = vcmp.eq.s32.totalorder %v2860_v57, 3 }
 0x250   : > { %2333 = vmatpush3.bf16.msra.mxu0 %v2493_v34  ;;  %vm1018_vm3 = vmor %vm1016_vm15, %vm1017_vm0  ;;  %vm1019_vm4 = vcmp.eq.s32.totalorder %v2858_v56, 2  ;;  %vm1047_vm15 = vcmask 1042432   ;;  %vm1243_vm0 = vcmask 1045507  }
 0x251   : > { %vm1033_vm5 = vmor %vm1031_vm1, %vm1032_vm2 }
 0x316   : > { %v642_v62 = vpop.f32.mrb[8].mxu0 }
 0x317   : > { %780 = vrot.lane.b32.xlu0 %v642_v62, %s2582_s25  ;;  %v2294_v63 = vpop.f32.mrb[9].mxu0 }
 0x318   : > { %v645_v0 = vpop.f32.mrb[10].mxu0 }
 0x319   : > { %v2295_v1 = vpop.f32.mrb[11].mxu0 }
 0x31b   : > { %912 = vrot.lane.b32.xlu0 %v465_v2, %s2583_s20 }
 0x31e   : > { %v773_v3 = vpop.f32.mrb[12].mxu0 }
 0x31f   : > { %784 = vrot.lane.b32.xlu1 %v773_v3, %s2584_s21  ;;  %v2310_v4 = vpop.f32.mrb[13].mxu0  ;;  %s1560_s21 = sadd.s32 1, %s2690_s17 }
 0x320   : > { %v776_v5 = vpop.f32.mrb[14].mxu0 }
 0x321   : > { %v2311_v6 = vpop.f32.mrb[15].mxu0 }
 0x323   : > { %788 = vrot.lane.b32.xlu1 %v2752_v13, %s2585_s26 }
 0x389   : > { %v781_v8 = vpop.permute.xlu0 %780 }
 0x38a   : > { %v791_v10 = vsel %vm476_vm6, %v2772_v16, %v781_v8  ;;  %vm1020_vm6 = vmor %vm1018_vm3, %vm1019_vm4  ;;  %v1040_v8 = vshll.u32 %v2860_v57, 4 }
 0x38d   : > { %v913_v29 = vpop.permute.xlu0 %912 }
 0x391   : > { %v785_v9 = vpop.permute.xlu1 %784 }
 0x392   : > { %v793_v11 = vsel %vm792_vm12, %v791_v10, %v785_v9 }
 0x395   : > { %v789_v12 = vpop.permute.xlu1 %788 }
 0x396   : > { %v795_v14 = vsel %vm794_vm13, %v793_v11, %v789_v12  ;;  %vm1043_vm13 = vcmask 124928  }
 0x397   : > { %v796_v15 = vpack.c.bf16 %v795_v14, %v795_v14 }
 0x399   : > { %2327 = vmatmul.mubr.msk.bf16.vlgmr.msra.gmra.mrb[4].mxu1 %vm860_vm14, %v796_v15  ;;  %vm1239_vm14 = vcmask 128003   ;;  %v2883_v15 = vadd.s32 %v1040_v8, %v2858_v56 }
 0x46c   : > { %v898_v18 = vpop.f32.mrb[4].mxu1 }
 0x46d   : > { %v899_v19 = vadd.f32 %v2214_v17, %v898_v18  ;;  %v2328_v13 = vpop.f32.mrb[5].mxu1 }
 0x46e   : > { %v901_v20 = vpop.f32.mrb[6].mxu1 }
 0x46f   : > { %2502 = vtanh.f32 %v899_v19  ;;  %v2329_v21 = vpop.f32.mrb[7].mxu1  ;;  %v904_v16 = vsub.f32 0.0, %v899_v19  ;;  %v2886_v20 = vcvt.s32.f32 %v2883_v15 }
 0x471   : > { %v905_v23 = vmul.f32 1.442695, %v904_v16 }
 0x473   : > { %2504 = vpow2.f32 %v905_v23 }
 0x479   : > { %v2503_v22 = vpop.eup %2502 }
 0x47a   : > { %917 = vrot.lane.b32.xlu1 %v2503_v22, %s2586_s0 }
 0x47d   : > { %v2505_v24 = vpop.eup %2504 }
 0x47e   : > { %v907_v25 = vadd.f32 1.0, %v2505_v24  ;;  %v1253_v24 = vrot.slane %v2886_v20, 5 }
 0x480   : > { %2506 = vrcp.f32 %v907_v25 }
 0x48a   : > { %v2507_v26 = vpop.eup %2506 }
 0x48b   : > { %v915_v30 = vmul.f32 %v2507_v26, %v913_v29 }
 0x4ec   : > { %v918_v27 = vpop.permute.xlu1 %917 }
 0x4ed   : > { %v920_v28 = vmul.f32 %v2507_v26, %v918_v27 }
 0x4ef   : > { %922 = vrot.lane.b32.xlu1 %v920_v28, %s2583_s20 }
 0x561   : > { %v923_v31 = vpop.permute.xlu1 %922 }
 0x562   : > { %v2837_v32 = vadd.f32 %v923_v31, %v915_v30 }
 0x564   : > { %2508 = vtanh.f32 %v2837_v32 }
 0x56e   : > { %v2509_v35 = vpop.eup %2508 }
 0x56f   : > { %928 = vrot.lane.b32.xlu0 %v2509_v35, %s2586_s0  ;;  %s1035_s0 = scalar_select %p442_p10, 1, 0 }
 0x571   : > { %v1036_v58 = vstv %s1035_s0 }
 0x572   : > { %vm1037_vm9 = vcmp.eq.s32.totalorder %v1036_v58, 1 }
 0x5e1   : > { %v929_v36 = vpop.permute.xlu0 %928 }
 0x5e2   : > { %v2847_v37 = vmul.f32 %v2507_v26, %v929_v36 }
 0x5e4   : > { %v932_v38 = vpack.c.bf16 %v2847_v37, %v2847_v37 }
 0x5e6   : > { %945 = vrot.lane.b32.xlu1 %v932_v38, %s2583_s20 }
 0x658   : > { %v946_v39 = vpop.permute.xlu1 %945 }
 0x659   : > { %2335 = vmatmul.mubr.msk.bf16.vlgmr.msra.gmra.mrb[16].mxu0 %vm537_vm7, %v946_v39  ;;  %vm2588_vm7 = vmmov 1  }
 0x65a   : > { %vm1034_vm8 = vmxor %vm1033_vm5, %vm2588_vm7  ;;  %vm1224_vm7 = vcmp.eq.s32.totalorder %v2860_v57, 1 }
 0x65b   : > { %vm1038_vm12 = vmand %vm1037_vm9, %vm1034_vm8 }
 0x72c   : > { %v996_v41 = vpop.f32.mrb[16].mxu0 }
 0x72d   : > { %v997_v42 = vadd.f32 %v2223_v40, %v996_v41  ;;  %v2336_v43 = vpop.f32.mrb[17].mxu0 }
 0x72e   : > { %v999_v44 = vpop.f32.mrb[18].mxu0 }
 0x72f   : > { %v2337_v45 = vpop.f32.mrb[19].mxu0  ;;  %v1002_v46 = vsel %vm584_vm10, %v997_v42, -inf }
 0x730   : > { %1003 = vmax.xlane.f32.xlu0 %v1002_v46 }
 0x746   : > { %1025 = vperm.xlu0 %2476, %v1022_v47  }
 0x7bd   : > { %v1004_v49 = vpop.xlane.xlu0 %1003 }
 0x7be   : > { %v1005_v50 = vsub.f32 %v997_v42, %v1004_v49 }
 0x7c0   : > { %v1006_v51 = vmul.f32 1.442695, %v1005_v50 }
 0x7c2   : > { %2510 = vpow2.f32 %v1006_v51 }
 0x7c5   : > { %v1026_v62 = vpop.permute.xlu0 %1025 }
 0x7cc   : > { %v2511_v52 = vpop.eup %2510 }
 0x7cd   : > { %v1008_v53 = vsel %vm584_vm10, %v2511_v52, 0.0 }
 0x7ce   : > { %1009 = vadd.xlane.f32.xlu1 %v1008_v53 }
 0x85b   : > { %v1010_v55 = vpop.xlane.xlu1 %1009 }
 0x85c   : > { %2512 = vlog2.f32 %v1010_v55 }
 0x866   : > { %v2513_v59 = vpop.eup %2512 }
 0x867   : > { %v1012_v60 = vmul.f32 0.6931472, %v2513_v59 }
 0x869   : > { %v1013_v61 = vsub.f32 %v1005_v50, %v1012_v60 }
 0x86b   : > { %v1021_v63 = vsel %vm1020_vm6, -1e+30, %v1013_v61 }
 0x86c   : > { %v1028_v0 = vadd.f32 %v1026_v62, %v1021_v63 }
 0x86e   : > { %v2873_v1 = vsel %vm1038_vm12, -1e+30, %v1028_v0 }
 0x86f   : > { %v1044_v2 = vsel %vm1043_vm13, %v2873_v1, -inf  ;;  %v1240_v3 = vsel %vm1239_vm14, %v2873_v1, -inf  ;;  %v1269_v53 = vrot.slane %v2873_v1, 3 }
 0x870   : > { %1045 = vmax.xlane.f32.xlu1 %v1044_v2 }
 0x874   : > { %1241 = vmax.xlane.f32.xlu1 %v1240_v3 }
 0x8fd   : > { %v1046_v4 = vpop.xlane.xlu1 %1045 }
 0x8fe   : > { %v1048_v5 = vsel %vm1047_vm15, %v1046_v4, -inf }
 0x8ff   : > { %v1049_v6 = vrot.slane %v1048_v5, 4 }
 0x901   : > { %v1050_v9 = vmax.f32 %v1048_v5, %v1049_v6  ;;  %v1242_v10 = vpop.xlane.xlu1 %1241 }
 0x902   : > { %v1244_v11 = vsel %vm1243_vm0, %v1242_v10, -inf }
 0x903   : > { %v1051_v12 = vrot.slane %v1050_v9, 2  ;;  %v1245_v14 = vrot.slane %v1244_v11, 4 }
 0x905   : > { %v1052_v17 = vmax.f32 %v1050_v9, %v1051_v12  ;;  %v1246_v18 = vmax.f32 %v1244_v11, %v1245_v14 }
 0x907   : > { %v1053_v19 = vrot.slane %v1052_v17, 1  ;;  %v1247_v13 = vrot.slane %v1246_v18, 2 }
 0x909   : > { %v1248_v21 = vmax.f32 %v1246_v18, %v1247_v13  ;;  %v1054_v22 = vmax.f32 %v1052_v17, %v1053_v19 }
 0x90b   : > { %v1249_v16 = vrot.slane %v1248_v21, 1  ;;  %vm1055_vm3 = vcmp.eq.f32.partialorder %v2873_v1, %v1054_v22  ;;  %v1455_v9 = vsel %vm1031_vm1, %v1054_v22, 0.0 }
 0x90c   : > { %v1056_v23 = vsel %vm1055_vm3, %v2886_v20, 48.0 }
 0x90d   : > { %v1057_v25 = vsel %vm1043_vm13, %v1056_v23, inf  ;;  %v2892_v26 = vmax.f32 %v1248_v21, %v1249_v16 }
 0x90e   : > { %1058 = vmin.xlane.f32.xlu1 %v1057_v25 }
 0x90f   : > { %vm1251_vm4 = vcmp.eq.f32.partialorder %v2873_v1, %v2892_v26 }
 0x910   : > { %v1255_v27 = vsel %vm1251_vm4, %v1253_v24, 48.0 }
 0x911   : > { %v1256_v28 = vsel %vm1239_vm14, %v1255_v27, inf }
 0x912   : > { %1257 = vmin.xlane.f32.xlu1 %v1256_v28 }
 0x99b   : > { %v1059_v29 = vpop.xlane.xlu1 %1058 }
 0x99c   : > { %v1060_v30 = vsel %vm1047_vm15, %v1059_v29, inf }
 0x99d   : > { %v1061_v31 = vrot.slane %v1060_v30, 4 }
 0x99f   : > { %v1062_v33 = vmin.f32 %v1060_v30, %v1061_v31  ;;  %v1258_v34 = vpop.xlane.xlu1 %1257 }
 0x9a0   : > { %v1259_v35 = vsel %vm1243_vm0, %v1258_v34, inf }
 0x9a1   : > { %v1063_v36 = vrot.slane %v1062_v33, 2  ;;  %v1260_v38 = vrot.slane %v1259_v35, 4 }
 0x9a3   : > { %v1064_v39 = vmin.f32 %v1062_v33, %v1063_v36  ;;  %v1261_v40 = vmin.f32 %v1259_v35, %v1260_v38 }
 0x9a5   : > { %v1065_v41 = vrot.slane %v1064_v39, 1  ;;  %v1262_v42 = vrot.slane %v1261_v40, 2 }
 0x9a7   : > { %v1066_v43 = vmin.f32 %v1064_v39, %v1065_v41  ;;  %v1263_v44 = vmin.f32 %v1261_v40, %v1262_v42 }
 0x9a9   : > { %v2338_v45 = vtrunc.f32 %v1066_v43  ;;  %v1264_v46 = vrot.slane %v1263_v44, 1 }
 0x9ab   : > { %v2899_v47 = vcvt.f32.s32 %v2338_v45  ;;  %v1265_v48 = vmin.f32 %v1263_v44, %v1264_v46 }
 0x9ad   : > { %v2350_v49 = vtrunc.f32 %v1265_v48  ;;  %vm1068_vm5 = vcmp.eq.s32.totalorder %v2883_v15, %v2899_v47  ;;  %v1194_v30 = vshra.s32 %v2899_v47, 4  ;;  %v1193_v39 = vand.u32 15, %v2899_v47 }
 0x9ae   : > { %v2904_v50 = vsel %vm1068_vm5, -3e+38, %v2873_v1 }
 0x9af   : > { %v2906_v51 = vcvt.f32.s32 %v2350_v49  ;;  %v1070_v52 = vsel %vm1043_vm13, %v2904_v50, -inf  ;;  %vm1195_vm12 = vcmp.eq.s32.totalorder %v2858_v56, %v1194_v30  ;;  %v1223_v48 = vsel %vm1031_vm1, %v1193_v39, 0 }
 0x9b0   : > { %1071 = vmax.xlane.f32.xlu1 %v1070_v52  ;;  %v2227_v43 = vsel %vm1195_vm12, 1.0, %v3582_v7  ;;  %vm1231_vm12 = vcmp.eq.s32.totalorder %v2860_v57, 5 }
 0x9b1   : > { %vm1267_vm6 = vcmp.eq.s32.totalorder %v2883_v15, %v2906_v51  ;;  %v1396_v40 = vshra.s32 %v2906_v51, 4 }
 0x9b2   : > { %v2913_v54 = vsel %vm1267_vm6, -3e+38, %v1269_v53  ;;  %vm1226_vm6 = vcmp.eq.s32.totalorder %v2860_v57, 2 }
 0x9b3   : > { %v1272_v55 = vsel %vm1043_vm13, %v2913_v54, -inf  ;;  %vm1413_vm0 = vcmp.eq.s32.totalorder %v2858_v56, %v1396_v40 }
 0x9b4   : > { %1273 = vmax.xlane.f32.xlu1 %v1272_v55  ;;  %v1233_v55 = vsel %vm1031_vm1, %v2227_v43, 0.0 }
 0xa3d   : > { %v1072_v58 = vpop.xlane.xlu1 %1071 }
 0xa3e   : > { %v1073_v59 = vsel %vm1047_vm15, %v1072_v58, -inf }
 0xa3f   : > { %v1074_v60 = vrot.slane %v1073_v59, 4 }
 0xa41   : > { %v1075_v61 = vmax.f32 %v1073_v59, %v1074_v60  ;;  %v1274_v62 = vpop.xlane.xlu1 %1273 }
 0xa42   : > { %v1275_v63 = vsel %vm1047_vm15, %v1274_v62, -inf }
 0xa43   : > { %v1076_v0 = vrot.slane %v1075_v61, 2  ;;  %v1276_v2 = vrot.slane %v1275_v63, 4 }
 0xa45   : > { %v1077_v1 = vmax.f32 %v1075_v61, %v1076_v0  ;;  %v1277_v3 = vmax.f32 %v1275_v63, %v1276_v2 }
 0xa47   : > { %v1078_v4 = vrot.slane %v1077_v1, 1  ;;  %v1278_v5 = vrot.slane %v1277_v3, 2 }
 0xa49   : > { %v1279_v6 = vmax.f32 %v1277_v3, %v1278_v5  ;;  %v1079_v8 = vmax.f32 %v1077_v1, %v1078_v4 }
 0xa4b   : > { %v1280_v10 = vrot.slane %v1279_v6, 1  ;;  %vm1080_vm8 = vcmp.eq.f32.partialorder %v2904_v50, %v1079_v8  ;;  %v2925_v11 = vsel %vm1224_vm7, %v1079_v8, %v1455_v9 }
 0xa4c   : > { %v1081_v12 = vsel %vm1080_vm8, %v2886_v20, 48.0  ;;  %vm1229_vm8 = vcmp.eq.s32.totalorder %v2860_v57, 4 }
 0xa4d   : > { %v1082_v14 = vsel %vm1043_vm13, %v1081_v12, inf  ;;  %v2929_v17 = vmax.f32 %v1279_v6, %v1280_v10 }
 0xa4e   : > { %1083 = vmin.xlane.f32.xlu1 %v1082_v14 }
 0xa4f   : > { %vm1282_vm9 = vcmp.eq.f32.partialorder %v2913_v54, %v2929_v17 }
 0xa50   : > { %v1283_v18 = vsel %vm1282_vm9, %v2886_v20, 48.0 }
 0xa51   : > { %v1284_v19 = vsel %vm1043_vm13, %v1283_v18, inf }
 0xa52   : > { %1285 = vmin.xlane.f32.xlu1 %v1284_v19 }
 0xadb   : > { %v1084_v13 = vpop.xlane.xlu1 %1083 }
 0xadc   : > { %v1085_v21 = vsel %vm1047_vm15, %v1084_v13, inf }
 0xadd   : > { %v1086_v22 = vrot.slane %v1085_v21, 4 }
 0xadf   : > { %v1087_v16 = vmin.f32 %v1085_v21, %v1086_v22  ;;  %v1286_v23 = vpop.xlane.xlu1 %1285  ;;  %v3581_v21 = vstv %s2690_s17 }
 0xae0   : > { %v1287_v24 = vsel %vm1047_vm15, %v1286_v23, inf }
 0xae1   : > { %v1088_v25 = vrot.slane %v1087_v16, 2  ;;  %v1288_v27 = vrot.slane %v1287_v24, 4 }
 0xae3   : > { %v1089_v28 = vmin.f32 %v1087_v16, %v1088_v25  ;;  %v1289_v29 = vmin.f32 %v1287_v24, %v1288_v27 }
 0xae5   : > { %v1090_v31 = vrot.slane %v1089_v28, 1  ;;  %v1290_v33 = vrot.slane %v1289_v29, 2 }
 0xae7   : > { %v1091_v34 = vmin.f32 %v1089_v28, %v1090_v31  ;;  %v1291_v35 = vmin.f32 %v1289_v29, %v1290_v33 }
 0xae9   : > { %v2340_v36 = vtrunc.f32 %v1091_v34  ;;  %v1292_v38 = vrot.slane %v1291_v35, 1 }
 0xaeb   : > { %v2341_v41 = vcvt.f32.s32 %v2340_v36  ;;  %v1293_v42 = vmin.f32 %v1291_v35, %v1292_v38 }
 0xaed   : > { %v1198_v44 = vand.u32 15, %v2341_v41  ;;  %v1199_v45 = vshra.s32 %v2341_v41, 4  ;;  %v2352_v46 = vtrunc.f32 %v1293_v42  ;;  %vm1093_vm14 = vcmp.eq.s32.totalorder %v2883_v15, %v2341_v41 }
 0xaee   : > { %v2949_v47 = vsel %vm1093_vm14, -3e+38, %v2904_v50  ;;  %v2236_v50 = vsel %vm1413_vm0, 1.0, %v3582_v7  ;;  %vm1576_vm14 = vcmp.eq.s32.totalorder %v2858_v56, %v3581_v21  ;;  %vm1708_vm0 = vcmask 5120  }
 0xaef   : > { %vm1200_vm3 = vcmp.eq.s32.totalorder %v2858_v56, %v1199_v45  ;;  %v2954_v49 = vsel %vm1224_vm7, %v1198_v44, %v1223_v48  ;;  %v2956_v52 = vcvt.f32.s32 %v2352_v46  ;;  %v1095_v53 = vsel %vm1043_vm13, %v2949_v47, -inf }
 0xaf0   : > { %v2228_v58 = vsel %vm1200_vm3, 1.0, %v3582_v7  ;;  %1096 = vmax.xlane.f32.xlu1 %v1095_v53  ;;  %v1443_v63 = vsel %vm1031_vm1, %v2236_v50, 0.0  ;;  %vm1511_vm3 = vcmask 54272   ;;  %v1397_v46 = vadd.s32 3, %v1396_v40 }
 0xaf1   : > { %v2966_v59 = vsel %vm1224_vm7, %v2228_v58, %v1233_v55  ;;  %v1402_v60 = vshra.s32 %v2956_v52, 4  ;;  %vm1295_vm4 = vcmp.eq.s32.totalorder %v2883_v15, %v2956_v52 }
 0xaf2   : > { %v2972_v61 = vsel %vm1295_vm4, -3e+38, %v2913_v54 }
 0xaf3   : > { %vm1416_vm5 = vcmp.eq.s32.totalorder %v2858_v56, %v1402_v60  ;;  %v1297_v62 = vsel %vm1043_vm13, %v2972_v61, -inf }
 0xaf4   : > { %v2237_v0 = vsel %vm1416_vm5, 1.0, %v3582_v7  ;;  %1298 = vmax.xlane.f32.xlu0 %v1297_v62  ;;  %vm1398_vm5 = vcmp.eq.s32.totalorder %v2858_v56, %v1397_v46 }
 0xaf5   : > { %v2984_v2 = vsel %vm1224_vm7, %v2237_v0, %v1443_v63  ;;  %v1403_v63 = vadd.s32 3, %v1402_v60  ;;  %v2233_v40 = vsel %vm1398_vm5, 1.0, %v3582_v7 }
 0xb7d   : > { %v1097_v54 = vpop.xlane.xlu1 %1096 }
 0xb7e   : > { %v1098_v1 = vsel %vm1047_vm15, %v1097_v54, -inf }
 0xb7f   : > { %v1099_v3 = vrot.slane %v1098_v1, 4 }
 0xb81   : > { %v1100_v4 = vmax.f32 %v1098_v1, %v1099_v3  ;;  %v1299_v5 = vpop.xlane.xlu0 %1298  ;;  %v1395_v3 = vand.u32 15, %v2906_v51 }
 0xb82   : > { %v1300_v6 = vsel %vm1047_vm15, %v1299_v5, -inf }
 0xb83   : > { %v1101_v8 = vrot.slane %v1100_v4, 2  ;;  %v1301_v9 = vrot.slane %v1300_v6, 4 }
 0xb85   : > { %v1102_v10 = vmax.f32 %v1100_v4, %v1101_v8  ;;  %v1302_v12 = vmax.f32 %v1300_v6, %v1301_v9  ;;  %v1401_v8 = vand.u32 15, %v2956_v52 }
 0xb87   : > { %v1103_v14 = vrot.slane %v1102_v10, 1  ;;  %v1303_v18 = vrot.slane %v1302_v12, 2 }
 0xb89   : > { %v1304_v19 = vmax.f32 %v1302_v12, %v1303_v18  ;;  %v1104_v13 = vmax.f32 %v1102_v10, %v1103_v14 }
 0xb8b   : > { %v1305_v22 = vrot.slane %v1304_v19, 1  ;;  %vm1105_vm9 = vcmp.eq.f32.partialorder %v2949_v47, %v1104_v13  ;;  %v1457_v16 = vsel %vm1226_vm6, %v1104_v13, %v2925_v11  ;;  %v1577_v11 = vld [vmem:[%s3578_s13] sm:$0x3f] }
 0xb8c   : > { %v1106_v23 = vsel %vm1105_vm9, %v2886_v20, 48.0  ;;  %v1458_v24 = vsel %vm1032_vm2, %v2892_v26, %v1457_v16 }
 0xb8d   : > { %v1107_v25 = vsel %vm1043_vm13, %v1106_v23, inf  ;;  %v1306_v27 = vmax.f32 %v1304_v19, %v1305_v22  ;;  %v1459_v28 = vsel %vm1229_vm8, %v2929_v17, %v1458_v24 }
 0xb8e   : > { %1108 = vmin.xlane.f32.xlu1 %v1107_v25 }
 0xb8f   : > { %vm1307_vm4 = vcmp.eq.f32.partialorder %v2972_v61, %v1306_v27  ;;  %v1460_v26 = vsel %vm1231_vm12, %v1306_v27, %v1459_v28 }
 0xb90   : > { %v1308_v29 = vsel %vm1307_vm4, %v2886_v20, 48.0  ;;  %v1578_v30 = vsel %vm1576_vm14, %v1460_v26, %v1577_v11  ;;  %1709 = vst.msk [vmem:[#allocation4] sm:$0x3f] %vm1708_vm0, %v1460_v26  ;;  %vm1404_vm0 = vcmp.eq.s32.totalorder %v2858_v56, %v1403_v63 }
 0xb91   : > { %v1309_v31 = vsel %vm1043_vm13, %v1308_v29, inf  ;;  %1579 = vst.msk [vmem:[%s3578_s13] sm:$0x3f] %vm1511_vm3, %v1578_v30  ;;  %v2234_v22 = vsel %vm1404_vm0, 1.0, %v3582_v7 }
 0xb92   : > { %1310 = vmin.xlane.f32.xlu1 %v1309_v31 }
 0xc1b   : > { %v1109_v17 = vpop.xlane.xlu1 %1108 }
 0xc1c   : > { %v1110_v33 = vsel %vm1047_vm15, %v1109_v17, inf }
 0xc1d   : > { %v1111_v34 = vrot.slane %v1110_v33, 4 }
 0xc1f   : > { %v1112_v35 = vmin.f32 %v1110_v33, %v1111_v34  ;;  %v1311_v36 = vpop.xlane.xlu1 %1310 }
 0xc20   : > { %v1312_v38 = vsel %vm1047_vm15, %v1311_v36, inf }
 0xc21   : > { %v1113_v39 = vrot.slane %v1112_v35, 2  ;;  %v1313_v41 = vrot.slane %v1312_v38, 4 }
 0xc23   : > { %v1114_v42 = vmin.f32 %v1112_v35, %v1113_v39  ;;  %v1314_v43 = vmin.f32 %v1312_v38, %v1313_v41 }
 0xc25   : > { %v1115_v44 = vrot.slane %v1114_v42, 1  ;;  %v1315_v45 = vrot.slane %v1314_v43, 2 }
 0xc27   : > { %v1116_v48 = vmin.f32 %v1114_v42, %v1115_v44  ;;  %v1316_v53 = vmin.f32 %v1314_v43, %v1315_v45 }
 0xc29   : > { %v2342_v55 = vtrunc.f32 %v1116_v48  ;;  %v1317_v58 = vrot.slane %v1316_v53, 1 }
 0xc2b   : > { %v2343_v50 = vcvt.f32.s32 %v2342_v55  ;;  %v1318_v62 = vmin.f32 %v1316_v53, %v1317_v58 }
 0xc2d   : > { %v1203_v0 = vand.u32 15, %v2343_v50  ;;  %v1204_v54 = vshra.s32 %v2343_v50, 4  ;;  %v2354_v1 = vtrunc.f32 %v1318_v62  ;;  %vm1118_vm9 = vcmp.eq.s32.totalorder %v2883_v15, %v2343_v50 }
 0xc2e   : > { %v3030_v4 = vsel %vm1118_vm9, -3e+38, %v2949_v47 }
 0xc2f   : > { %vm1205_vm14 = vcmp.eq.s32.totalorder %v2858_v56, %v1204_v54  ;;  %v3036_v5 = vsel %vm1226_vm6, %v1203_v0, %v2954_v49  ;;  %v3038_v60 = vcvt.f32.s32 %v2354_v1  ;;  %v1120_v6 = vsel %vm1043_vm13, %v3030_v4, -inf }
 0xc30   : > { %v2229_v9 = vsel %vm1205_vm14, 1.0, %v3582_v7  ;;  %1121 = vmax.xlane.f32.xlu1 %v1120_v6  ;;  %v1452_v47 = vsel %vm1032_vm2, %v1395_v3, %v3036_v5 }
 0xc31   : > { %v3053_v49 = vsel %vm1226_vm6, %v2229_v9, %v2966_v59  ;;  %v1407_v10 = vand.u32 15, %v3038_v60  ;;  %v1408_v12 = vshra.s32 %v3038_v60, 4  ;;  %vm1320_vm4 = vcmp.eq.s32.totalorder %v2883_v15, %v3038_v60 }
 0xc32   : > { %v3060_v14 = vsel %vm1320_vm4, -3e+38, %v2972_v61  ;;  %v1449_v18 = vsel %vm1032_vm2, %v2233_v40, %v3053_v49  ;;  %v1453_v59 = vsel %vm1229_vm8, %v1401_v8, %v1452_v47 }
 0xc33   : > { %v1409_v19 = vadd.s32 3, %v1408_v12  ;;  %vm1419_vm5 = vcmp.eq.s32.totalorder %v2858_v56, %v1408_v12  ;;  %v1322_v13 = vsel %vm1043_vm13, %v3060_v14, -inf  ;;  %v1450_v16 = vsel %vm1229_vm8, %v2234_v22, %v1449_v18 }
 0xc34   : > { %v2238_v61 = vsel %vm1419_vm5, 1.0, %v3582_v7  ;;  %1323 = vmax.xlane.f32.xlu1 %v1322_v13  ;;  %v3080_v23 = vsel %vm1231_vm12, %v1407_v10, %v1453_v59 }
 0xc35   : > { %v3085_v24 = vsel %vm1226_vm6, %v2238_v61, %v2984_v2  ;;  %vm1410_vm9 = vcmp.eq.s32.totalorder %v2858_v56, %v1409_v19  ;;  %vm1710_vm14 = vcmp.eq.s32.totalorder %v2858_v56, %v3080_v23 }
 0xc36   : > { %v2235_v25 = vsel %vm1410_vm9, 1.0, %v3582_v7  ;;  %v2242_v27 = vsel %vm1710_vm14, 1.0, %v3582_v7 }
 0xc37   : > { %v3094_v28 = vsel %vm1231_vm12, %v2235_v25, %v1450_v16  ;;  %1713 = vst.msk [vmem:[#allocation5] sm:$0x3f] %vm584_vm10, %v2242_v27  ;;  %v1437_v27 = vsel %vm1031_vm1, %v1395_v3, 0 }
 0xcbd   : > { %v1122_v11 = vpop.xlane.xlu1 %1121 }
 0xcbe   : > { %v1123_v26 = vsel %vm1047_vm15, %v1122_v11, -inf  ;;  %v1438_v11 = vsel %vm1224_vm7, %v1401_v8, %v1437_v27 }
 0xcbf   : > { %v1124_v2 = vrot.slane %v1123_v26, 4 }
 0xcc1   : > { %v1125_v29 = vmax.f32 %v1123_v26, %v1124_v2  ;;  %v1324_v30 = vpop.xlane.xlu1 %1323 }
 0xcc2   : > { %v1325_v31 = vsel %vm1047_vm15, %v1324_v30, -inf }
 0xcc3   : > { %v1126_v17 = vrot.slane %v1125_v29, 2  ;;  %v1326_v33 = vrot.slane %v1325_v31, 4 }
 0xcc5   : > { %v1127_v34 = vmax.f32 %v1125_v29, %v1126_v17  ;;  %v1327_v35 = vmax.f32 %v1325_v31, %v1326_v33 }
 0xcc7   : > { %v1128_v36 = vrot.slane %v1127_v34, 1  ;;  %v1328_v38 = vrot.slane %v1327_v35, 2 }
 0xcc9   : > { %v1329_v39 = vmax.f32 %v1327_v35, %v1328_v38  ;;  %v1129_v41 = vmax.f32 %v1127_v34, %v1128_v36 }
 0xccb   : > { %v1330_v42 = vrot.slane %v1329_v39, 1  ;;  %vm1130_vm0 = vcmp.eq.f32.partialorder %v3030_v4, %v1129_v41 }
 0xccc   : > { %v1131_v43 = vsel %vm1130_vm0, %v2886_v20, 48.0 }
 0xccd   : > { %v1132_v44 = vsel %vm1043_vm13, %v1131_v43, inf  ;;  %v1331_v45 = vmax.f32 %v1329_v39, %v1330_v42 }
 0xcce   : > { %1133 = vmin.xlane.f32.xlu1 %v1132_v44 }
 0xccf   : > { %vm1332_vm10 = vcmp.eq.f32.partialorder %v3060_v14, %v1331_v45 }
 0xcd0   : > { %v1333_v46 = vsel %vm1332_vm10, %v2886_v20, 48.0 }
 0xcd1   : > { %v1334_v48 = vsel %vm1043_vm13, %v1333_v46, inf }
 0xcd2   : > { %1335 = vmin.xlane.f32.xlu1 %v1334_v48 }
 0xd5b   : > { %v1134_v53 = vpop.xlane.xlu1 %1133 }
 0xd5c   : > { %v1135_v55 = vsel %vm1047_vm15, %v1134_v53, inf }
 0xd5d   : > { %v1136_v58 = vrot.slane %v1135_v55, 4 }
 0xd5f   : > { %v1137_v50 = vmin.f32 %v1135_v55, %v1136_v58  ;;  %v1336_v62 = vpop.xlane.xlu1 %1335 }
 0xd60   : > { %v1337_v63 = vsel %vm1047_vm15, %v1336_v62, inf }
 0xd61   : > { %v1138_v0 = vrot.slane %v1137_v50, 2  ;;  %v1338_v54 = vrot.slane %v1337_v63, 4 }
 0xd63   : > { %v1139_v1 = vmin.f32 %v1137_v50, %v1138_v0  ;;  %v1339_v40 = vmin.f32 %v1337_v63, %v1338_v54 }
 0xd65   : > { %v1140_v6 = vrot.slane %v1139_v1, 1  ;;  %v1340_v9 = vrot.slane %v1339_v40, 2 }
 0xd67   : > { %v1141_v47 = vmin.f32 %v1139_v1, %v1140_v6  ;;  %v1341_v12 = vmin.f32 %v1339_v40, %v1340_v9 }
 0xd69   : > { %v2344_v18 = vtrunc.f32 %v1141_v47  ;;  %v1342_v59 = vrot.slane %v1341_v12, 1 }
 0xd6b   : > { %v3107_v19 = vcvt.f32.s32 %v2344_v18  ;;  %v1343_v13 = vmin.f32 %v1341_v12, %v1342_v59 }
 0xd6d   : > { %v2356_v22 = vtrunc.f32 %v1343_v13  ;;  %vm1143_vm4 = vcmp.eq.s32.totalorder %v2883_v15, %v3107_v19  ;;  %v1209_v6 = vshra.s32 %v3107_v19, 4 }
 0xd6e   : > { %v3112_v61 = vsel %vm1143_vm4, -3e+38, %v3030_v4  ;;  %v1439_v4 = vsel %vm1226_vm6, %v1407_v10, %v1438_v11 }
 0xd6f   : > { %v2357_v16 = vcvt.f32.s32 %v2356_v22  ;;  %v1145_v25 = vsel %vm1043_vm13, %v3112_v61, -inf  ;;  %vm1210_vm9 = vcmp.eq.s32.totalorder %v2858_v56, %v1209_v6  ;;  %v1208_v22 = vand.u32 15, %v3107_v19 }
 0xd70   : > { %1146 = vmax.xlane.f32.xlu1 %v1145_v25  ;;  %v2230_v27 = vsel %vm1210_vm9, 1.0, %v3582_v7  ;;  %vm1567_vm9 = vcmask 1043459  }
 0xd71   : > { %v1422_v26 = vand.u32 15, %v2357_v16  ;;  %v1423_v2 = vshra.s32 %v2357_v16, 4  ;;  %vm1345_vm5 = vcmp.eq.s32.totalorder %v2883_v15, %v2357_v16 }
 0xd72   : > { %v3130_v51 = vsel %vm1345_vm5, -3e+38, %v3060_v14  ;;  %vm1563_vm5 = vcmask 1041409  }
 0xd73   : > { %vm1424_vm1 = vcmp.eq.s32.totalorder %v2858_v56, %v1423_v2  ;;  %v3135_v52 = vsel %vm1032_vm2, %v1422_v26, %v1439_v4  ;;  %v1347_v3 = vsel %vm1043_vm13, %v3130_v51, -inf  ;;  %v1228_v4 = vsel %vm1032_vm2, %v1208_v22, %v3036_v5 }
 0xd74   : > { %v2239_v8 = vsel %vm1424_vm1, 1.0, %v3582_v7  ;;  %1348 = vmax.xlane.f32.xlu1 %v1347_v3 }
 0xd75   : > { %v3143_v60 = vsel %vm1032_vm2, %v2239_v8, %v3085_v24 }
 0xdfd   : > { %v1147_v10 = vpop.xlane.xlu1 %1146 }
 0xdfe   : > { %v1148_v14 = vsel %vm1047_vm15, %v1147_v10, -inf }
 0xdff   : > { %v1149_v29 = vrot.slane %v1148_v14, 4 }
 0xe01   : > { %v1150_v30 = vmax.f32 %v1148_v14, %v1149_v29  ;;  %v1349_v31 = vpop.xlane.xlu1 %1348  ;;  %v1236_v14 = vsel %vm1032_vm2, %v2230_v27, %v3053_v49  ;;  %vm1650_vm2 = vcmask 521472  }
 0xe02   : > { %v1350_v17 = vsel %vm1047_vm15, %v1349_v31, -inf }
 0xe03   : > { %v1151_v33 = vrot.slane %v1150_v30, 2  ;;  %v1351_v34 = vrot.slane %v1350_v17, 4 }
 0xe05   : > { %v1152_v35 = vmax.f32 %v1150_v30, %v1151_v33  ;;  %v1352_v36 = vmax.f32 %v1350_v17, %v1351_v34  ;;  %v3203_v34 = vsub.s32 0, %v2860_v57 }
 0xe07   : > { %v1153_v38 = vrot.slane %v1152_v35, 1  ;;  %v1353_v39 = vrot.slane %v1352_v36, 2 }
 0xe09   : > { %v1354_v41 = vmax.f32 %v1352_v36, %v1353_v39  ;;  %v1154_v42 = vmax.f32 %v1152_v35, %v1153_v38  ;;  %v1466_v36 = vrot.slane %v3094_v28, %v3203_v34  ;;  %v3213_v38 = vsub.s32 3, %v2860_v57 }
 0xe0a   : > { %v3218_v39 = vsub.s32 4, %v2860_v57 }
 0xe0b   : > { %v1355_v43 = vrot.slane %v1354_v41, 1  ;;  %vm1155_vm7 = vcmp.eq.f32.partialorder %v3112_v61, %v1154_v42  ;;  %v3223_v42 = vsub.s32 5, %v2860_v57 }
 0xe0c   : > { %v1156_v24 = vsel %vm1155_vm7, %v2886_v20, 48.0  ;;  %vm1565_vm7 = vcmask 1042434  }
 0xe0d   : > { %v1157_v44 = vsel %vm1043_vm13, %v1156_v24, inf  ;;  %v1356_v45 = vmax.f32 %v1354_v41, %v1355_v43  ;;  %v1487_v41 = vrot.slane %v3094_v28, %v3213_v38  ;;  %v1494_v43 = vrot.slane %v3094_v28, %v3218_v39 }
 0xe0e   : > { %1158 = vmin.xlane.f32.xlu0 %v1157_v44  ;;  %v1501_v24 = vrot.slane %v3094_v28, %v3223_v42  ;;  %v1461_v44 = vld [vmem:[%s3577_s12] sm:$0x3f] }
 0xe0f   : > { %vm1357_vm6 = vcmp.eq.f32.partialorder %v3130_v51, %v1356_v45 }
 0xe10   : > { %v1358_v46 = vsel %vm1357_vm6, %v2886_v20, 48.0 }
 0xe11   : > { %v1359_v48 = vsel %vm1043_vm13, %v1358_v46, inf  ;;  %v3232_v46 = vcvt.s32.f32 %v1461_v44 }
 0xe12   : > { %1360 = vmin.xlane.f32.xlu1 %v1359_v48 }
 0xe9b   : > { %v1159_v53 = vpop.xlane.xlu0 %1158 }
 0xe9c   : > { %v1160_v55 = vsel %vm1047_vm15, %v1159_v53, inf }
 0xe9d   : > { %v1161_v58 = vrot.slane %v1160_v55, 4 }
 0xe9f   : > { %v1162_v50 = vmin.f32 %v1160_v55, %v1161_v58  ;;  %v1361_v62 = vpop.xlane.xlu1 %1360 }
 0xea0   : > { %v1362_v63 = vsel %vm1047_vm15, %v1361_v62, inf }
 0xea1   : > { %v1163_v0 = vrot.slane %v1162_v50, 2  ;;  %v1363_v54 = vrot.slane %v1362_v63, 4 }
 0xea3   : > { %v1164_v1 = vmin.f32 %v1162_v50, %v1163_v0  ;;  %v1364_v40 = vmin.f32 %v1362_v63, %v1363_v54 }
 0xea5   : > { %v1165_v9 = vrot.slane %v1164_v1, 1  ;;  %v1365_v47 = vrot.slane %v1364_v40, 2 }
 0xea7   : > { %v1166_v12 = vmin.f32 %v1164_v1, %v1165_v9  ;;  %v1366_v18 = vmin.f32 %v1364_v40, %v1365_v47 }
 0xea9   : > { %v2346_v59 = vtrunc.f32 %v1166_v12  ;;  %v1367_v13 = vrot.slane %v1366_v18, 1 }
 0xeab   : > { %v2347_v16 = vcvt.f32.s32 %v2346_v59  ;;  %v1368_v25 = vmin.f32 %v1366_v18, %v1367_v13 }
 0xead   : > { %v1213_v11 = vand.u32 15, %v2347_v16  ;;  %v1214_v26 = vshra.s32 %v2347_v16, 4  ;;  %v2358_v2 = vtrunc.f32 %v1368_v25  ;;  %vm1168_vm14 = vcmp.eq.s32.totalorder %v2883_v15, %v2347_v16 }
 0xeae   : > { %v3164_v3 = vsel %vm1168_vm14, -3e+38, %v3112_v61 }
 0xeaf   : > { %vm1215_vm0 = vcmp.eq.s32.totalorder %v2858_v56, %v1214_v26  ;;  %v2359_v8 = vcvt.f32.s32 %v2358_v2  ;;  %v1170_v19 = vsel %vm1043_vm13, %v3164_v3, -inf  ;;  %v3171_v10 = vsel %vm1229_vm8, %v1213_v11, %v1228_v4 }
 0xeb0   : > { %v2231_v29 = vsel %vm1215_vm0, 1.0, %v3582_v7  ;;  %1171 = vmax.xlane.f32.xlu0 %v1170_v19  ;;  %vm1569_vm0 = vcmask 1044484  }
 0xeb1   : > { %v1427_v5 = vand.u32 15, %v2359_v8  ;;  %v1428_v61 = vshra.s32 %v2359_v8, 4  ;;  %vm1370_vm10 = vcmp.eq.s32.totalorder %v2883_v15, %v2359_v8  ;;  %v3180_v30 = vsel %vm1229_vm8, %v2231_v29, %v1236_v14 }
 0xeb2   : > { %v3183_v31 = vsel %vm1370_vm10, -3e+38, %v3130_v51  ;;  %v3200_v51 = vsub.s32 1, %v2860_v57  ;;  %vm1571_vm10 = vcmask 1045509  }
 0xeb3   : > { %vm1429_vm4 = vcmp.eq.s32.totalorder %v2858_v56, %v1428_v61  ;;  %v1372_v17 = vsel %vm1043_vm13, %v3183_v31, -inf  ;;  %v3191_v49 = vsel %vm1229_vm8, %v1427_v5, %v3135_v52  ;;  %v3208_v52 = vsub.s32 2, %v2860_v57 }
 0xeb4   : > { %v2240_v33 = vsel %vm1429_vm4, 1.0, %v3582_v7  ;;  %1373 = vmax.xlane.f32.xlu1 %v1372_v17  ;;  %v1473_v35 = vrot.slane %v3094_v28, %v3200_v51 }
 0xeb5   : > { %v3197_v15 = vsel %vm1229_vm8, %v2240_v33, %v3143_v60  ;;  %v1480_v60 = vrot.slane %v3094_v28, %v3208_v52  ;;  %vm1586_vm8 = vcmask 1046272  }
 0xec5   : > { %1475 = vbcast.lane.b32.xlu1 %v1473_v35, 256 }
 0xec6   : > { %1468 = vbcast.lane.b32.xlu0 %v1466_v36, 256 }
 0xec9   : > { %1482 = vbcast.lane.b32.xlu1 %v1480_v60, 256 }
 0xeca   : > { %1489 = vbcast.lane.b32.xlu0 %v1487_v41, 256 }
 0xecd   : > { %1496 = vbcast.lane.b32.xlu1 %v1494_v43, 256 }
 0xece   : > { %1503 = vbcast.lane.b32.xlu0 %v1501_v24, 256 }
 0xf3d   : > { %v1172_v45 = vpop.xlane.xlu0 %1171 }
 0xf3e   : > { %v1173_v48 = vsel %vm1047_vm15, %v1172_v45, -inf }
 0xf3f   : > { %v1174_v63 = vrot.slane %v1173_v48, 4 }
 0xf41   : > { %v1469_v53 = vpop.permute.xlu0 %1468  ;;  %v1374_v55 = vpop.xlane.xlu1 %1373  ;;  %v1175_v22 = vmax.f32 %v1173_v48, %v1174_v63 }
 0xf42   : > { %v1505_v58 = vmul.f32 %v1469_v53, %v3232_v46  ;;  %v1580_v50 = vmul.f32 %v1469_v53, %v2847_v37  ;;  %v1644_v28 = vmul.f32 %v1469_v53, %v2837_v32  ;;  %v1375_v62 = vsel %vm1047_vm15, %v1374_v55, -inf }
 0xf43   : > { %v1376_v40 = vrot.slane %v1375_v62, 4  ;;  %v1176_v29 = vrot.slane %v1175_v22, 2 }
 0xf44   : > { %v1512_v0 = vsel %vm1511_vm3, %v1505_v58, 0.0  ;;  %v1651_v54 = vsel %vm1650_vm2, %v1644_v28, 0.0  ;;  %v1587_v9 = vsel %vm1586_vm8, %v1580_v50, 0.0 }
 0xf45   : > { %v1513_v1 = vrot.slane %v1512_v0, 4  ;;  %v1490_v6 = vpop.permute.xlu0 %1489  ;;  %v1652_v47 = vrot.slane %v1651_v54, 4  ;;  %v1476_v13 = vpop.permute.xlu1 %1475  ;;  %v1588_v27 = vrot.slane %v1587_v9, 4  ;;  %v1377_v11 = vmax.f32 %v1375_v62, %v1376_v40 }
 0xf46   : > { %v1508_v12 = vmul.f32 %v1490_v6, %v3232_v46  ;;  %v1647_v18 = vmul.f32 %v1490_v6, %v2837_v32  ;;  %v1583_v4 = vmul.f32 %v1490_v6, %v2847_v37  ;;  %v1506_v8 = vmul.f32 %v1476_v13, %v3232_v46 }
 0xf47   : > { %v1514_v59 = vadd.f32 %v1513_v1, %v1512_v0  ;;  %v1653_v2 = vadd.f32 %v1652_v47, %v1651_v54  ;;  %v1589_v17 = vadd.f32 %v1588_v27, %v1587_v9  ;;  %v1378_v33 = vrot.slane %v1377_v11, 2 }
 0xf48   : > { %v1533_v16 = vsel %vm1511_vm3, %v1508_v12, 0.0  ;;  %v1672_v25 = vsel %vm1650_vm2, %v1647_v18, 0.0  ;;  %v1519_v61 = vsel %vm1511_vm3, %v1506_v8, 0.0  ;;  %v1608_v36 = vsel %vm1586_vm8, %v1583_v4, 0.0 }
 0xf49   : > { %v1534_v26 = vrot.slane %v1533_v16, 4  ;;  %v1515_v19 = vrot.slane %v1514_v59, 2  ;;  %v1673_v14 = vrot.slane %v1672_v25, 4  ;;  %v1654_v35 = vrot.slane %v1653_v2, 2  ;;  %v1504_v44 = vpop.permute.xlu0 %1503 }
 0xf4a   : > { %v1520_v60 = vrot.slane %v1519_v61, 4  ;;  %v1581_v24 = vmul.f32 %v1476_v13, %v2847_v37  ;;  %v3252_v45 = vmax.f32 %v1175_v22, %v1176_v29  ;;  %v1590_v55 = vrot.slane %v1589_v17, 2  ;;  %v1483_v22 = vpop.permute.xlu1 %1482 }
 0xf4b   : > { %v1535_v5 = vadd.f32 %v1534_v26, %v1533_v16  ;;  %v1516_v41 = vadd.f32 %v1515_v19, %v1514_v59  ;;  %v1674_v43 = vadd.f32 %v1673_v14, %v1672_v25  ;;  %v3254_v58 = vmax.f32 %v1377_v11, %v1378_v33 }
 0xf4c   : > { %v1521_v53 = vadd.f32 %v1520_v60, %v1519_v61  ;;  %v1609_v50 = vrot.slane %v1608_v36, 4  ;;  %v1645_v28 = vmul.f32 %v1476_v13, %v2837_v32  ;;  %v1655_v62 = vadd.f32 %v1654_v35, %v1653_v2 }
 0xf4d   : > { %v1536_v48 = vrot.slane %v1535_v5, 2  ;;  %v1510_v0 = vmul.f32 %v1504_v44, %v3232_v46  ;;  %v3258_v54 = vstv %s1560_s21  ;;  %v1517_v1 = vrot.slane %v1516_v41, 1 }
 0xf4e   : > { %v1522_v63 = vrot.slane %v1521_v53, 2  ;;  %v1675_v40 = vrot.slane %v1674_v43, 2  ;;  %v1594_v6 = vsel %vm1586_vm8, %v1581_v24, 0.0  ;;  %v1658_v9 = vsel %vm1650_vm2, %v1645_v28, 0.0 }
 0xf4f   : > { %v1178_v47 = vrot.slane %v3252_v45, 1  ;;  %v1537_v12 = vadd.f32 %v1536_v48, %v1535_v5  ;;  %v1659_v59 = vrot.slane %v1658_v9, 4  ;;  %v3263_v16 = vadd.f32 %v1590_v55, %v1589_v17 }
 0xf50   : > { %v1523_v18 = vadd.f32 %v1522_v63, %v1521_v53  ;;  %v1380_v13 = vrot.slane %v3254_v58, 1  ;;  %v3266_v25 = vadd.f32 %v1609_v50, %v1608_v36  ;;  %v1547_v27 = vsel %vm1511_vm3, %v1510_v0, 0.0  ;;  %v1497_v63 = vpop.permute.xlu1 %1496 }
 0xf51   : > { %v1595_v26 = vrot.slane %v1594_v6, 4  ;;  %v1660_v2 = vadd.f32 %v1659_v59, %v1658_v9  ;;  %v1548_v4 = vrot.slane %v1547_v27, 4  ;;  %v3269_v8 = vadd.f32 %v1517_v1, %v1516_v41 }
 0xf52   : > { %v1524_v11 = vrot.slane %v1523_v18, 1  ;;  %v1656_v19 = vrot.slane %v1655_v62, 1  ;;  %v3271_v14 = vadd.f32 %v1675_v40, %v1674_v43  ;;  %v1507_v29 = vmul.f32 %v1483_v22, %v3232_v46 }
 0xf53   : > { %v1538_v5 = vrot.slane %v1537_v12, 1  ;;  %v1549_v61 = vadd.f32 %v1548_v4, %v1547_v27  ;;  %v1585_v17 = vmul.f32 %v1504_v44, %v2847_v37  ;;  %v1649_v33 = vmul.f32 %v1504_v44, %v2837_v32 }
 0xf54   : > { %v1525_v36 = vadd.f32 %v1524_v11, %v1523_v18  ;;  %v1526_v60 = vsel %vm1511_vm3, %v1507_v29, 0.0  ;;  %v1582_v24 = vmul.f32 %v1483_v22, %v2847_v37  ;;  %v1611_v41 = vrot.slane %v3266_v25, 2 }
 0xf55   : > { %v3280_v48 = vadd.f32 %v1595_v26, %v1594_v6  ;;  %v1661_v43 = vrot.slane %v1660_v2, 2  ;;  %v1550_v53 = vrot.slane %v1549_v61, 2  ;;  %v2362_v55 = vtrunc.f32 %v3269_v8 }
 0xf56   : > { %v3283_v50 = vadd.f32 %v1656_v19, %v1655_v62  ;;  %v1677_v28 = vrot.slane %v3271_v14, 1  ;;  %v1527_v44 = vrot.slane %v1526_v60, 4  ;;  %v3286_v0 = vadd.f32 %v1538_v5, %v1537_v12 }
 0xf57   : > { %v3289_v1 = vsel %vm1586_vm8, %v1585_v17, 0.0  ;;  %v1686_v40 = vsel %vm1650_vm2, %v1649_v33, 0.0  ;;  %v1601_v6 = vsel %vm1586_vm8, %v1582_v24, 0.0  ;;  %v2364_v9 = vtrunc.f32 %v1525_v36 }
 0xf58   : > { %v1551_v18 = vadd.f32 %v1550_v53, %v1549_v61  ;;  %v1528_v59 = vadd.f32 %v1527_v44, %v1526_v60  ;;  %v1646_v27 = vmul.f32 %v1483_v22, %v2837_v32  ;;  %v1597_v62 = vrot.slane %v3280_v48, 2 }
 0xf59   : > { %v1662_v11 = vadd.f32 %v1661_v43, %v1660_v2  ;;  %v1509_v26 = vmul.f32 %v1497_v63, %v3232_v46  ;;  %v1584_v12 = vmul.f32 %v1497_v63, %v2847_v37  ;;  %v1623_v4 = vrot.slane %v3289_v1, 4 }
 0xf5a   : > { %v1529_v19 = vrot.slane %v1528_v59, 2  ;;  %v1602_v29 = vrot.slane %v1601_v6, 4  ;;  %v1665_v5 = vsel %vm1650_vm2, %v1646_v27, 0.0  ;;  %v1687_v17 = vrot.slane %v1686_v40, 4 }
 0xf5b   : > { %v1666_v33 = vrot.slane %v1665_v5, 4  ;;  %v1540_v61 = vsel %vm1511_vm3, %v1509_v26, 0.0  ;;  %v1615_v36 = vsel %vm1586_vm8, %v1584_v12, 0.0  ;;  %v2365_v22 = vcvt.f32.s32 %v2364_v9 }
 0xf5c   : > { %v1552_v60 = vrot.slane %v1551_v18, 1  ;;  %v1530_v24 = vadd.f32 %v1529_v19, %v1528_v59  ;;  %v1541_v2 = vrot.slane %v1540_v61, 4  ;;  %v1663_v43 = vrot.slane %v1662_v11, 1 }
 0xf5d   : > { %v1667_v46 = vadd.f32 %v1666_v33, %v1665_v5  ;;  %v1648_v37 = vmul.f32 %v1497_v63, %v2837_v32  ;;  %v1179_v53 = vmax.f32 %v3252_v45, %v1178_v47  ;;  %v1603_v21 = vadd.f32 %v1602_v29, %v1601_v6 }
 0xf5e   : > { %v1531_v44 = vrot.slane %v1530_v24, 1  ;;  %v1542_v7 = vadd.f32 %v1541_v2, %v1540_v61  ;;  %v1616_v27 = vrot.slane %v1615_v36, 4  ;;  %v1381_v9 = vmax.f32 %v3254_v58, %v1380_v13 }
 0xf5f   : > { %v1668_v35 = vrot.slane %v1667_v46, 2  ;;  %v1679_v26 = vsel %vm1650_vm2, %v1648_v37, 0.0  ;;  %vm1180_vm1 = vcmp.eq.f32.partialorder %v3164_v3, %v1179_v53  ;;  %v1553_v59 = vadd.f32 %v1552_v60, %v1551_v18 }
 0xf60   : > { %v1688_v12 = vadd.f32 %v1687_v17, %v1686_v40  ;;  %v1532_v32 = vadd.f32 %v1531_v44, %v1530_v24  ;;  %v1543_v63 = vrot.slane %v1542_v7, 2  ;;  %v1680_v47 = vrot.slane %v1679_v26, 4 }
 0xf61   : > { %v1669_v45 = vadd.f32 %v1668_v35, %v1667_v46  ;;  %v1181_v6 = vsel %vm1180_vm1, %v2886_v20, 48.0  ;;  %vm1382_vm6 = vcmp.eq.f32.partialorder %v3183_v31, %v1381_v9  ;;  %v1604_v29 = vrot.slane %v1603_v21, 2 }
 0xf62   : > { %v2366_v19 = vtrunc.f32 %v1532_v32  ;;  %v1544_v5 = vadd.f32 %v1543_v63, %v1542_v7  ;;  %v1617_v33 = vadd.f32 %v1616_v27, %v1615_v36  ;;  %v1681_v61 = vadd.f32 %v1680_v47, %v1679_v26 }
 0xf63   : > { %v1670_v3 = vrot.slane %v1669_v45, 1  ;;  %v1182_v58 = vsel %vm1043_vm13, %v1181_v6, inf  ;;  %v1383_v13 = vsel %vm1382_vm6, %v2886_v20, 48.0  ;;  %vm1562_vm14 = vcmp.eq.s32.totalorder %v2858_v56, %v3258_v54 }
 0xf64   : > { %v1689_v35 = vrot.slane %v1688_v12, 2  ;;  %v2367_v40 = vcvt.f32.s32 %v2366_v19  ;;  %v1545_v18 = vrot.slane %v1544_v5, 1  ;;  %1183 = vmin.xlane.f32.xlu1 %v1182_v58  ;;  %v1384_v31 = vsel %vm1043_vm13, %v1383_v13, inf }
 0xf65   : > { %v2363_v7 = vcvt.f32.s32 %v2362_v55  ;;  %v2368_v17 = vtrunc.f32 %v3286_v0  ;;  %v1598_v36 = vadd.f32 %v1597_v62, %v3280_v48  ;;  %v1682_v60 = vrot.slane %v1681_v61, 2  ;;  %1385 = vmin.xlane.f32.xlu0 %v1384_v31 }
 0xf66   : > { %v1664_v20 = vadd.f32 %v1663_v43, %v1662_v11  ;;  %v1605_v24 = vadd.f32 %v1604_v29, %v1603_v21  ;;  %v1546_v2 = vadd.f32 %v1545_v18, %v1544_v5  ;;  %v1618_v46 = vrot.slane %v1617_v33, 2 }
 0xf67   : > { %v2372_v37 = vtrunc.f32 %v1553_v59  ;;  %v1671_v53 = vadd.f32 %v1670_v3, %v1669_v45  ;;  %v1683_v44 = vadd.f32 %v1682_v60, %v1681_v61  ;;  %v1564_v27 = vsel %vm1563_vm5, %v2365_v22, %v2363_v7 }
 0xf68   : > { %v1624_v8 = vadd.f32 %v1623_v4, %v3289_v1  ;;  %v2370_v55 = vtrunc.f32 %v1546_v2  ;;  %v1566_v0 = vsel %vm1565_vm7, %v2367_v40, %v1564_v27  ;;  %v1690_v26 = vadd.f32 %v1689_v35, %v1688_v12 }
 0xf69   : > { %v2369_v48 = vcvt.f32.s32 %v2368_v17  ;;  %v1612_v21 = vadd.f32 %v1611_v41, %v3266_v25  ;;  %v1599_v62 = vrot.slane %v1598_v36, 1  ;;  %v1684_v11 = vrot.slane %v1683_v44, 1 }
 0xf6a   : > { %v1606_v43 = vrot.slane %v1605_v24, 1  ;;  %v2371_v9 = vcvt.f32.s32 %v2370_v55  ;;  %v1619_v59 = vadd.f32 %v1618_v46, %v1617_v33  ;;  %v1699_v22 = vsel %vm1563_vm5, %v1664_v20, %v3283_v50 }
 0xf6b   : > { %v2373_v32 = vcvt.f32.s32 %v2372_v37  ;;  %v1568_v1 = vsel %vm1567_vm9, %v2369_v48, %v1566_v0  ;;  %v1685_v4 = vadd.f32 %v1684_v11, %v1683_v44  ;;  %v1700_v63 = vsel %vm1565_vm7, %v1671_v53, %v1699_v22 }
 0xf6c   : > { %v1678_v12 = vadd.f32 %v1677_v28, %v3271_v14  ;;  %v1625_v45 = vrot.slane %v1624_v8, 2  ;;  %v1691_v25 = vrot.slane %v1690_v26, 1  ;;  %v1570_v41 = vsel %vm1569_vm0, %v2371_v9, %v1568_v1 }
 0xf6d   : > { %v1572_v47 = vsel %vm1571_vm10, %v2373_v32, %v1570_v41  ;;  %v1600_v6 = vadd.f32 %v1599_v62, %v1598_v36  ;;  %v1607_v29 = vadd.f32 %v1606_v43, %v1605_v24  ;;  %v1620_v14 = vrot.slane %v1619_v59, 1 }
 0xf6e   : > { %v1701_v19 = vsel %vm1567_vm9, %v1678_v12, %v1700_v63  ;;  %v3341_v50 = vsel %vm1562_vm14, %v3080_v23, %v1572_v47  ;;  %v3592_v28 = vrot.slane %v3263_v16, 1  ;;  %v1613_v3 = vrot.slane %v1612_v21, 1 }
 0xf6f   : > { %v1702_v5 = vsel %vm1569_vm0, %v1685_v4, %v1701_v19  ;;  %1574 = vst.msk [vmem:[%s3577_s12] sm:$0x3f] %vm1511_vm3, %v3341_v50  ;;  %v1692_v61 = vadd.f32 %v1691_v25, %v1690_v26  ;;  %v1626_v58 = vadd.f32 %v1625_v45, %v1624_v8  ;;  %v1621_v35 = vadd.f32 %v1620_v14, %v1619_v59 }
 0xf70   : > { %v1593_v33 = vadd.f32 %v3592_v28, %v3263_v16  ;;  %v1614_v18 = vadd.f32 %v1613_v3, %v1612_v21  ;;  %v3593_v25 = vmov 0.0  }
 0xf71   : > { %v1703_v23 = vsel %vm1571_vm10, %v1692_v61, %v1702_v5  ;;  %v1627_v31 = vrot.slane %v1626_v58, 1 }
 0xf72   : > { %v1635_v13 = vsel %vm1563_vm5, %v1600_v6, %v1593_v33 }
 0xf73   : > { %v1636_v40 = vsel %vm1565_vm7, %v1607_v29, %v1635_v13  ;;  %v1628_v36 = vadd.f32 %v1627_v31, %v1626_v58  ;;  %v3397_v13 = vcvt.s32.f32 (!%p2243_p12), %v3341_v50 }
 0xf74   : > { %v1637_v7 = vsel %vm1567_vm9, %v1614_v18, %v1636_v40 }
 0xf75   : > { %1704 = vrot.lane.b32.xlu1 %v1703_v23, %s2589_s18  ;;  %v1638_v17 = vsel %vm1569_vm0, %v1621_v35, %v1637_v7  ;;  %v3400_v35 = vrot.slane (!%p2243_p12), %v3397_v13, 3 }
 0xf76   : > { %v1639_v16 = vsel %vm1571_vm10, %v1628_v36, %v1638_v17 }
 0xf7b   : > { %1640 = vrot.lane.b32.xlu0 %v1639_v16, %s2583_s20 }
 0xff1   : > { %v1184_v60 = vpop.xlane.xlu1 %1183 }
 0xff2   : > { %v1185_v20 = vsel %vm1047_vm15, %v1184_v60, inf  ;;  %v1386_v24 = vpop.xlane.xlu0 %1385 }
 0xff3   : > { %v1186_v2 = vrot.slane %v1185_v20, 4  ;;  %v1387_v46 = vsel %vm1047_vm15, %v1386_v24, inf  ;;  %vm1767_vm15 = vcmask (!%p2243_p12), 51200  }
 0xff4   : > { %v1388_v37 = vrot.slane %v1387_v46, 4 }
 0xff5   : > { %v1187_v53 = vmin.f32 %v1185_v20, %v1186_v2  ;;  %v1705_v44 = vpop.permute.xlu1 %1704 }
 0xff6   : > { %v1389_v27 = vmin.f32 %v1387_v46, %v1388_v37  ;;  %1707 = vst.msk [vmem:[#allocation3] sm:$0x3f] %vm707_vm11, %v1705_v44  ;;  %v1641_v8 = vpop.permute.xlu0 %1640 }
 0xff7   : > { %v1188_v55 = vrot.slane %v1187_v53, 2  ;;  %1643 = vst.msk [vmem:[#allocation2] sm:$0x3f] %vm707_vm11, %v1641_v8 }
 0xff8   : > { %v1390_v0 = vrot.slane %v1389_v27, 2 }
 0xff9   : > { %v1189_v26 = vmin.f32 %v1187_v53, %v1188_v55 }
 0xffa   : > { %v1391_v48 = vmin.f32 %v1389_v27, %v1390_v0 }
 0xffb   : > { %v1190_v21 = vrot.slane %v1189_v26, 1 }
 0xffc   : > { %v1392_v62 = vrot.slane %v1391_v48, 1 }
 0xffd   : > { %v1191_v11 = vmin.f32 %v1189_v26, %v1190_v21 }
 0xffe   : > { %v1393_v43 = vmin.f32 %v1391_v48, %v1392_v62 }
 0xfff   : > { %v2348_v9 = vtrunc.f32 %v1191_v11 }
0x1000   : > { %v2360_v59 = vtrunc.f32 %v1393_v43 }
0x1001   : > { %v2349_v22 = vcvt.f32.s32 %v2348_v9 }
0x1002   : > { %v2361_v32 = vcvt.f32.s32 %v2360_v59  ;;  %1717 = sbr.rel (%p2243_p12) target bundleno = 4264 (0x10a8), region = 76 }
0x1003   : > { %v1218_v1 = vand.u32 15, %v2349_v22  ;;  %v1219_v4 = vshra.s32 %v2349_v22, 4 }
0x1004   : > { %v1432_v63 = vand.u32 15, %v2361_v32  ;;  %v1433_v12 = vshra.s32 %v2361_v32, 4 }
0x1005   : > { %vm1220_vm13 = vcmp.eq.s32.totalorder %v2858_v56, %v1219_v4  ;;  %v3367_v45 = vsel %vm1231_vm12, %v1218_v1, %v3171_v10 }
0x1006   : > { %v2232_v41 = vsel %vm1220_vm13, 1.0, %v3593_v25  ;;  %vm1434_vm11 = vcmp.eq.s32.totalorder %v2858_v56, %v1433_v12  ;;  %v3374_v47 = vsel %vm1231_vm12, %v1432_v63, %v3191_v49 }
0x1007   : > { %v1238_v6 = vsel %vm1231_vm12, %v2232_v41, %v3180_v30  ;;  %v2241_v19 = vsel %vm1434_vm11, 1.0, %v3593_v25 }
0x1008   : > { %v1448_v10 = vsel %vm1231_vm12, %v2241_v19, %v3197_v15  ;;  %v1722_v5 = vrot.slane (!%p2243_p12), %v1238_v6, %v3203_v34  ;;  %v1729_v14 = vrot.slane (!%p2243_p12), %v1238_v6, %v3200_v51  ;;  %v1736_v28 = vrot.slane (!%p2243_p12), %v1238_v6, %v3208_v52 }
0x1009   : > { %v1829_v29 = vrot.slane %v1448_v10, %v3203_v34  ;;  %v1836_v49 = vrot.slane %v1448_v10, %v3200_v51  ;;  %v1843_v30 = vrot.slane %v1448_v10, %v3208_v52  ;;  %v1850_v15 = vrot.slane %v1448_v10, %v3213_v38 }
0x100a   : > { %1724 = vbcast.lane.b32.xlu0 %v1722_v5, 256  ;;  %v1743_v33 = vrot.slane %v1238_v6, %v3213_v38  ;;  %v1857_v3 = vrot.slane %v1448_v10, %v3218_v39  ;;  %v1750_v61 = vrot.slane %v1238_v6, %v3218_v39  ;;  %v1864_v58 = vrot.slane %v1448_v10, %v3223_v42 }
0x100b   : > { %1831 = vbcast.lane.b32.xlu1 %v1829_v29, 256  ;;  %v1757_v23 = vrot.slane %v1238_v6, %v3223_v42 }
0x100e   : > { %1731 = vbcast.lane.b32.xlu0 %v1729_v14, 256 }
0x100f   : > { %1838 = vbcast.lane.b32.xlu1 %v1836_v49, 256 }
0x1012   : > { %1738 = vbcast.lane.b32.xlu0 %v1736_v28, 256 }
0x1013   : > { %1845 = vbcast.lane.b32.xlu1 %v1843_v30, 256 }
0x1016   : > { %1745 = vbcast.lane.b32.xlu0 %v1743_v33, 256 }
0x1017   : > { %1852 = vbcast.lane.b32.xlu1 %v1850_v15, 256 }
0x101a   : > { %1752 = vbcast.lane.b32.xlu0 %v1750_v61, 256 }
0x101b   : > { %1859 = vbcast.lane.b32.xlu1 %v1857_v3, 256 }
0x101e   : > { %1759 = vbcast.lane.b32.xlu0 %v1757_v23, 256 }
0x101f   : > { %1866 = vbcast.lane.b32.xlu1 %v1864_v58, 256 }
0x107c   : > { %v1725_v18 = vpop.permute.xlu0 %1724 }
0x107d   : > { %v1832_v40 = vpop.permute.xlu1 %1831  ;;  %v1761_v7 = vmul.f32 %v1725_v18, %v3397_v13 }
0x107e   : > { %v1871_v31 = vmul.f32 %v3400_v35, %v1832_v40 }
0x107f   : > { %v1768_v60 = vsel %vm1767_vm15, %v1761_v7, 0.0 }
0x1080   : > { %v1732_v36 = vpop.permute.xlu0 %1731  ;;  %v1877_v16 = vsel %vm1767_vm15, %v1871_v31, 0.0  ;;  %v1769_v53 = vrot.slane %v1768_v60, 4 }
0x1081   : > { %v1839_v17 = vpop.permute.xlu1 %1838  ;;  %v1762_v24 = vmul.f32 %v1732_v36, %v3397_v13  ;;  %v1878_v37 = vrot.slane %v1877_v16, 4 }
0x1082   : > { %v1872_v20 = vmul.f32 %v3400_v35, %v1839_v17  ;;  %v1770_v11 = vadd.f32 %v1769_v53, %v1768_v60 }
0x1083   : > { %v1775_v46 = vsel %vm1767_vm15, %v1762_v24, 0.0  ;;  %v1879_v62 = vadd.f32 %v1878_v37, %v1877_v16 }
0x1084   : > { %v1884_v2 = vsel %vm1767_vm15, %v1872_v20, 0.0  ;;  %v1776_v27 = vrot.slane %v1775_v46, 4  ;;  %v1739_v55 = vpop.permute.xlu0 %1738  ;;  %v1771_v10 = vrot.slane %v1770_v11, 2 }
0x1085   : > { %v1885_v44 = vrot.slane %v1884_v2, 4  ;;  %v1846_v8 = vpop.permute.xlu1 %1845  ;;  %v1763_v26 = vmul.f32 %v1739_v55, %v3397_v13  ;;  %v1880_v19 = vrot.slane %v1879_v62, 2 }
0x1086   : > { %v1873_v0 = vmul.f32 %v3400_v35, %v1846_v8  ;;  %v1777_v9 = vadd.f32 %v1776_v27, %v1775_v46  ;;  %v1772_v23 = vadd.f32 %v1771_v10, %v1770_v11 }
0x1087   : > { %v1782_v21 = vsel %vm1767_vm15, %v1763_v26, 0.0  ;;  %v1886_v43 = vadd.f32 %v1885_v44, %v1884_v2  ;;  %v1881_v58 = vadd.f32 %v1880_v19, %v1879_v62 }
0x1088   : > { %v1891_v48 = vsel %vm1767_vm15, %v1873_v0, 0.0  ;;  %v1746_v22 = vpop.permute.xlu0 %1745  ;;  %v1783_v1 = vrot.slane %v1782_v21, 4  ;;  %v1778_v5 = vrot.slane %v1777_v9, 2  ;;  %v1773_v55 = vrot.slane %v1772_v23, 1 }
0x1089   : > { %v1853_v59 = vpop.permute.xlu1 %1852  ;;  %v1892_v32 = vrot.slane %v1891_v48, 4  ;;  %v1764_v63 = vmul.f32 %v1746_v22, %v3397_v13  ;;  %v1887_v29 = vrot.slane %v1886_v43, 2  ;;  %v1882_v8 = vrot.slane %v1881_v58, 1 }
0x108a   : > { %v1874_v4 = vmul.f32 %v3400_v35, %v1853_v59  ;;  %v1784_v25 = vadd.f32 %v1783_v1, %v1782_v21  ;;  %v1779_v7 = vadd.f32 %v1778_v5, %v1777_v9 }
0x108b   : > { %v1893_v12 = vadd.f32 %v1892_v32, %v1891_v48  ;;  %v1789_v6 = vsel %vm1767_vm15, %v1764_v63, 0.0  ;;  %v1888_v31 = vadd.f32 %v1887_v29, %v1886_v43 }
0x108c   : > { %v1898_v41 = vsel %vm1767_vm15, %v1874_v4, 0.0  ;;  %v1790_v14 = vrot.slane %v1789_v6, 4  ;;  %v1753_v28 = vpop.permute.xlu0 %1752  ;;  %v1785_v33 = vrot.slane %v1784_v25, 2  ;;  %v1780_v26 = vrot.slane %v1779_v7, 1 }
0x108d   : > { %v1899_v49 = vrot.slane %v1898_v41, 4  ;;  %v1860_v30 = vpop.permute.xlu1 %1859  ;;  %v1894_v15 = vrot.slane %v1893_v12, 2  ;;  %v1765_v18 = vmul.f32 %v1753_v28, %v3397_v13  ;;  %v1889_v0 = vrot.slane %v1888_v31, 1 }
0x108e   : > { %v1791_v61 = vadd.f32 %v1790_v14, %v1789_v6  ;;  %v1875_v40 = vmul.f32 %v3400_v35, %v1860_v30  ;;  %v1786_v24 = vadd.f32 %v1785_v33, %v1784_v25  ;;  %v1774_v25 = vadd.f32 %v1773_v55, %v1772_v23 }
0x108f   : > { %v1900_v3 = vadd.f32 %v1899_v49, %v1898_v41  ;;  %v1796_v60 = vsel %vm1767_vm15, %v1765_v18, 0.0  ;;  %v1895_v20 = vadd.f32 %v1894_v15, %v1893_v12  ;;  %v1883_v12 = vadd.f32 %v1882_v8, %v1881_v58 }
0x1090   : > { %v1792_v36 = vrot.slane %v1791_v61, 2  ;;  %v1905_v16 = vsel %vm1767_vm15, %v1875_v40, 0.0  ;;  %v1760_v53 = vpop.permute.xlu0 %1759  ;;  %v1797_v27 = vrot.slane %v1796_v60, 4  ;;  %v1787_v9 = vrot.slane %v1786_v24, 1 }
0x1091   : > { %v1901_v17 = vrot.slane %v1900_v3, 2  ;;  %v1867_v37 = vpop.permute.xlu1 %1866  ;;  %v1906_v44 = vrot.slane %v1905_v16, 4  ;;  %v1766_v11 = vmul.f32 %v1760_v53, %v3397_v13  ;;  %v1896_v43 = vrot.slane %v1895_v20, 1 }
0x1092   : > { %v1793_v46 = vadd.f32 %v1792_v36, %v1791_v61  ;;  %v1798_v21 = vadd.f32 %v1797_v27, %v1796_v60  ;;  %v1876_v62 = vmul.f32 %v3400_v35, %v1867_v37  ;;  %v1890_v41 = vadd.f32 %v1889_v0, %v1888_v31 }
0x1093   : > { %v1902_v2 = vadd.f32 %v1901_v17, %v1900_v3  ;;  %v1907_v48 = vadd.f32 %v1906_v44, %v1905_v16  ;;  %v1803_v63 = vsel %vm1767_vm15, %v1766_v11, 0.0  ;;  %v1781_v6 = vadd.f32 %v1780_v26, %v1779_v7 }
0x1094   : > { %v1794_v22 = vrot.slane %v1793_v46, 1  ;;  %v1799_v1 = vrot.slane %v1798_v21, 2  ;;  %v1912_v4 = vsel %vm1767_vm15, %v1876_v62, 0.0  ;;  %v1804_v35 = vrot.slane %v1803_v63, 4  ;;  %v1926_v62 = vld [vmem:[#allocation6 + $0x8] sm:$0x3f] }
0x1095   : > { %v1903_v59 = vrot.slane %v1902_v2, 1  ;;  %v1908_v32 = vrot.slane %v1907_v48, 2  ;;  %v1913_v29 = vrot.slane %v1912_v4, 4  ;;  %v1897_v5 = vadd.f32 %v1896_v43, %v1895_v20  ;;  %v1817_v43 = vld [vmem:[#allocation6] sm:$0x3f] }
0x1096   : > { %v1800_v10 = vadd.f32 %v1799_v1, %v1798_v21  ;;  %v1788_v13 = vadd.f32 %v1787_v9, %v1786_v24  ;;  %v1795_v14 = vadd.f32 %v1794_v22, %v1793_v46  ;;  %v1805_v33 = vadd.f32 %v1804_v35, %v1803_v63 }
0x1097   : > { %v1909_v19 = vadd.f32 %v1908_v32, %v1907_v48  ;;  %v1904_v49 = vadd.f32 %v1903_v59, %v1902_v2  ;;  %v1914_v15 = vadd.f32 %v1913_v29, %v1912_v4  ;;  %v2388_v3 = vtrunc.f32 %v1890_v41 }
0x1098   : > { %v1801_v28 = vrot.slane %v1800_v10, 1  ;;  %v2376_v61 = vtrunc.f32 %v1781_v6  ;;  %v1806_v23 = vrot.slane %v1805_v33, 2  ;;  %v2386_v31 = vtrunc.f32 %v1883_v12 }
0x1099   : > { %v1910_v30 = vrot.slane %v1909_v19, 1  ;;  %v1915_v58 = vrot.slane %v1914_v15, 2  ;;  %v2374_v7 = vtrunc.f32 %v1774_v25  ;;  %v2390_v17 = vtrunc.f32 %v1897_v5 }
0x109a   : > { %v1802_v18 = vadd.f32 %v1801_v28, %v1800_v10  ;;  %v2378_v36 = vtrunc.f32 %v1788_v13  ;;  %v2392_v16 = vtrunc.f32 %v1904_v49  ;;  %v2380_v60 = vtrunc.f32 %v1795_v14 }
0x109b   : > { %v1911_v40 = vadd.f32 %v1910_v30, %v1909_v19  ;;  %v1916_v20 = vadd.f32 %v1915_v58, %v1914_v15  ;;  %v1807_v24 = vadd.f32 %v1806_v23, %v1805_v33  ;;  %v2389_v37 = vcvt.f32.s32 %v2388_v3 }
0x109c   : > { %v2382_v46 = vtrunc.f32 %v1802_v18  ;;  %v2377_v53 = vcvt.f32.s32 %v2376_v61  ;;  %v2387_v8 = vcvt.f32.s32 %v2386_v31  ;;  %v2375_v55 = vcvt.f32.s32 %v2374_v7 }
0x109d   : > { %v2394_v2 = vtrunc.f32 %v1911_v40  ;;  %v1917_v44 = vrot.slane %v1916_v20, 1  ;;  %v1808_v27 = vrot.slane %v1807_v24, 1  ;;  %v2391_v0 = vcvt.f32.s32 %v2390_v17 }
0x109e   : > { %v2379_v26 = vcvt.f32.s32 %v2378_v36  ;;  %v2393_v48 = vcvt.f32.s32 %v2392_v16  ;;  %v2381_v21 = vcvt.f32.s32 %v2380_v60  ;;  %v2383_v22 = vcvt.f32.s32 %v2382_v46 }
0x109f   : > { %v1918_v11 = vadd.f32 %v1917_v44, %v1916_v20  ;;  %v1809_v9 = vadd.f32 %v1808_v27, %v1807_v24  ;;  %v2395_v59 = vcvt.f32.s32 %v2394_v2  ;;  %v3594_v32 = vstv %s2690_s17 }
0x10a0   : > { %vm3429_vm12 = vcmp.le.s32.totalorder %v2858_v56, %v3594_v32  ;;  %v1928_v4 = vsel %vm1563_vm5, %v2389_v37, %v2387_v8  ;;  %v1819_v63 = vsel %vm1563_vm5, %v2377_v53, %v2375_v55  ;;  %v1927_v19 = vsel %vm1562_vm14, %v3374_v47, %v1926_v62 }
0x10a1   : > { %v2396_v12 = vtrunc.f32 %v1918_v11  ;;  %v2384_v25 = vtrunc.f32 %v1809_v9  ;;  %v1929_v41 = vsel %vm1565_vm7, %v2391_v0, %v1928_v4  ;;  %v1820_v6 = vsel %vm1565_vm7, %v2379_v26, %v1819_v63 }
0x10a2   : > { %v1818_v10 = vsel %vm1562_vm14, %v3367_v45, %v1817_v43  ;;  %v1930_v29 = vsel %vm1567_vm9, %v2393_v48, %v1929_v41  ;;  %v1821_v35 = vsel %vm1567_vm9, %v2381_v21, %v1820_v6 }
0x10a3   : > { %v2397_v5 = vcvt.f32.s32 %v2396_v12  ;;  %v2385_v13 = vcvt.f32.s32 %v2384_v25  ;;  %v1931_v49 = vsel %vm1569_vm0, %v2395_v59, %v1930_v29  ;;  %v1822_v14 = vsel %vm1569_vm0, %v2383_v22, %v1821_v35 }
0x10a5   : > { %v1932_v30 = vsel %vm1571_vm10, %v2397_v5, %v1931_v49  ;;  %v1823_v28 = vsel %vm1571_vm10, %v2385_v13, %v1822_v14 }
0x10a6   : > { %v1933_v47 = vsel %vm3429_vm12, %v1932_v30, %v1927_v19  ;;  %v1824_v54 = vsel %vm3429_vm12, %v1823_v28, %v1818_v10 }
0x10a7   : > { %1934 = vst.msk [vmem:[#allocation6 + $0x8] sm:$0x3f] %vm1511_vm3, %v1933_v47  ;;  %1825 = vst.msk [vmem:[#allocation6] sm:$0x3f] %vm1511_vm3, %v1824_v54 }
0x10a8 PF: > { %p2244_p13 = scmp.gt.s32.totalorder %s2690_s17, 1 }
0x10a9   : > { %vm1939_vm4 = vcmp.eq.s32.totalorder (!%p2244_p13), %v2860_v57, %v2858_v56  ;;  %v2590_v45 = vmov (!%p2244_p13), 0.0   ;;  %v3467_v56 = vcvt.s32.f32 (!%p2244_p13), %v3341_v50  ;;  %vm1991_vm2 = vcmask (!%p2244_p13), 51200  }
0x10aa   : > { %1938 = sbr.rel (%p2244_p13) target bundleno = 4423 (0x1147), region = 80  ;;  %v2245_v15 = vsel (!%p2244_p13), %vm1939_vm4, 1.0, %v2590_v45  ;;  %vm2040_vm8 = vcmp.lt.s32.totalorder (!%p2244_p13), %v2860_v57, 3 }
0x10ab   : > { %v1960_v33 = vrot.slane (!%p2244_p13), %v2245_v15, %v3208_v52  ;;  %v1946_v3 = vrot.slane (!%p2244_p13), %v2245_v15, %v3203_v34  ;;  %v1967_v61 = vrot.slane (!%p2244_p13), %v2245_v15, %v3213_v38  ;;  %v1953_v40 = vrot.slane (!%p2244_p13), %v2245_v15, %v3200_v51 }
0x10ac   : > { %v1981_v18 = vrot.slane (!%p2244_p13), %v2245_v15, %v3223_v42  ;;  %v1974_v58 = vrot.slane (!%p2244_p13), %v2245_v15, %v3218_v39  ;;  %v3470_v52 = vrot.slane (!%p2244_p13), %v3467_v56, 3 }
0x10ad   : > { %1962 = vbcast.lane.b32.xlu1 (!%p2244_p13), %v1960_v33, 256  ;;  %1948 = vbcast.lane.b32.xlu0 (!%p2244_p13), %v1946_v3, 256 }
0x10b1   : > { %1969 = vbcast.lane.b32.xlu1 %v1967_v61, 256  ;;  %1955 = vbcast.lane.b32.xlu0 %v1953_v40, 256 }
0x10b5   : > { %1983 = vbcast.lane.b32.xlu1 %v1981_v18, 256  ;;  %1976 = vbcast.lane.b32.xlu0 %v1974_v58, 256 }
0x111f   : > { %v1963_v34 = vpop.permute.xlu1 %1962  ;;  %v1949_v23 = vpop.permute.xlu0 %1948 }
0x1120   : > { %v1987_v38 = vmul.f32 %v1963_v34, %v3467_v56  ;;  %v2054_v51 = vmul.f32 %v3470_v52, %v1963_v34  ;;  %v1985_v31 = vmul.f32 %v1949_v23, %v3467_v56  ;;  %v2052_v42 = vmul.f32 %v3470_v52, %v1949_v23 }
0x1122   : > { %v2006_v39 = vsel %vm1991_vm2, %v1987_v38, 0.0  ;;  %v2072_v7 = vsel %vm1991_vm2, %v2054_v51, 0.0  ;;  %v1992_v50 = vsel %vm1991_vm2, %v1985_v31, 0.0  ;;  %v2058_v17 = vsel %vm1991_vm2, %v2052_v42, 0.0 }
0x1123   : > { %v2007_v36 = vrot.slane %v2006_v39, 4  ;;  %v2073_v16 = vrot.slane %v2072_v7, 4  ;;  %v1993_v60 = vrot.slane %v1992_v50, 4  ;;  %v2059_v20 = vrot.slane %v2058_v17, 4  ;;  %v1970_v24 = vpop.permute.xlu1 %1969  ;;  %v1956_v2 = vpop.permute.xlu0 %1955 }
0x1124   : > { %v1988_v46 = vmul.f32 %v1970_v24, %v3467_v56  ;;  %v2055_v37 = vmul.f32 %v3470_v52, %v1970_v24  ;;  %v1986_v53 = vmul.f32 %v1956_v2, %v3467_v56  ;;  %v2053_v44 = vmul.f32 %v3470_v52, %v1956_v2 }
0x1125   : > { %v1994_v27 = vadd.f32 %v1993_v60, %v1992_v50  ;;  %v2060_v8 = vadd.f32 %v2059_v20, %v2058_v17  ;;  %v2008_v21 = vadd.f32 %v2007_v36, %v2006_v39  ;;  %v2074_v62 = vadd.f32 %v2073_v16, %v2072_v7 }
0x1126   : > { %v2013_v55 = vsel %vm1991_vm2, %v1988_v46, 0.0  ;;  %v2079_v0 = vsel %vm1991_vm2, %v2055_v37, 0.0  ;;  %v1999_v26 = vsel %vm1991_vm2, %v1986_v53, 0.0  ;;  %v2065_v48 = vsel %vm1991_vm2, %v2053_v44, 0.0 }
0x1127   : > { %v1995_v11 = vrot.slane %v1994_v27, 2  ;;  %v2061_v43 = vrot.slane %v2060_v8, 2  ;;  %v2014_v9 = vrot.slane %v2013_v55, 4  ;;  %v2080_v59 = vrot.slane %v2079_v0, 4  ;;  %v1984_v15 = vpop.permute.xlu1 %1983  ;;  %v1977_v33 = vpop.permute.xlu0 %1976 }
0x1128   : > { %v2000_v22 = vrot.slane %v1999_v26, 4  ;;  %v2066_v32 = vrot.slane %v2065_v48, 4  ;;  %v2009_v25 = vrot.slane %v2008_v21, 2  ;;  %v2075_v41 = vrot.slane %v2074_v62, 2 }
0x1129   : > { %v2015_v1 = vadd.f32 %v2014_v9, %v2013_v55  ;;  %v2081_v4 = vadd.f32 %v2080_v59, %v2079_v0  ;;  %v1996_v6 = vadd.f32 %v1995_v11, %v1994_v27  ;;  %v2062_v19 = vadd.f32 %v2061_v43, %v2060_v8 }
0x112a   : > { %v2001_v63 = vadd.f32 %v2000_v22, %v1999_v26  ;;  %v2067_v12 = vadd.f32 %v2066_v32, %v2065_v48  ;;  %v2010_v14 = vadd.f32 %v2009_v25, %v2008_v21  ;;  %v2076_v30 = vadd.f32 %v2075_v41, %v2074_v62 }
0x112b   : > { %v2016_v35 = vrot.slane %v2015_v1, 2  ;;  %v2082_v5 = vrot.slane %v2081_v4, 2  ;;  %v1997_v28 = vrot.slane %v1996_v6, 1  ;;  %v2063_v47 = vrot.slane %v2062_v19, 1 }
0x112c   : > { %v2002_v10 = vrot.slane %v2001_v63, 2  ;;  %v2068_v29 = vrot.slane %v2067_v12, 2  ;;  %v1990_v58 = vmul.f32 %v1984_v15, %v3467_v56  ;;  %v2057_v34 = vmul.f32 %v3470_v52, %v1984_v15 }
0x112d   : > { %v2017_v3 = vadd.f32 %v2016_v35, %v2015_v1  ;;  %v2083_v61 = vadd.f32 %v2082_v5, %v2081_v4  ;;  %v1989_v23 = vmul.f32 %v1977_v33, %v3467_v56  ;;  %v2056_v38 = vmul.f32 %v3470_v52, %v1977_v33 }
0x112e   : > { %v2003_v13 = vadd.f32 %v2002_v10, %v2001_v63  ;;  %v2069_v49 = vadd.f32 %v2068_v29, %v2067_v12  ;;  %v2011_v51 = vrot.slane %v2010_v14, 1  ;;  %v2077_v31 = vrot.slane %v2076_v30, 1 }
0x112f   : > { %v1998_v42 = vadd.f32 %v1997_v28, %v1996_v6  ;;  %v2064_v39 = vadd.f32 %v2063_v47, %v2062_v19  ;;  %v2027_v7 = vsel %vm1991_vm2, %v1990_v58, 0.0  ;;  %v2093_v50 = vsel %vm1991_vm2, %v2057_v34, 0.0 }
0x1130   : > { %v2004_v54 = vrot.slane %v2003_v13, 1  ;;  %v2070_v45 = vrot.slane %v2069_v49, 1  ;;  %v2020_v17 = vsel %vm1991_vm2, %v1989_v23, 0.0  ;;  %v2086_v36 = vsel %vm1991_vm2, %v2056_v38, 0.0 }
0x1131   : > { %v2018_v16 = vrot.slane %v2017_v3, 1  ;;  %v2084_v60 = vrot.slane %v2083_v61, 1  ;;  %v2028_v2 = vrot.slane %v2027_v7, 4  ;;  %v2094_v56 = vrot.slane %v2093_v50, 4 }
0x1132   : > { %v2005_v40 = vadd.f32 %v2004_v54, %v2003_v13  ;;  %v2071_v18 = vadd.f32 %v2070_v45, %v2069_v49  ;;  %v2021_v46 = vrot.slane %v2020_v17, 4  ;;  %v2087_v52 = vrot.slane %v2086_v36, 4 }
0x1133   : > { %v2012_v37 = vadd.f32 %v2011_v51, %v2010_v14  ;;  %v2078_v53 = vadd.f32 %v2077_v31, %v2076_v30  ;;  %v2398_v44 = vtrunc.f32 %v1998_v42  ;;  %v2410_v27 = vtrunc.f32 %v2064_v39 }
0x1134   : > { %v2400_v20 = vtrunc.f32 %v2005_v40  ;;  %v2412_v24 = vtrunc.f32 %v2071_v18  ;;  %v2029_v8 = vadd.f32 %v2028_v2, %v2027_v7  ;;  %v2095_v55 = vadd.f32 %v2094_v56, %v2093_v50  ;;  %v2041_v50 = vld [vmem:[#allocation6] sm:$0x3f] }
0x1135   : > { %v2019_v0 = vadd.f32 %v2018_v16, %v2017_v3  ;;  %v2085_v26 = vadd.f32 %v2084_v60, %v2083_v61  ;;  %v2022_v48 = vadd.f32 %v2021_v46, %v2020_v17  ;;  %v2088_v21 = vadd.f32 %v2087_v52, %v2086_v36  ;;  %v2107_v17 = vld [vmem:[#allocation6 + $0x8] sm:$0x3f] }
0x1136   : > { %v2401_v62 = vcvt.f32.s32 %v2400_v20  ;;  %v2413_v11 = vcvt.f32.s32 %v2412_v24  ;;  %v2030_v43 = vrot.slane %v2029_v8, 2  ;;  %v2096_v9 = vrot.slane %v2095_v55, 2 }
0x1137   : > { %v2402_v59 = vtrunc.f32 %v2012_v37  ;;  %v2414_v22 = vtrunc.f32 %v2078_v53  ;;  %v2023_v32 = vrot.slane %v2022_v48, 2  ;;  %v2089_v1 = vrot.slane %v2088_v21, 2 }
0x1138   : > { %v2399_v4 = vcvt.f32.s32 %v2398_v44  ;;  %v2411_v63 = vcvt.f32.s32 %v2410_v27  ;;  %v2031_v12 = vadd.f32 %v2030_v43, %v2029_v8  ;;  %v2097_v25 = vadd.f32 %v2096_v9, %v2095_v55 }
0x1139   : > { %v2404_v41 = vtrunc.f32 %v2019_v0  ;;  %v2416_v6 = vtrunc.f32 %v2085_v26  ;;  %v2024_v19 = vadd.f32 %v2023_v32, %v2022_v48  ;;  %v2090_v10 = vadd.f32 %v2089_v1, %v2088_v21 }
0x113a   : > { %v2042_v29 = vsel %vm1563_vm5, %v2401_v62, %v2399_v4  ;;  %v2108_v35 = vsel %vm1563_vm5, %v2413_v11, %v2411_v63  ;;  %v2032_v5 = vrot.slane %v2031_v12, 1  ;;  %v2098_v13 = vrot.slane %v2097_v25, 1 }
0x113b   : > { %v2403_v49 = vcvt.f32.s32 %v2402_v59  ;;  %v2415_v14 = vcvt.f32.s32 %v2414_v22  ;;  %v2025_v30 = vrot.slane %v2024_v19, 1  ;;  %v2091_v28 = vrot.slane %v2090_v10, 1 }
0x113c   : > { %v2033_v47 = vadd.f32 %v2032_v5, %v2031_v12  ;;  %v2099_v54 = vadd.f32 %v2098_v13, %v2097_v25  ;;  %v2405_v61 = vcvt.f32.s32 %v2404_v41  ;;  %v2417_v40 = vcvt.f32.s32 %v2416_v6 }
0x113d   : > { %v2043_v45 = vsel %vm1565_vm7, %v2403_v49, %v2042_v29  ;;  %v2109_v15 = vsel %vm1565_vm7, %v2415_v14, %v2108_v35  ;;  %v2026_v33 = vadd.f32 %v2025_v30, %v2024_v19  ;;  %v2092_v3 = vadd.f32 %v2091_v28, %v2090_v10 }
0x113e   : > { %v2408_v18 = vtrunc.f32 %v2033_v47  ;;  %v2420_v58 = vtrunc.f32 %v2099_v54  ;;  %v2044_v31 = vsel %vm1567_vm9, %v2405_v61, %v2043_v45  ;;  %v2110_v42 = vsel %vm1567_vm9, %v2417_v40, %v2109_v15 }
0x113f   : > { %v2406_v34 = vtrunc.f32 %v2026_v33  ;;  %v2418_v23 = vtrunc.f32 %v2092_v3 }
0x1140   : > { %v2409_v38 = vcvt.f32.s32 %v2408_v18  ;;  %v2421_v51 = vcvt.f32.s32 %v2420_v58 }
0x1141   : > { %v2407_v39 = vcvt.f32.s32 %v2406_v34  ;;  %v2419_v7 = vcvt.f32.s32 %v2418_v23 }
0x1143   : > { %v2045_v36 = vsel %vm1569_vm0, %v2407_v39, %v2044_v31  ;;  %v2111_v16 = vsel %vm1569_vm0, %v2419_v7, %v2110_v42 }
0x1144   : > { %v2046_v60 = vsel %vm1571_vm10, %v2409_v38, %v2045_v36  ;;  %v2112_v20 = vsel %vm1571_vm10, %v2421_v51, %v2111_v16 }
0x1145   : > { %v2047_v24 = vsel %vm2040_vm8, %v2046_v60, %v2041_v50  ;;  %v2113_v2 = vsel %vm2040_vm8, %v2112_v20, %v2107_v17 }
0x1146   : > { %2048 = vst.msk [vmem:[#allocation6] sm:$0x3f] %vm1511_vm3, %v2047_v24  ;;  %2114 = vst.msk [vmem:[#allocation6 + $0x8] sm:$0x3f] %vm1511_vm3, %v2113_v2 }
0x1147 PF: > { %s2251_s20 = sshll.u32 %s2690_s17, 8  ;;  %s2139_s26 = sshll.u32 %s2721_s27, 4  ;;  %s3520_s26 = int_to_ptr.vmem [resolvable:$true] %s2139_s26 }
0x1148   : > { %s3517_s21 = scalar_lea.hbm %s3579_s14, %s2251_s20  ;;  %s3597_s28 = sand.u32 1, %s2568_s30  }
0x1149   : > { %s3524_s18 = scalar_lea.sflag [#allocation8], %s3597_s28  ;;  %s2514_s1 = scalar_lea.vmem %s3520_s26, 256 }
0x114a   : > { %p2515_p0 = scmp.ne.s32.totalorder %s3520_s26, %s2514_s1  ;;  %s2591_s17 = smov [#allocation7]  }
0x114b   : > { %s2518_s2 = sshll.u32 %s2591_s17, 4  ;;  %s2519_s2 = int_to_ptr.vmem [resolvable:$false] %s2518_s2 }
0x114c   : > { %p2516_p1 = pnand %p2515_p0, %p2707_p5  ;;  %s2520_s25 = scalar_lea.vmem %s2519_s2, 512 }
0x114d   : > { %v2115_v56 = vld [vmem:[#allocation6] sm:$0x3f]  ;;  %v2116_v57 = vld [vmem:[#allocation6 + $0x8] sm:$0x3f]  ;;  %p2521_p3 = scmp.lt.s32.totalorder %s3520_s26, %s2519_s2  ;;  %p2522_p4 = scmp.lt.s32.totalorder %s2520_s25, %s2514_s1 }
0x114e   : > { %2117 = vst.msk [vmem:[%s2721_s27] sm:$0x3f] %vm1511_vm3, %v2115_v56  ;;  %2118 = vst.msk [vmem:[%s2721_s27 + $0x8] sm:$0x3f] %vm1511_vm3, %v2116_v57  ;;  %p2517_p2 = pneg %p2516_p1 }
0x114f   : > { %p2523_p7 = por %p2522_p4, %p2521_p3 }
0x1151   : > { %p2524_p8 = pnand %p2523_p7, %p2517_p2 }
0x1153   : > { %2527 = shalt.err (!%p2524_p8)
}
0x1154   : > { %s2528_s27 = scalar_lea.hbm %s3517_s21, 256  ;;  %s2532_s28 = scalar_lea.hbm %s3579_s14, 1536 }
0x1155   : > { %p2529_p9 = scmp.ne.s32.totalorder %s3517_s21, %s2528_s27  ;;  %p2533_p12 = scmp.lt.u32.totalorder %s3517_s21, %s3579_s14 }
0x1156   : > { %p2534_p13 = scmp.lt.u32.totalorder %s2532_s28, %s2528_s27  ;;  %p2536_p1 = scmp.lt.u32.totalorder %s2528_s27, %s3517_s21 }
0x1157   : > { %p2530_p10 = pnand %p2529_p9, %p2707_p5 }
0x1158   : > { %p2535_p0 = por %p2534_p13, %p2533_p12 }
0x1159   : > { %p2531_p11 = pneg %p2530_p10 }
0x115a   : > { %p2537_p2 = por %p2536_p1, %p2535_p0 }
0x115c   : > { %p2538_p3 = pnand %p2537_p2, %p2531_p11 }
0x115e   : > { %2541 = shalt.err (!%p2538_p3)
}
0x115f   : > { %s2592_s1 = smov 128   ;;  %s2593_s25 = smov 8  }
0x1160   : > { %2422 = dma.vmem_to_hbm [thread:$0]  (%p2707_p5), %s3520_s26, 256, %s3517_s21, %s3524_s18, %s2592_s1, %s2592_s1, %s2593_s25  }
0x1161 PF: > { %p2428_p4 = scmp.ge.s32.totalorder %s2576_s16, 2  ;;  %s2160_s20 = sand.u32 1, %s2564_s29  }
0x1162   : > { %s2161_s27 = scalar_lea.sflag [#allocation8], %s2160_s20 }
0x1163   : > { %p2425_p7 = pnand %p2428_p4, %p2711_p6 }
0x1165   : > { %2559 = dma.done.wait (!%p2425_p7), %s2161_s27, 256  }
0x1166   : > { %2561 = vsyncadd (!%p2425_p7), %s2161_s27, 4294967040  ;;  %p25_p8 = scmp.ge.s32.totalorder %s2694_s19, 8   ;;  %s3598_s29 = smov %s2568_s30 }
0x1167   : > { %s3599_s30 = smov %s2572_s15  ;;  %s3600_s15 = smov %s2705_s22 }
0x1168   : > { %s3601_s16 = smov %s2694_s19  ;;  %27 = sbr.rel (!%p25_p8) target bundleno = 7 (0x7), region = 130 }
0x116f   :  { %2166 = vsyncpa [#allocation8], 1 }
0x1170   :  { %2168 = vsyncpa [#allocation8 + $0x1], 1 }

</bundles_post_ra>
